<compile_context>
chip_gen: v5e
topology: v5e:2x2
jax: 0.10.0
libtpu: 0.0.40
codegen_flags: <defaults>
</compile_context>

<pallas_src>
import numpy as np

import jax
import jax.numpy as jnp
from jax.experimental import pallas as pl
from jax.experimental.pallas import tpu as pltpu


def _round_up(x, m):
    return (x + m - 1) // m * m


# ---------------------------------------------------------------------------
# The fused Pallas kernel
# ---------------------------------------------------------------------------
def _rt_fused_kernel(tab_ref, tv_ref, se3_ref, *refs):
    (w0, b0, w1, b1, w2, b2, w3, b3, w4, b4,
     w5a, w5b, b5, w6, b6, w7, b7, w8, b8, wf, bf, out_ref) = refs

    f32 = jnp.float32
    relu = lambda t: jnp.maximum(t, 0.0)

    # ---- FrameCode: Fourier embedding x one-hot(video), built on the lane axis ----
    tid = tv_ref[:, 0:1]          # (bm, 1)  time, already scaled by FrameCode.scale
    vid = tv_ref[:, 1:2]          # (bm, 1)  video index (exact small integer in f32)
    freq   = tab_ref[0:1, :]      # (1, Kp)  2^k per lane (dummy elsewhere)
    is_sin = tab_ref[1:2, :]
    is_x   = tab_ref[2:3, :]
    lane_v = tab_ref[3:4, :]
    valid  = tab_ref[4:5, :]

    arg = tid * freq                                              # (bm, Kp)
    emb = jnp.where(is_x > 0.5, tid,
                    jnp.where(is_sin > 0.5, jnp.sin(arg), jnp.cos(arg)))
    # NOTE: FrameCode builds Embedding(..., alpha=N_freqs), so the cosine window == 1.
    sel = (jnp.abs(lane_v - vid) < 0.5) & (valid > 0.5)
    coeff = jnp.where(sel, emb, 0.0).astype(f32)                  # (bm, Kp)

    # ---- basis_mlp (no activation) ----
    code = jnp.dot(coeff, w0[...], preferred_element_type=f32) + b0[...]

    # ---- BaseMLP: D=8, W=256, skip connection feeds `code` back in at layer 5 ----
    h = relu(jnp.dot(code, w1[...], preferred_element_type=f32) + b1[...])
    h = relu(jnp.dot(h, w2[...], preferred_element_type=f32) + b2[...])
    h = relu(jnp.dot(h, w3[...], preferred_element_type=f32) + b3[...])
    h = relu(jnp.dot(h, w4[...], preferred_element_type=f32) + b4[...])
    h = relu(jnp.dot(code, w5a[...], preferred_element_type=f32)  # cat([x, out]) @ W5
             + jnp.dot(h, w5b[...], preferred_element_type=f32) + b5[...])
    h = relu(jnp.dot(h, w6[...], preferred_element_type=f32) + b6[...])
    h = relu(jnp.dot(h, w7[...], preferred_element_type=f32) + b7[...])
    h = relu(jnp.dot(h, w8[...], preferred_element_type=f32) + b8[...])
    y = jnp.dot(h, wf[...], preferred_element_type=f32) + bf[...]  # (bm, 128); cols 0..5 used

    # ---- RTHead decode (use_quat=False): 0.1*trans + so3 exponential map ----
    tdx = y[:, 0:1] * 0.1
    tdy = y[:, 1:2] * 0.1
    tdz = y[:, 2:3] * 0.1
    rx = y[:, 3:4]
    ry = y[:, 4:5]
    rz = y[:, 5:6]
    nrm2 = rx * rx + ry * ry + rz * rz
    theta = jnp.sqrt(jnp.maximum(nrm2, 1e-4))        # pytorch3d so3_exponential_map eps
    inv_t = 1.0 / theta
    fac1 = inv_t * jnp.sin(theta)
    fac2 = inv_t * inv_t * (1.0 - jnp.cos(theta))
    d00 = 1.0 + fac2 * (-(ry * ry + rz * rz))
    d01 = fac1 * (-rz) + fac2 * (rx * ry)
    d02 = fac1 * (ry) + fac2 * (rx * rz)
    d10 = fac1 * (rz) + fac2 * (rx * ry)
    d11 = 1.0 + fac2 * (-(rx * rx + rz * rz))
    d12 = fac1 * (-rx) + fac2 * (ry * rz)
    d20 = fac1 * (-ry) + fac2 * (rx * rz)
    d21 = fac1 * (rx) + fac2 * (ry * rz)
    d22 = 1.0 + fac2 * (-(rx * rx + ry * ry))

    # ---- RTExplicit base: 0.1*trans + normalized quaternion -> rotation ----
    tbx = se3_ref[:, 0:1] * 0.1
    tby = se3_ref[:, 1:2] * 0.1
    tbz = se3_ref[:, 2:3] * 0.1
    qr = se3_ref[:, 3:4]
    qi = se3_ref[:, 4:5]
    qj = se3_ref[:, 5:6]
    qk = se3_ref[:, 6:7]
    qn = jnp.sqrt(qr * qr + qi * qi + qj * qj + qk * qk)
    inv_qn = 1.0 / jnp.maximum(qn, 1e-12)            # F.normalize eps
    qr = qr * inv_qn
    qi = qi * inv_qn
    qj = qj * inv_qn
    qk = qk * inv_qn
    two_s = 2.0 / (qr * qr + qi * qi + qj * qj + qk * qk)
    b00 = 1.0 - two_s * (qj * qj + qk * qk)
    b01 = two_s * (qi * qj - qk * qr)
    b02 = two_s * (qi * qk + qj * qr)
    b10 = two_s * (qi * qj + qk * qr)
    b11 = 1.0 - two_s * (qi * qi + qk * qk)
    b12 = two_s * (qj * qk - qi * qr)
    b20 = two_s * (qi * qk - qj * qr)
    b21 = two_s * (qj * qk + qi * qr)
    b22 = 1.0 - two_s * (qi * qi + qj * qj)
    # (base_rts * 10 - (base_rts * 9).detach()) is the identity in the forward pass.

    # ---- compose: R = Rb @ Rd, t = tb + Rb @ td ----
    r00 = b00 * d00 + b01 * d10 + b02 * d20
    r01 = b00 * d01 + b01 * d11 + b02 * d21
    r02 = b00 * d02 + b01 * d12 + b02 * d22
    r10 = b10 * d00 + b11 * d10 + b12 * d20
    r11 = b10 * d01 + b11 * d11 + b12 * d21
    r12 = b10 * d02 + b11 * d12 + b12 * d22
    r20 = b20 * d00 + b21 * d10 + b22 * d20
    r21 = b20 * d01 + b21 * d11 + b22 * d21
    r22 = b20 * d02 + b21 * d12 + b22 * d22
    tx = tbx + b00 * tdx + b01 * tdy + b02 * tdz
    ty = tby + b10 * tdx + b11 * tdy + b12 * tdz
    tz = tbz + b20 * tdx + b21 * tdy + b22 * tdz

    # Lane-dense assembly of the 12 result columns into the (bm, 128) output block.
    lane = jax.lax.broadcasted_iota(jnp.int32, (1, out_ref.shape[1]), 1)
    cols = [r00, r01, r02, r10, r11, r12, r20, r21, r22, tx, ty, tz]
    res = jnp.zeros(out_ref.shape, f32)
    for idx, col in enumerate(cols):
        res = res + jnp.where(lane == idx, col, 0.0)
    out_ref[...] = res.astype(out_ref.dtype)


def _rt_fused_pallas(tv, se3, ops, bm):
    """tv/se3: (bs_pad, 8) per-row inputs; ops: (lane_table, weights...)."""
    tab = ops[0]
    weights = ops[1:]
    bs_pad = tv.shape[0]
    grid = (bs_pad // bm,)

    def _tile(shape):
        return pl.BlockSpec((bm, shape[1]), lambda i: (i, 0))

    def _whole(a):
        n = a.ndim
        return pl.BlockSpec(a.shape, lambda i: (0,) * n)

    in_specs = [_whole(tab), _tile(tv.shape), _tile(se3.shape)]
    in_specs += [_whole(a) for a in weights]     # constant index_map -> stays VMEM-resident

    return pl.pallas_call(
        _rt_fused_kernel,
        out_shape=jax.ShapeDtypeStruct((bs_pad, 128), jnp.float32),
        grid=grid,
        in_specs=in_specs,
        out_specs=pl.BlockSpec((bm, 128), lambda i: (i, 0)),
        compiler_params=pltpu.CompilerParams(dimension_semantics=("parallel",)),
    )(tab, tv, se3, *weights)


# ---------------------------------------------------------------------------
# Parameter construction (deterministic synthetic params, PyTorch shapes)
# ---------------------------------------------------------------------------
def _uniform(key, shape, fan_in):
    bound = float(np.sqrt(6.0 / fan_in))     # He-uniform (keeps activations non-trivial)
    return jax.random.uniform(key, shape, jnp.float32, -bound, bound)


def _build_lane_table(num_vids, n_freq, kp):
    """Per-lane constants encoding FrameCode's (Fourier channel x video) flattening."""
    lane = np.arange(kp)
    c = lane // num_vids                      # embedding channel  (flat index = c*V + v)
    v = lane % num_vids                       # video slot
    n_chan = 1 + 2 * n_freq
    valid = (c < n_chan).astype(np.float32)
    is_x = ((c == 0) & (c < n_chan)).astype(np.float32)
    is_sin = (((c - 1) % 2 == 0) & (c >= 1) & (c < n_chan)).astype(np.float32)
    f_idx = np.clip((c - 1) // 2, 0, max(n_freq - 1, 0))
    if n_freq > 0:
        freq_bands = 2.0 ** np.linspace(0, n_freq - 1, n_freq)   # logscale freq bands
        freq = freq_bands[f_idx]
    else:
        freq = np.ones(kp)
    tab = np.zeros((8, kp), np.float32)
    tab[0] = freq
    tab[1] = is_sin
    tab[2] = is_x
    tab[3] = v.astype(np.float32)
    tab[4] = valid
    return jnp.asarray(tab)


def build_rt_exp_mlp(key, max_t, num_freqs, t_embed_dim, data_offset):
    data_offset = np.asarray(data_offset, np.int64)
    num_vids = int(len(data_offset) - 1)
    max_ts = float((data_offset[1:] - data_offset[:-1]).max())
    n_freq = (2 * int(np.log2(max_ts)) - 2) if num_freqs > 0 else 0
    n_chan = 2 * n_freq + 1                      # Embedding(1, n_freq).out_channels
    k0 = num_vids * n_chan                       # basis_mlp in-features
    E, Wd, D = int(t_embed_dim), 256, 8

    keys = jax.random.split(key, 16)
    params = {
        "basis_w": _uniform(keys[0], (k0, E), k0),
        "basis_b": jnp.zeros((E,), jnp.float32),          # reinit() zeroes all biases
        "fin_w": _uniform(keys[1], (Wd, 6), Wd),
        "fin_b": jnp.zeros((6,), jnp.float32),
        "lin_w": [],
        "lin_b": [],
    }
    for i in range(D):
        fan_in = E if i == 0 else (E + Wd if i == 4 else Wd)
        params["lin_w"].append(_uniform(keys[2 + i], (fan_in, Wd), fan_in))
        params["lin_b"].append(jnp.zeros((Wd,), jnp.float32))

    # RTExplicit(max_t, delta=False, rand=False): zero translation, identity quaternion.
    se3 = jnp.zeros((max_t, 7), jnp.float32).at[:, 3].set(1.0)

    # Padded / packed kernel operands (zero padding is numerically exact).
    kp = max(_round_up(k0, 128), 128)
    ep = max(_round_up(E, 128), 128)
    tab = _build_lane_table(num_vids, n_freq, kp)

    def pad2(m, r, c):
        return jnp.zeros((r, c), jnp.float32).at[: m.shape[0], : m.shape[1]].set(m)

    def pad_bias(b, c):
        return jnp.zeros((1, c), jnp.float32).at[0, : b.shape[0]].set(b)

    w5 = params["lin_w"][4]
    kernel_ops = (
        tab,
        pad2(params["basis_w"], kp, ep), pad_bias(params["basis_b"], ep),
        pad2(params["lin_w"][0], ep, Wd), pad_bias(params["lin_b"][0], Wd),
        params["lin_w"][1], pad_bias(params["lin_b"][1], Wd),
        params["lin_w"][2], pad_bias(params["lin_b"][2], Wd),
        params["lin_w"][3], pad_bias(params["lin_b"][3], Wd),
        pad2(w5[:E], ep, Wd), w5[E:], pad_bias(params["lin_b"][4], Wd),
        params["lin_w"][5], pad_bias(params["lin_b"][5], Wd),
        params["lin_w"][6], pad_bias(params["lin_b"][6], Wd),
        params["lin_w"][7], pad_bias(params["lin_b"][7], Wd),
        pad2(params["fin_w"], Wd, 128), pad_bias(params["fin_b"], 128),
    )

    return {
        "params": params,
        "se3": se3,
        "vid_offset": jnp.asarray(data_offset, jnp.int32),
        "num_vids": num_vids,
        "max_ts": max_ts,
        "num_freq": n_freq,
        "scale": 0.1,
        "kernel_ops": kernel_ops,
    }


# ---------------------------------------------------------------------------
# Forward wrapper (plain-JAX glue: index math + gather + row padding)
# ---------------------------------------------------------------------------
def make_forward(model, block_m=128):
    assert block_m % 8 == 0
    ker = model["kernel_ops"]
    se3 = model["se3"]
    vid_offset = model["vid_offset"]
    num_vids = model["num_vids"]
    max_ts = model["max_ts"]
    scale = model["scale"]

    def forward(fid):
        fid = fid.astype(jnp.int32)
        bs = fid.shape[0]

        # fid_reindex: global frame id -> (video id, normalized time within video)
        # TODO(synk): fid_reindex is not part of the provided snippet; reproduced from banmo.
        vid = jnp.clip(jnp.searchsorted(vid_offset, fid, side="right") - 1, 0, num_vids - 1)
        start = vid_offset[vid].astype(jnp.float32)
        doff = (vid_offset[vid + 1] - vid_offset[vid]).astype(jnp.float32)
        tid = (fid.astype(jnp.float32) - start - 0.5 * doff) / max_ts * 2.0
        tid = tid * scale                                   # FrameCode(scale=0.1)

        bm = min(block_m, _round_up(bs, 8))
        bs_pad = _round_up(bs, bm)

        tv = jnp.zeros((bs_pad, 8), jnp.float32)
        tv = tv.at[:bs, 0].set(tid).at[:bs, 1].set(vid.astype(jnp.float32))
        se3_rows = jnp.zeros((bs_pad, 8), jnp.float32).at[:, 3].set(1.0)   # safe pad rows
        se3_rows = se3_rows.at[:bs, :7].set(se3[fid])

        out = _rt_fused_pallas(tv, se3_rows, ker, bm)
        return out[:bs, :12].reshape(bs, 1, 12)

    return jax.jit(forward)


# ---------------------------------------------------------------------------
# Pure-JAX reference (mirrors the PyTorch forward) for validation
# ---------------------------------------------------------------------------
def _so3_exp_ref(log_rot, eps=1e-4):
    nrms = jnp.sum(log_rot * log_rot, axis=-1)
    theta = jnp.sqrt(jnp.maximum(nrms, eps))
    f1 = jnp.sin(theta) / theta
    f2 = (1.0 - jnp.cos(theta)) / (theta * theta)
    x, y, z = log_rot[:, 0], log_rot[:, 1], log_rot[:, 2]
    zero = jnp.zeros_like(x)
    K = jnp.stack([jnp.stack([zero, -z, y], -1),
                   jnp.stack([z, zero, -x], -1),
                   jnp.stack([-y, x, zero], -1)], axis=-2)
    K2 = jnp.einsum("bij,bjk->bik", K, K)
    return jnp.eye(3, dtype=log_rot.dtype)[None] + f1[:, None, None] * K + f2[:, None, None] * K2


def _quat_to_mat_ref(q):
    r, i, j, k = q[:, 0], q[:, 1], q[:, 2], q[:, 3]
    two_s = 2.0 / jnp.sum(q * q, axis=-1)
    o = jnp.stack(
        [1 - two_s * (j * j + k * k), two_s * (i * j - k * r), two_s * (i * k + j * r),
         two_s * (i * j + k * r), 1 - two_s * (i * i + k * k), two_s * (j * k - i * r),
         two_s * (i * k - j * r), two_s * (j * k + i * r), 1 - two_s * (i * i + j * j)],
        axis=-1)
    return o.reshape(-1, 3, 3)


def rt_exp_mlp_reference(fid, model):
    HI = jax.lax.Precision.HIGHEST
    p = model["params"]
    vid_offset, num_vids = model["vid_offset"], model["num_vids"]
    max_ts, scale, n_freq = model["max_ts"], model["scale"], model["num_freq"]

    fid = fid.astype(jnp.int32)
    vid = jnp.clip(jnp.searchsorted(vid_offset, fid, side="right") - 1, 0, num_vids - 1)
    start = vid_offset[vid].astype(jnp.float32)
    doff = (vid_offset[vid + 1] - vid_offset[vid]).astype(jnp.float32)
    tid = (fid.astype(jnp.float32) - start - 0.5 * doff) / max_ts * 2.0
    tid = (tid * scale)[:, None]

    outs = [tid]
    for f in range(n_freq):
        freq = 2.0 ** f
        outs += [jnp.sin(freq * tid), jnp.cos(freq * tid)]
    emb = jnp.concatenate(outs, axis=-1)                     # (bs, 1 + 2F)
    onehot = jax.nn.one_hot(vid, num_vids, dtype=jnp.float32)
    coeff = (emb[:, :, None] * onehot[:, None, :]).reshape(fid.shape[0], -1)

    code = jnp.dot(coeff, p["basis_w"], precision=HI) + p["basis_b"]
    h = code
    for i in range(8):
        if i == 4:
            h = jnp.concatenate([code, h], axis=-1)
        h = jax.nn.relu(jnp.dot(h, p["lin_w"][i], precision=HI) + p["lin_b"][i])
    y = jnp.dot(h, p["fin_w"], precision=HI) + p["fin_b"]

    t_d = y[:, :3] * 0.1
    R_d = _so3_exp_ref(y[:, 3:6])

    se3 = model["se3"][fid]
    t_b = se3[:, :3] * 0.1
    q = se3[:, 3:7]
    q = q / jnp.maximum(jnp.linalg.norm(q, axis=-1, keepdims=True), 1e-12)
    R_b = _quat_to_mat_ref(q)

    t = t_b + jnp.einsum("bij,bj->bi", R_b, t_d)
    R = jnp.einsum("bij,bjk->bik", R_b, R_d)
    return jnp.concatenate([R.reshape(-1, 9), t], axis=-1).reshape(-1, 1, 12)


# ---------------------------------------------------------------------------
if __name__ == "__main__":
    key = jax.random.PRNGKey(0)
    k_param, k_fid = jax.random.split(key)

    # Two videos of 8 frames each -> 16 global frame ids.
    data_offset = np.array([0, 8, 16], dtype=np.int64)
    max_t = 16
    num_freqs = 6          # only its sign matters; FrameCode derives freq count from max_ts
    t_embed_dim = 128

    model = build_rt_exp_mlp(k_param, max_t, num_freqs, t_embed_dim, data_offset)
    fid = jax.random.randint(k_fid, (16,), 0, max_t, dtype=jnp.int32)

    fwd = make_forward(model, block_m=8)       # small batch -> 8-row tiles, grid=(2,)
    out = jax.block_until_ready(fwd(fid))

    assert out.shape == (16, 1, 12), out.shape
    assert out.dtype == jnp.float32, out.dtype
    assert bool(jnp.all(jnp.isfinite(out)))

    # Validate against the pure-JAX reference (tolerance covers MXU pass-precision modes).
    ref = rt_exp_mlp_reference(fid, model)
    max_err = float(jnp.max(jnp.abs(out - ref)))
    assert max_err < 2e-2, f"max abs err vs reference: {max_err}"

    # Rotation block must be (approximately) orthonormal.
    R = out[:, 0, :9].reshape(-1, 3, 3)
    ortho_err = float(jnp.max(jnp.abs(jnp.einsum("bij,bkj->bik", R, R) - jnp.eye(3))))
    assert ortho_err < 1e-2, f"orthonormality error: {ortho_err}"

    print("KERNEL_OK")
</pallas_src>

<mosaic_0001>
module attributes {stable_mosaic.version = 11 : i64} {
  func.func @_rt_fused_kernel(%arg0: i32, %arg1: memref<8x128xf32, #tpu.memory_space<vmem>>, %arg2: memref<8x8xf32, #tpu.memory_space<vmem>>, %arg3: memref<8x8xf32, #tpu.memory_space<vmem>>, %arg4: memref<128x128xf32, #tpu.memory_space<vmem>>, %arg5: memref<1x128xf32, #tpu.memory_space<vmem>>, %arg6: memref<128x256xf32, #tpu.memory_space<vmem>>, %arg7: memref<1x256xf32, #tpu.memory_space<vmem>>, %arg8: memref<256x256xf32, #tpu.memory_space<vmem>>, %arg9: memref<1x256xf32, #tpu.memory_space<vmem>>, %arg10: memref<256x256xf32, #tpu.memory_space<vmem>>, %arg11: memref<1x256xf32, #tpu.memory_space<vmem>>, %arg12: memref<256x256xf32, #tpu.memory_space<vmem>>, %arg13: memref<1x256xf32, #tpu.memory_space<vmem>>, %arg14: memref<128x256xf32, #tpu.memory_space<vmem>>, %arg15: memref<256x256xf32, #tpu.memory_space<vmem>>, %arg16: memref<1x256xf32, #tpu.memory_space<vmem>>, %arg17: memref<256x256xf32, #tpu.memory_space<vmem>>, %arg18: memref<1x256xf32, #tpu.memory_space<vmem>>, %arg19: memref<256x256xf32, #tpu.memory_space<vmem>>, %arg20: memref<1x256xf32, #tpu.memory_space<vmem>>, %arg21: memref<256x256xf32, #tpu.memory_space<vmem>>, %arg22: memref<1x256xf32, #tpu.memory_space<vmem>>, %arg23: memref<256x128xf32, #tpu.memory_space<vmem>>, %arg24: memref<1x128xf32, #tpu.memory_space<vmem>>, %arg25: memref<8x128xf32, #tpu.memory_space<vmem>>) attributes {dimension_semantics = [#tpu.dimension_semantics<parallel>], iteration_bounds = array<i64: 2>, scalar_prefetch = 0 : i64, scratch_operands = 0 : i64, tpu.core_type = #tpu.core_type<tc>, window_params = [{pipeline_mode = #tpu.pipeline_mode<synchronous>, transform_indices = @transform_0, window_bounds = array<i64: 8, 128>}, {transform_indices = @transform_1, window_bounds = array<i64: 8, 8>}, {transform_indices = @transform_2, window_bounds = array<i64: 8, 8>}, {pipeline_mode = #tpu.pipeline_mode<synchronous>, transform_indices = @transform_3, window_bounds = array<i64: 128, 128>}, {pipeline_mode = #tpu.pipeline_mode<synchronous>, transform_indices = @transform_4, window_bounds = array<i64: 1, 128>}, {pipeline_mode = #tpu.pipeline_mode<synchronous>, transform_indices = @transform_5, window_bounds = array<i64: 128, 256>}, {pipeline_mode = #tpu.pipeline_mode<synchronous>, transform_indices = @transform_6, window_bounds = array<i64: 1, 256>}, {pipeline_mode = #tpu.pipeline_mode<synchronous>, transform_indices = @transform_7, window_bounds = array<i64: 256, 256>}, {pipeline_mode = #tpu.pipeline_mode<synchronous>, transform_indices = @transform_8, window_bounds = array<i64: 1, 256>}, {pipeline_mode = #tpu.pipeline_mode<synchronous>, transform_indices = @transform_9, window_bounds = array<i64: 256, 256>}, {pipeline_mode = #tpu.pipeline_mode<synchronous>, transform_indices = @transform_10, window_bounds = array<i64: 1, 256>}, {pipeline_mode = #tpu.pipeline_mode<synchronous>, transform_indices = @transform_11, window_bounds = array<i64: 256, 256>}, {pipeline_mode = #tpu.pipeline_mode<synchronous>, transform_indices = @transform_12, window_bounds = array<i64: 1, 256>}, {pipeline_mode = #tpu.pipeline_mode<synchronous>, transform_indices = @transform_13, window_bounds = array<i64: 128, 256>}, {pipeline_mode = #tpu.pipeline_mode<synchronous>, transform_indices = @transform_14, window_bounds = array<i64: 256, 256>}, {pipeline_mode = #tpu.pipeline_mode<synchronous>, transform_indices = @transform_15, window_bounds = array<i64: 1, 256>}, {pipeline_mode = #tpu.pipeline_mode<synchronous>, transform_indices = @transform_16, window_bounds = array<i64: 256, 256>}, {pipeline_mode = #tpu.pipeline_mode<synchronous>, transform_indices = @transform_17, window_bounds = array<i64: 1, 256>}, {pipeline_mode = #tpu.pipeline_mode<synchronous>, transform_indices = @transform_18, window_bounds = array<i64: 256, 256>}, {pipeline_mode = #tpu.pipeline_mode<synchronous>, transform_indices = @transform_19, window_bounds = array<i64: 1, 256>}, {pipeline_mode = #tpu.pipeline_mode<synchronous>, transform_indices = @transform_20, window_bounds = array<i64: 256, 256>}, {pipeline_mode = #tpu.pipeline_mode<synchronous>, transform_indices = @transform_21, window_bounds = array<i64: 1, 256>}, {pipeline_mode = #tpu.pipeline_mode<synchronous>, transform_indices = @transform_22, window_bounds = array<i64: 256, 128>}, {pipeline_mode = #tpu.pipeline_mode<synchronous>, transform_indices = @transform_23, window_bounds = array<i64: 1, 128>}, {transform_indices = @transform_24, window_bounds = array<i64: 8, 128>}]} {
    %c0 = arith.constant 0 : index
    %c0_0 = arith.constant 0 : index
    %0 = vector.load %arg2[%c0, %c0_0] : memref<8x8xf32, #tpu.memory_space<vmem>>, vector<8x1xf32>
    %c0_1 = arith.constant 0 : index
    %c1 = arith.constant 1 : index
    %1 = vector.load %arg2[%c0_1, %c1] : memref<8x8xf32, #tpu.memory_space<vmem>>, vector<8x1xf32>
    %c0_2 = arith.constant 0 : index
    %c0_3 = arith.constant 0 : index
    %2 = vector.load %arg1[%c0_2, %c0_3] : memref<8x128xf32, #tpu.memory_space<vmem>>, vector<1x128xf32>
    %c1_4 = arith.constant 1 : index
    %c0_5 = arith.constant 0 : index
    %3 = vector.load %arg1[%c1_4, %c0_5] : memref<8x128xf32, #tpu.memory_space<vmem>>, vector<1x128xf32>
    %c2 = arith.constant 2 : index
    %c0_6 = arith.constant 0 : index
    %4 = vector.load %arg1[%c2, %c0_6] : memref<8x128xf32, #tpu.memory_space<vmem>>, vector<1x128xf32>
    %c3 = arith.constant 3 : index
    %c0_7 = arith.constant 0 : index
    %5 = vector.load %arg1[%c3, %c0_7] : memref<8x128xf32, #tpu.memory_space<vmem>>, vector<1x128xf32>
    %c4 = arith.constant 4 : index
    %c0_8 = arith.constant 0 : index
    %6 = vector.load %arg1[%c4, %c0_8] : memref<8x128xf32, #tpu.memory_space<vmem>>, vector<1x128xf32>
    %7 = vector.broadcast %0 : vector<8x1xf32> to vector<8x128xf32>
    %8 = vector.broadcast %2 : vector<1x128xf32> to vector<8x128xf32>
    %9 = arith.mulf %7, %8 : vector<8x128xf32>
    %cst = arith.constant 5.000000e-01 : f32
    %10 = vector.broadcast %cst : f32 to vector<1x128xf32>
    %11 = arith.cmpf ogt, %4, %10 : vector<1x128xf32>
    %cst_9 = arith.constant 5.000000e-01 : f32
    %12 = vector.broadcast %cst_9 : f32 to vector<1x128xf32>
    %13 = arith.cmpf ogt, %3, %12 : vector<1x128xf32>
    %14 = math.sin %9 : vector<8x128xf32>
    %15 = math.cos %9 : vector<8x128xf32>
    %16 = vector.shape_cast %13 : vector<1x128xi1> to vector<1x128xi1>
    %17 = vector.broadcast %16 : vector<1x128xi1> to vector<8x128xi1>
    %18 = arith.select %17, %14, %15 : vector<8x128xi1>, vector<8x128xf32>
    %19 = vector.shape_cast %11 : vector<1x128xi1> to vector<1x128xi1>
    %20 = vector.broadcast %19 : vector<1x128xi1> to vector<8x128xi1>
    %21 = vector.shape_cast %0 : vector<8x1xf32> to vector<8x1xf32>
    %22 = vector.broadcast %21 : vector<8x1xf32> to vector<8x128xf32>
    %23 = arith.select %20, %22, %18 : vector<8x128xi1>, vector<8x128xf32>
    %24 = vector.broadcast %5 : vector<1x128xf32> to vector<8x128xf32>
    %25 = vector.broadcast %1 : vector<8x1xf32> to vector<8x128xf32>
    %26 = arith.subf %24, %25 : vector<8x128xf32>
    %27 = math.absf %26 : vector<8x128xf32>
    %cst_10 = arith.constant 5.000000e-01 : f32
    %28 = vector.broadcast %cst_10 : f32 to vector<8x128xf32>
    %29 = arith.cmpf olt, %27, %28 : vector<8x128xf32>
    %cst_11 = arith.constant 5.000000e-01 : f32
    %30 = vector.broadcast %cst_11 : f32 to vector<1x128xf32>
    %31 = arith.cmpf ogt, %6, %30 : vector<1x128xf32>
    %32 = vector.broadcast %31 : vector<1x128xi1> to vector<8x128xi1>
    %33 = arith.andi %29, %32 : vector<8x128xi1>
    %cst_12 = arith.constant 0.000000e+00 : f32
    %34 = vector.broadcast %cst_12 : f32 to vector<8x128xf32>
    %35 = arith.select %33, %23, %34 : vector<8x128xi1>, vector<8x128xf32>
    %c0_13 = arith.constant 0 : index
    %c0_14 = arith.constant 0 : index
    %36 = vector.load %arg4[%c0_13, %c0_14] : memref<128x128xf32, #tpu.memory_space<vmem>>, vector<128x128xf32>
    %cst_15 = arith.constant dense<0.000000e+00> : vector<8x128xf32>
    %37 = tpu.matmul %35, %36, %cst_15 {dimension_numbers = #tpu.dot_dimension_numbers<[1], [0], [0], [1], [0, 0, 1, 1], [], []>} : vector<8x128xf32>, vector<128x128xf32>, vector<8x128xf32> -> vector<8x128xf32>
    %c0_16 = arith.constant 0 : index
    %c0_17 = arith.constant 0 : index
    %38 = vector.load %arg5[%c0_16, %c0_17] : memref<1x128xf32, #tpu.memory_space<vmem>>, vector<1x128xf32>
    %39 = vector.broadcast %38 : vector<1x128xf32> to vector<8x128xf32>
    %40 = arith.addf %37, %39 : vector<8x128xf32>
    %c0_18 = arith.constant 0 : index
    %c0_19 = arith.constant 0 : index
    %41 = vector.load %arg6[%c0_18, %c0_19] : memref<128x256xf32, #tpu.memory_space<vmem>>, vector<128x256xf32>
    %cst_20 = arith.constant dense<0.000000e+00> : vector<8x256xf32>
    %42 = tpu.matmul %40, %41, %cst_20 {dimension_numbers = #tpu.dot_dimension_numbers<[1], [0], [0], [1], [0, 0, 1, 1], [], []>} : vector<8x128xf32>, vector<128x256xf32>, vector<8x256xf32> -> vector<8x256xf32>
    %c0_21 = arith.constant 0 : index
    %c0_22 = arith.constant 0 : index
    %43 = vector.load %arg7[%c0_21, %c0_22] : memref<1x256xf32, #tpu.memory_space<vmem>>, vector<1x256xf32>
    %44 = vector.broadcast %43 : vector<1x256xf32> to vector<8x256xf32>
    %45 = arith.addf %42, %44 : vector<8x256xf32>
    %cst_23 = arith.constant 0.000000e+00 : f32
    %46 = vector.broadcast %cst_23 : f32 to vector<8x256xf32>
    %47 = arith.maximumf %45, %46 : vector<8x256xf32>
    %c0_24 = arith.constant 0 : index
    %c0_25 = arith.constant 0 : index
    %48 = vector.load %arg8[%c0_24, %c0_25] : memref<256x256xf32, #tpu.memory_space<vmem>>, vector<256x256xf32>
    %cst_26 = arith.constant dense<0.000000e+00> : vector<8x256xf32>
    %49 = tpu.matmul %47, %48, %cst_26 {dimension_numbers = #tpu.dot_dimension_numbers<[1], [0], [0], [1], [0, 0, 1, 1], [], []>} : vector<8x256xf32>, vector<256x256xf32>, vector<8x256xf32> -> vector<8x256xf32>
    %c0_27 = arith.constant 0 : index
    %c0_28 = arith.constant 0 : index
    %50 = vector.load %arg9[%c0_27, %c0_28] : memref<1x256xf32, #tpu.memory_space<vmem>>, vector<1x256xf32>
    %51 = vector.broadcast %50 : vector<1x256xf32> to vector<8x256xf32>
    %52 = arith.addf %49, %51 : vector<8x256xf32>
    %cst_29 = arith.constant 0.000000e+00 : f32
    %53 = vector.broadcast %cst_29 : f32 to vector<8x256xf32>
    %54 = arith.maximumf %52, %53 : vector<8x256xf32>
    %c0_30 = arith.constant 0 : index
    %c0_31 = arith.constant 0 : index
    %55 = vector.load %arg10[%c0_30, %c0_31] : memref<256x256xf32, #tpu.memory_space<vmem>>, vector<256x256xf32>
    %cst_32 = arith.constant dense<0.000000e+00> : vector<8x256xf32>
    %56 = tpu.matmul %54, %55, %cst_32 {dimension_numbers = #tpu.dot_dimension_numbers<[1], [0], [0], [1], [0, 0, 1, 1], [], []>} : vector<8x256xf32>, vector<256x256xf32>, vector<8x256xf32> -> vector<8x256xf32>
    %c0_33 = arith.constant 0 : index
    %c0_34 = arith.constant 0 : index
    %57 = vector.load %arg11[%c0_33, %c0_34] : memref<1x256xf32, #tpu.memory_space<vmem>>, vector<1x256xf32>
    %58 = vector.broadcast %57 : vector<1x256xf32> to vector<8x256xf32>
    %59 = arith.addf %56, %58 : vector<8x256xf32>
    %cst_35 = arith.constant 0.000000e+00 : f32
    %60 = vector.broadcast %cst_35 : f32 to vector<8x256xf32>
    %61 = arith.maximumf %59, %60 : vector<8x256xf32>
    %c0_36 = arith.constant 0 : index
    %c0_37 = arith.constant 0 : index
    %62 = vector.load %arg12[%c0_36, %c0_37] : memref<256x256xf32, #tpu.memory_space<vmem>>, vector<256x256xf32>
    %cst_38 = arith.constant dense<0.000000e+00> : vector<8x256xf32>
    %63 = tpu.matmul %61, %62, %cst_38 {dimension_numbers = #tpu.dot_dimension_numbers<[1], [0], [0], [1], [0, 0, 1, 1], [], []>} : vector<8x256xf32>, vector<256x256xf32>, vector<8x256xf32> -> vector<8x256xf32>
    %c0_39 = arith.constant 0 : index
    %c0_40 = arith.constant 0 : index
    %64 = vector.load %arg13[%c0_39, %c0_40] : memref<1x256xf32, #tpu.memory_space<vmem>>, vector<1x256xf32>
    %65 = vector.broadcast %64 : vector<1x256xf32> to vector<8x256xf32>
    %66 = arith.addf %63, %65 : vector<8x256xf32>
    %cst_41 = arith.constant 0.000000e+00 : f32
    %67 = vector.broadcast %cst_41 : f32 to vector<8x256xf32>
    %68 = arith.maximumf %66, %67 : vector<8x256xf32>
    %c0_42 = arith.constant 0 : index
    %c0_43 = arith.constant 0 : index
    %69 = vector.load %arg14[%c0_42, %c0_43] : memref<128x256xf32, #tpu.memory_space<vmem>>, vector<128x256xf32>
    %cst_44 = arith.constant dense<0.000000e+00> : vector<8x256xf32>
    %70 = tpu.matmul %40, %69, %cst_44 {dimension_numbers = #tpu.dot_dimension_numbers<[1], [0], [0], [1], [0, 0, 1, 1], [], []>} : vector<8x128xf32>, vector<128x256xf32>, vector<8x256xf32> -> vector<8x256xf32>
    %c0_45 = arith.constant 0 : index
    %c0_46 = arith.constant 0 : index
    %71 = vector.load %arg15[%c0_45, %c0_46] : memref<256x256xf32, #tpu.memory_space<vmem>>, vector<256x256xf32>
    %cst_47 = arith.constant dense<0.000000e+00> : vector<8x256xf32>
    %72 = tpu.matmul %68, %71, %cst_47 {dimension_numbers = #tpu.dot_dimension_numbers<[1], [0], [0], [1], [0, 0, 1, 1], [], []>} : vector<8x256xf32>, vector<256x256xf32>, vector<8x256xf32> -> vector<8x256xf32>
    %73 = arith.addf %70, %72 : vector<8x256xf32>
    %c0_48 = arith.constant 0 : index
    %c0_49 = arith.constant 0 : index
    %74 = vector.load %arg16[%c0_48, %c0_49] : memref<1x256xf32, #tpu.memory_space<vmem>>, vector<1x256xf32>
    %75 = vector.broadcast %74 : vector<1x256xf32> to vector<8x256xf32>
    %76 = arith.addf %73, %75 : vector<8x256xf32>
    %cst_50 = arith.constant 0.000000e+00 : f32
    %77 = vector.broadcast %cst_50 : f32 to vector<8x256xf32>
    %78 = arith.maximumf %76, %77 : vector<8x256xf32>
    %c0_51 = arith.constant 0 : index
    %c0_52 = arith.constant 0 : index
    %79 = vector.load %arg17[%c0_51, %c0_52] : memref<256x256xf32, #tpu.memory_space<vmem>>, vector<256x256xf32>
    %cst_53 = arith.constant dense<0.000000e+00> : vector<8x256xf32>
    %80 = tpu.matmul %78, %79, %cst_53 {dimension_numbers = #tpu.dot_dimension_numbers<[1], [0], [0], [1], [0, 0, 1, 1], [], []>} : vector<8x256xf32>, vector<256x256xf32>, vector<8x256xf32> -> vector<8x256xf32>
    %c0_54 = arith.constant 0 : index
    %c0_55 = arith.constant 0 : index
    %81 = vector.load %arg18[%c0_54, %c0_55] : memref<1x256xf32, #tpu.memory_space<vmem>>, vector<1x256xf32>
    %82 = vector.broadcast %81 : vector<1x256xf32> to vector<8x256xf32>
    %83 = arith.addf %80, %82 : vector<8x256xf32>
    %cst_56 = arith.constant 0.000000e+00 : f32
    %84 = vector.broadcast %cst_56 : f32 to vector<8x256xf32>
    %85 = arith.maximumf %83, %84 : vector<8x256xf32>
    %c0_57 = arith.constant 0 : index
    %c0_58 = arith.constant 0 : index
    %86 = vector.load %arg19[%c0_57, %c0_58] : memref<256x256xf32, #tpu.memory_space<vmem>>, vector<256x256xf32>
    %cst_59 = arith.constant dense<0.000000e+00> : vector<8x256xf32>
    %87 = tpu.matmul %85, %86, %cst_59 {dimension_numbers = #tpu.dot_dimension_numbers<[1], [0], [0], [1], [0, 0, 1, 1], [], []>} : vector<8x256xf32>, vector<256x256xf32>, vector<8x256xf32> -> vector<8x256xf32>
    %c0_60 = arith.constant 0 : index
    %c0_61 = arith.constant 0 : index
    %88 = vector.load %arg20[%c0_60, %c0_61] : memref<1x256xf32, #tpu.memory_space<vmem>>, vector<1x256xf32>
    %89 = vector.broadcast %88 : vector<1x256xf32> to vector<8x256xf32>
    %90 = arith.addf %87, %89 : vector<8x256xf32>
    %cst_62 = arith.constant 0.000000e+00 : f32
    %91 = vector.broadcast %cst_62 : f32 to vector<8x256xf32>
    %92 = arith.maximumf %90, %91 : vector<8x256xf32>
    %c0_63 = arith.constant 0 : index
    %c0_64 = arith.constant 0 : index
    %93 = vector.load %arg21[%c0_63, %c0_64] : memref<256x256xf32, #tpu.memory_space<vmem>>, vector<256x256xf32>
    %cst_65 = arith.constant dense<0.000000e+00> : vector<8x256xf32>
    %94 = tpu.matmul %92, %93, %cst_65 {dimension_numbers = #tpu.dot_dimension_numbers<[1], [0], [0], [1], [0, 0, 1, 1], [], []>} : vector<8x256xf32>, vector<256x256xf32>, vector<8x256xf32> -> vector<8x256xf32>
    %c0_66 = arith.constant 0 : index
    %c0_67 = arith.constant 0 : index
    %95 = vector.load %arg22[%c0_66, %c0_67] : memref<1x256xf32, #tpu.memory_space<vmem>>, vector<1x256xf32>
    %96 = vector.broadcast %95 : vector<1x256xf32> to vector<8x256xf32>
    %97 = arith.addf %94, %96 : vector<8x256xf32>
    %cst_68 = arith.constant 0.000000e+00 : f32
    %98 = vector.broadcast %cst_68 : f32 to vector<8x256xf32>
    %99 = arith.maximumf %97, %98 : vector<8x256xf32>
    %c0_69 = arith.constant 0 : index
    %c0_70 = arith.constant 0 : index
    %100 = vector.load %arg23[%c0_69, %c0_70] : memref<256x128xf32, #tpu.memory_space<vmem>>, vector<256x128xf32>
    %cst_71 = arith.constant dense<0.000000e+00> : vector<8x128xf32>
    %101 = tpu.matmul %99, %100, %cst_71 {dimension_numbers = #tpu.dot_dimension_numbers<[1], [0], [0], [1], [0, 0, 1, 1], [], []>} : vector<8x256xf32>, vector<256x128xf32>, vector<8x128xf32> -> vector<8x128xf32>
    %c0_72 = arith.constant 0 : index
    %c0_73 = arith.constant 0 : index
    %102 = vector.load %arg24[%c0_72, %c0_73] : memref<1x128xf32, #tpu.memory_space<vmem>>, vector<1x128xf32>
    %103 = vector.broadcast %102 : vector<1x128xf32> to vector<8x128xf32>
    %104 = arith.addf %101, %103 : vector<8x128xf32>
    %105 = vector.extract_strided_slice %104 {offsets = [0, 0], sizes = [8, 1], strides = [1, 1]} : vector<8x128xf32> to vector<8x1xf32>
    %cst_74 = arith.constant 1.000000e-01 : f32
    %106 = vector.broadcast %cst_74 : f32 to vector<8x1xf32>
    %107 = arith.mulf %105, %106 : vector<8x1xf32>
    %108 = vector.extract_strided_slice %104 {offsets = [0, 1], sizes = [8, 1], strides = [1, 1]} : vector<8x128xf32> to vector<8x1xf32>
    %cst_75 = arith.constant 1.000000e-01 : f32
    %109 = vector.broadcast %cst_75 : f32 to vector<8x1xf32>
    %110 = arith.mulf %108, %109 : vector<8x1xf32>
    %111 = vector.extract_strided_slice %104 {offsets = [0, 2], sizes = [8, 1], strides = [1, 1]} : vector<8x128xf32> to vector<8x1xf32>
    %cst_76 = arith.constant 1.000000e-01 : f32
    %112 = vector.broadcast %cst_76 : f32 to vector<8x1xf32>
    %113 = arith.mulf %111, %112 : vector<8x1xf32>
    %114 = vector.extract_strided_slice %104 {offsets = [0, 3], sizes = [8, 1], strides = [1, 1]} : vector<8x128xf32> to vector<8x1xf32>
    %115 = vector.extract_strided_slice %104 {offsets = [0, 4], sizes = [8, 1], strides = [1, 1]} : vector<8x128xf32> to vector<8x1xf32>
    %116 = vector.extract_strided_slice %104 {offsets = [0, 5], sizes = [8, 1], strides = [1, 1]} : vector<8x128xf32> to vector<8x1xf32>
    %117 = arith.mulf %114, %114 : vector<8x1xf32>
    %118 = arith.mulf %115, %115 : vector<8x1xf32>
    %119 = arith.addf %117, %118 : vector<8x1xf32>
    %120 = arith.mulf %116, %116 : vector<8x1xf32>
    %121 = arith.addf %119, %120 : vector<8x1xf32>
    %cst_77 = arith.constant 9.99999974E-5 : f32
    %122 = vector.broadcast %cst_77 : f32 to vector<8x1xf32>
    %123 = arith.maximumf %121, %122 : vector<8x1xf32>
    %124 = math.sqrt %123 : vector<8x1xf32>
    %cst_78 = arith.constant 1.000000e+00 : f32
    %125 = vector.broadcast %cst_78 : f32 to vector<8x1xf32>
    %126 = arith.divf %125, %124 : vector<8x1xf32>
    %127 = math.sin %124 : vector<8x1xf32>
    %128 = arith.mulf %126, %127 : vector<8x1xf32>
    %129 = arith.mulf %126, %126 : vector<8x1xf32>
    %130 = math.cos %124 : vector<8x1xf32>
    %cst_79 = arith.constant 1.000000e+00 : f32
    %131 = vector.broadcast %cst_79 : f32 to vector<8x1xf32>
    %132 = arith.subf %131, %130 : vector<8x1xf32>
    %133 = arith.mulf %129, %132 : vector<8x1xf32>
    %134 = arith.mulf %115, %115 : vector<8x1xf32>
    %135 = arith.mulf %116, %116 : vector<8x1xf32>
    %136 = arith.addf %134, %135 : vector<8x1xf32>
    %cst_80 = arith.constant 0.000000e+00 : f32
    %137 = vector.broadcast %cst_80 : f32 to vector<8x1xf32>
    %138 = arith.subf %137, %136 : vector<8x1xf32>
    %139 = arith.mulf %133, %138 : vector<8x1xf32>
    %cst_81 = arith.constant 1.000000e+00 : f32
    %140 = vector.broadcast %cst_81 : f32 to vector<8x1xf32>
    %141 = arith.addf %140, %139 : vector<8x1xf32>
    %cst_82 = arith.constant 0.000000e+00 : f32
    %142 = vector.broadcast %cst_82 : f32 to vector<8x1xf32>
    %143 = arith.subf %142, %116 : vector<8x1xf32>
    %144 = arith.mulf %128, %143 : vector<8x1xf32>
    %145 = arith.mulf %114, %115 : vector<8x1xf32>
    %146 = arith.mulf %133, %145 : vector<8x1xf32>
    %147 = arith.addf %144, %146 : vector<8x1xf32>
    %148 = arith.mulf %128, %115 : vector<8x1xf32>
    %149 = arith.mulf %114, %116 : vector<8x1xf32>
    %150 = arith.mulf %133, %149 : vector<8x1xf32>
    %151 = arith.addf %148, %150 : vector<8x1xf32>
    %152 = arith.mulf %128, %116 : vector<8x1xf32>
    %153 = arith.mulf %114, %115 : vector<8x1xf32>
    %154 = arith.mulf %133, %153 : vector<8x1xf32>
    %155 = arith.addf %152, %154 : vector<8x1xf32>
    %156 = arith.mulf %114, %114 : vector<8x1xf32>
    %157 = arith.mulf %116, %116 : vector<8x1xf32>
    %158 = arith.addf %156, %157 : vector<8x1xf32>
    %cst_83 = arith.constant 0.000000e+00 : f32
    %159 = vector.broadcast %cst_83 : f32 to vector<8x1xf32>
    %160 = arith.subf %159, %158 : vector<8x1xf32>
    %161 = arith.mulf %133, %160 : vector<8x1xf32>
    %cst_84 = arith.constant 1.000000e+00 : f32
    %162 = vector.broadcast %cst_84 : f32 to vector<8x1xf32>
    %163 = arith.addf %162, %161 : vector<8x1xf32>
    %cst_85 = arith.constant 0.000000e+00 : f32
    %164 = vector.broadcast %cst_85 : f32 to vector<8x1xf32>
    %165 = arith.subf %164, %114 : vector<8x1xf32>
    %166 = arith.mulf %128, %165 : vector<8x1xf32>
    %167 = arith.mulf %115, %116 : vector<8x1xf32>
    %168 = arith.mulf %133, %167 : vector<8x1xf32>
    %169 = arith.addf %166, %168 : vector<8x1xf32>
    %cst_86 = arith.constant 0.000000e+00 : f32
    %170 = vector.broadcast %cst_86 : f32 to vector<8x1xf32>
    %171 = arith.subf %170, %115 : vector<8x1xf32>
    %172 = arith.mulf %128, %171 : vector<8x1xf32>
    %173 = arith.mulf %114, %116 : vector<8x1xf32>
    %174 = arith.mulf %133, %173 : vector<8x1xf32>
    %175 = arith.addf %172, %174 : vector<8x1xf32>
    %176 = arith.mulf %128, %114 : vector<8x1xf32>
    %177 = arith.mulf %115, %116 : vector<8x1xf32>
    %178 = arith.mulf %133, %177 : vector<8x1xf32>
    %179 = arith.addf %176, %178 : vector<8x1xf32>
    %180 = arith.mulf %114, %114 : vector<8x1xf32>
    %181 = arith.mulf %115, %115 : vector<8x1xf32>
    %182 = arith.addf %180, %181 : vector<8x1xf32>
    %cst_87 = arith.constant 0.000000e+00 : f32
    %183 = vector.broadcast %cst_87 : f32 to vector<8x1xf32>
    %184 = arith.subf %183, %182 : vector<8x1xf32>
    %185 = arith.mulf %133, %184 : vector<8x1xf32>
    %cst_88 = arith.constant 1.000000e+00 : f32
    %186 = vector.broadcast %cst_88 : f32 to vector<8x1xf32>
    %187 = arith.addf %186, %185 : vector<8x1xf32>
    %c0_89 = arith.constant 0 : index
    %c0_90 = arith.constant 0 : index
    %188 = vector.load %arg3[%c0_89, %c0_90] : memref<8x8xf32, #tpu.memory_space<vmem>>, vector<8x1xf32>
    %cst_91 = arith.constant 1.000000e-01 : f32
    %189 = vector.broadcast %cst_91 : f32 to vector<8x1xf32>
    %190 = arith.mulf %188, %189 : vector<8x1xf32>
    %c0_92 = arith.constant 0 : index
    %c1_93 = arith.constant 1 : index
    %191 = vector.load %arg3[%c0_92, %c1_93] : memref<8x8xf32, #tpu.memory_space<vmem>>, vector<8x1xf32>
    %cst_94 = arith.constant 1.000000e-01 : f32
    %192 = vector.broadcast %cst_94 : f32 to vector<8x1xf32>
    %193 = arith.mulf %191, %192 : vector<8x1xf32>
    %c0_95 = arith.constant 0 : index
    %c2_96 = arith.constant 2 : index
    %194 = vector.load %arg3[%c0_95, %c2_96] : memref<8x8xf32, #tpu.memory_space<vmem>>, vector<8x1xf32>
    %cst_97 = arith.constant 1.000000e-01 : f32
    %195 = vector.broadcast %cst_97 : f32 to vector<8x1xf32>
    %196 = arith.mulf %194, %195 : vector<8x1xf32>
    %c0_98 = arith.constant 0 : index
    %c3_99 = arith.constant 3 : index
    %197 = vector.load %arg3[%c0_98, %c3_99] : memref<8x8xf32, #tpu.memory_space<vmem>>, vector<8x1xf32>
    %c0_100 = arith.constant 0 : index
    %c4_101 = arith.constant 4 : index
    %198 = vector.load %arg3[%c0_100, %c4_101] : memref<8x8xf32, #tpu.memory_space<vmem>>, vector<8x1xf32>
    %c0_102 = arith.constant 0 : index
    %c5 = arith.constant 5 : index
    %199 = vector.load %arg3[%c0_102, %c5] : memref<8x8xf32, #tpu.memory_space<vmem>>, vector<8x1xf32>
    %c0_103 = arith.constant 0 : index
    %c6 = arith.constant 6 : index
    %200 = vector.load %arg3[%c0_103, %c6] : memref<8x8xf32, #tpu.memory_space<vmem>>, vector<8x1xf32>
    %201 = arith.mulf %197, %197 : vector<8x1xf32>
    %202 = arith.mulf %198, %198 : vector<8x1xf32>
    %203 = arith.addf %201, %202 : vector<8x1xf32>
    %204 = arith.mulf %199, %199 : vector<8x1xf32>
    %205 = arith.addf %203, %204 : vector<8x1xf32>
    %206 = arith.mulf %200, %200 : vector<8x1xf32>
    %207 = arith.addf %205, %206 : vector<8x1xf32>
    %208 = math.sqrt %207 : vector<8x1xf32>
    %cst_104 = arith.constant 9.99999996E-13 : f32
    %209 = vector.broadcast %cst_104 : f32 to vector<8x1xf32>
    %210 = arith.maximumf %208, %209 : vector<8x1xf32>
    %cst_105 = arith.constant 1.000000e+00 : f32
    %211 = vector.broadcast %cst_105 : f32 to vector<8x1xf32>
    %212 = arith.divf %211, %210 : vector<8x1xf32>
    %213 = arith.mulf %197, %212 : vector<8x1xf32>
    %214 = arith.mulf %198, %212 : vector<8x1xf32>
    %215 = arith.mulf %199, %212 : vector<8x1xf32>
    %216 = arith.mulf %200, %212 : vector<8x1xf32>
    %217 = arith.mulf %213, %213 : vector<8x1xf32>
    %218 = arith.mulf %214, %214 : vector<8x1xf32>
    %219 = arith.addf %217, %218 : vector<8x1xf32>
    %220 = arith.mulf %215, %215 : vector<8x1xf32>
    %221 = arith.addf %219, %220 : vector<8x1xf32>
    %222 = arith.mulf %216, %216 : vector<8x1xf32>
    %223 = arith.addf %221, %222 : vector<8x1xf32>
    %cst_106 = arith.constant 2.000000e+00 : f32
    %224 = vector.broadcast %cst_106 : f32 to vector<8x1xf32>
    %225 = arith.divf %224, %223 : vector<8x1xf32>
    %226 = arith.mulf %215, %215 : vector<8x1xf32>
    %227 = arith.mulf %216, %216 : vector<8x1xf32>
    %228 = arith.addf %226, %227 : vector<8x1xf32>
    %229 = arith.mulf %225, %228 : vector<8x1xf32>
    %cst_107 = arith.constant 1.000000e+00 : f32
    %230 = vector.broadcast %cst_107 : f32 to vector<8x1xf32>
    %231 = arith.subf %230, %229 : vector<8x1xf32>
    %232 = arith.mulf %214, %215 : vector<8x1xf32>
    %233 = arith.mulf %216, %213 : vector<8x1xf32>
    %234 = arith.subf %232, %233 : vector<8x1xf32>
    %235 = arith.mulf %225, %234 : vector<8x1xf32>
    %236 = arith.mulf %214, %216 : vector<8x1xf32>
    %237 = arith.mulf %215, %213 : vector<8x1xf32>
    %238 = arith.addf %236, %237 : vector<8x1xf32>
    %239 = arith.mulf %225, %238 : vector<8x1xf32>
    %240 = arith.mulf %214, %215 : vector<8x1xf32>
    %241 = arith.mulf %216, %213 : vector<8x1xf32>
    %242 = arith.addf %240, %241 : vector<8x1xf32>
    %243 = arith.mulf %225, %242 : vector<8x1xf32>
    %244 = arith.mulf %214, %214 : vector<8x1xf32>
    %245 = arith.mulf %216, %216 : vector<8x1xf32>
    %246 = arith.addf %244, %245 : vector<8x1xf32>
    %247 = arith.mulf %225, %246 : vector<8x1xf32>
    %cst_108 = arith.constant 1.000000e+00 : f32
    %248 = vector.broadcast %cst_108 : f32 to vector<8x1xf32>
    %249 = arith.subf %248, %247 : vector<8x1xf32>
    %250 = arith.mulf %215, %216 : vector<8x1xf32>
    %251 = arith.mulf %214, %213 : vector<8x1xf32>
    %252 = arith.subf %250, %251 : vector<8x1xf32>
    %253 = arith.mulf %225, %252 : vector<8x1xf32>
    %254 = arith.mulf %214, %216 : vector<8x1xf32>
    %255 = arith.mulf %215, %213 : vector<8x1xf32>
    %256 = arith.subf %254, %255 : vector<8x1xf32>
    %257 = arith.mulf %225, %256 : vector<8x1xf32>
    %258 = arith.mulf %215, %216 : vector<8x1xf32>
    %259 = arith.mulf %214, %213 : vector<8x1xf32>
    %260 = arith.addf %258, %259 : vector<8x1xf32>
    %261 = arith.mulf %225, %260 : vector<8x1xf32>
    %262 = arith.mulf %214, %214 : vector<8x1xf32>
    %263 = arith.mulf %215, %215 : vector<8x1xf32>
    %264 = arith.addf %262, %263 : vector<8x1xf32>
    %265 = arith.mulf %225, %264 : vector<8x1xf32>
    %cst_109 = arith.constant 1.000000e+00 : f32
    %266 = vector.broadcast %cst_109 : f32 to vector<8x1xf32>
    %267 = arith.subf %266, %265 : vector<8x1xf32>
    %268 = arith.mulf %231, %141 : vector<8x1xf32>
    %269 = arith.mulf %235, %155 : vector<8x1xf32>
    %270 = arith.addf %268, %269 : vector<8x1xf32>
    %271 = arith.mulf %239, %175 : vector<8x1xf32>
    %272 = arith.addf %270, %271 : vector<8x1xf32>
    %273 = arith.mulf %231, %147 : vector<8x1xf32>
    %274 = arith.mulf %235, %163 : vector<8x1xf32>
    %275 = arith.addf %273, %274 : vector<8x1xf32>
    %276 = arith.mulf %239, %179 : vector<8x1xf32>
    %277 = arith.addf %275, %276 : vector<8x1xf32>
    %278 = arith.mulf %231, %151 : vector<8x1xf32>
    %279 = arith.mulf %235, %169 : vector<8x1xf32>
    %280 = arith.addf %278, %279 : vector<8x1xf32>
    %281 = arith.mulf %239, %187 : vector<8x1xf32>
    %282 = arith.addf %280, %281 : vector<8x1xf32>
    %283 = arith.mulf %243, %141 : vector<8x1xf32>
    %284 = arith.mulf %249, %155 : vector<8x1xf32>
    %285 = arith.addf %283, %284 : vector<8x1xf32>
    %286 = arith.mulf %253, %175 : vector<8x1xf32>
    %287 = arith.addf %285, %286 : vector<8x1xf32>
    %288 = arith.mulf %243, %147 : vector<8x1xf32>
    %289 = arith.mulf %249, %163 : vector<8x1xf32>
    %290 = arith.addf %288, %289 : vector<8x1xf32>
    %291 = arith.mulf %253, %179 : vector<8x1xf32>
    %292 = arith.addf %290, %291 : vector<8x1xf32>
    %293 = arith.mulf %243, %151 : vector<8x1xf32>
    %294 = arith.mulf %249, %169 : vector<8x1xf32>
    %295 = arith.addf %293, %294 : vector<8x1xf32>
    %296 = arith.mulf %253, %187 : vector<8x1xf32>
    %297 = arith.addf %295, %296 : vector<8x1xf32>
    %298 = arith.mulf %257, %141 : vector<8x1xf32>
    %299 = arith.mulf %261, %155 : vector<8x1xf32>
    %300 = arith.addf %298, %299 : vector<8x1xf32>
    %301 = arith.mulf %267, %175 : vector<8x1xf32>
    %302 = arith.addf %300, %301 : vector<8x1xf32>
    %303 = arith.mulf %257, %147 : vector<8x1xf32>
    %304 = arith.mulf %261, %163 : vector<8x1xf32>
    %305 = arith.addf %303, %304 : vector<8x1xf32>
    %306 = arith.mulf %267, %179 : vector<8x1xf32>
    %307 = arith.addf %305, %306 : vector<8x1xf32>
    %308 = arith.mulf %257, %151 : vector<8x1xf32>
    %309 = arith.mulf %261, %169 : vector<8x1xf32>
    %310 = arith.addf %308, %309 : vector<8x1xf32>
    %311 = arith.mulf %267, %187 : vector<8x1xf32>
    %312 = arith.addf %310, %311 : vector<8x1xf32>
    %313 = arith.mulf %231, %107 : vector<8x1xf32>
    %314 = arith.addf %190, %313 : vector<8x1xf32>
    %315 = arith.mulf %235, %110 : vector<8x1xf32>
    %316 = arith.addf %314, %315 : vector<8x1xf32>
    %317 = arith.mulf %239, %113 : vector<8x1xf32>
    %318 = arith.addf %316, %317 : vector<8x1xf32>
    %319 = arith.mulf %243, %107 : vector<8x1xf32>
    %320 = arith.addf %193, %319 : vector<8x1xf32>
    %321 = arith.mulf %249, %110 : vector<8x1xf32>
    %322 = arith.addf %320, %321 : vector<8x1xf32>
    %323 = arith.mulf %253, %113 : vector<8x1xf32>
    %324 = arith.addf %322, %323 : vector<8x1xf32>
    %325 = arith.mulf %257, %107 : vector<8x1xf32>
    %326 = arith.addf %196, %325 : vector<8x1xf32>
    %327 = arith.mulf %261, %110 : vector<8x1xf32>
    %328 = arith.addf %326, %327 : vector<8x1xf32>
    %329 = arith.mulf %267, %113 : vector<8x1xf32>
    %330 = arith.addf %328, %329 : vector<8x1xf32>
    %331 = tpu.iota {dimensions = array<i32: 1>} : vector<1x128xi32>
    %cst_110 = arith.constant 0.000000e+00 : f32
    %332 = vector.broadcast %cst_110 : f32 to vector<8x128xf32>
    %c0_i32 = arith.constant 0 : i32
    %333 = vector.broadcast %c0_i32 : i32 to vector<1x128xi32>
    %334 = arith.cmpi eq, %331, %333 : vector<1x128xi32>
    %cst_111 = arith.constant 0.000000e+00 : f32
    %335 = vector.shape_cast %334 : vector<1x128xi1> to vector<1x128xi1>
    %336 = vector.broadcast %335 : vector<1x128xi1> to vector<8x128xi1>
    %337 = vector.shape_cast %272 : vector<8x1xf32> to vector<8x1xf32>
    %338 = vector.broadcast %337 : vector<8x1xf32> to vector<8x128xf32>
    %339 = vector.broadcast %cst_111 : f32 to vector<8x128xf32>
    %340 = arith.select %336, %338, %339 : vector<8x128xi1>, vector<8x128xf32>
    %341 = arith.addf %332, %340 : vector<8x128xf32>
    %c1_i32 = arith.constant 1 : i32
    %342 = vector.broadcast %c1_i32 : i32 to vector<1x128xi32>
    %343 = arith.cmpi eq, %331, %342 : vector<1x128xi32>
    %cst_112 = arith.constant 0.000000e+00 : f32
    %344 = vector.shape_cast %343 : vector<1x128xi1> to vector<1x128xi1>
    %345 = vector.broadcast %344 : vector<1x128xi1> to vector<8x128xi1>
    %346 = vector.shape_cast %277 : vector<8x1xf32> to vector<8x1xf32>
    %347 = vector.broadcast %346 : vector<8x1xf32> to vector<8x128xf32>
    %348 = vector.broadcast %cst_112 : f32 to vector<8x128xf32>
    %349 = arith.select %345, %347, %348 : vector<8x128xi1>, vector<8x128xf32>
    %350 = arith.addf %341, %349 : vector<8x128xf32>
    %c2_i32 = arith.constant 2 : i32
    %351 = vector.broadcast %c2_i32 : i32 to vector<1x128xi32>
    %352 = arith.cmpi eq, %331, %351 : vector<1x128xi32>
    %cst_113 = arith.constant 0.000000e+00 : f32
    %353 = vector.shape_cast %352 : vector<1x128xi1> to vector<1x128xi1>
    %354 = vector.broadcast %353 : vector<1x128xi1> to vector<8x128xi1>
    %355 = vector.shape_cast %282 : vector<8x1xf32> to vector<8x1xf32>
    %356 = vector.broadcast %355 : vector<8x1xf32> to vector<8x128xf32>
    %357 = vector.broadcast %cst_113 : f32 to vector<8x128xf32>
    %358 = arith.select %354, %356, %357 : vector<8x128xi1>, vector<8x128xf32>
    %359 = arith.addf %350, %358 : vector<8x128xf32>
    %c3_i32 = arith.constant 3 : i32
    %360 = vector.broadcast %c3_i32 : i32 to vector<1x128xi32>
    %361 = arith.cmpi eq, %331, %360 : vector<1x128xi32>
    %cst_114 = arith.constant 0.000000e+00 : f32
    %362 = vector.shape_cast %361 : vector<1x128xi1> to vector<1x128xi1>
    %363 = vector.broadcast %362 : vector<1x128xi1> to vector<8x128xi1>
    %364 = vector.shape_cast %287 : vector<8x1xf32> to vector<8x1xf32>
    %365 = vector.broadcast %364 : vector<8x1xf32> to vector<8x128xf32>
    %366 = vector.broadcast %cst_114 : f32 to vector<8x128xf32>
    %367 = arith.select %363, %365, %366 : vector<8x128xi1>, vector<8x128xf32>
    %368 = arith.addf %359, %367 : vector<8x128xf32>
    %c4_i32 = arith.constant 4 : i32
    %369 = vector.broadcast %c4_i32 : i32 to vector<1x128xi32>
    %370 = arith.cmpi eq, %331, %369 : vector<1x128xi32>
    %cst_115 = arith.constant 0.000000e+00 : f32
    %371 = vector.shape_cast %370 : vector<1x128xi1> to vector<1x128xi1>
    %372 = vector.broadcast %371 : vector<1x128xi1> to vector<8x128xi1>
    %373 = vector.shape_cast %292 : vector<8x1xf32> to vector<8x1xf32>
    %374 = vector.broadcast %373 : vector<8x1xf32> to vector<8x128xf32>
    %375 = vector.broadcast %cst_115 : f32 to vector<8x128xf32>
    %376 = arith.select %372, %374, %375 : vector<8x128xi1>, vector<8x128xf32>
    %377 = arith.addf %368, %376 : vector<8x128xf32>
    %c5_i32 = arith.constant 5 : i32
    %378 = vector.broadcast %c5_i32 : i32 to vector<1x128xi32>
    %379 = arith.cmpi eq, %331, %378 : vector<1x128xi32>
    %cst_116 = arith.constant 0.000000e+00 : f32
    %380 = vector.shape_cast %379 : vector<1x128xi1> to vector<1x128xi1>
    %381 = vector.broadcast %380 : vector<1x128xi1> to vector<8x128xi1>
    %382 = vector.shape_cast %297 : vector<8x1xf32> to vector<8x1xf32>
    %383 = vector.broadcast %382 : vector<8x1xf32> to vector<8x128xf32>
    %384 = vector.broadcast %cst_116 : f32 to vector<8x128xf32>
    %385 = arith.select %381, %383, %384 : vector<8x128xi1>, vector<8x128xf32>
    %386 = arith.addf %377, %385 : vector<8x128xf32>
    %c6_i32 = arith.constant 6 : i32
    %387 = vector.broadcast %c6_i32 : i32 to vector<1x128xi32>
    %388 = arith.cmpi eq, %331, %387 : vector<1x128xi32>
    %cst_117 = arith.constant 0.000000e+00 : f32
    %389 = vector.shape_cast %388 : vector<1x128xi1> to vector<1x128xi1>
    %390 = vector.broadcast %389 : vector<1x128xi1> to vector<8x128xi1>
    %391 = vector.shape_cast %302 : vector<8x1xf32> to vector<8x1xf32>
    %392 = vector.broadcast %391 : vector<8x1xf32> to vector<8x128xf32>
    %393 = vector.broadcast %cst_117 : f32 to vector<8x128xf32>
    %394 = arith.select %390, %392, %393 : vector<8x128xi1>, vector<8x128xf32>
    %395 = arith.addf %386, %394 : vector<8x128xf32>
    %c7_i32 = arith.constant 7 : i32
    %396 = vector.broadcast %c7_i32 : i32 to vector<1x128xi32>
    %397 = arith.cmpi eq, %331, %396 : vector<1x128xi32>
    %cst_118 = arith.constant 0.000000e+00 : f32
    %398 = vector.shape_cast %397 : vector<1x128xi1> to vector<1x128xi1>
    %399 = vector.broadcast %398 : vector<1x128xi1> to vector<8x128xi1>
    %400 = vector.shape_cast %307 : vector<8x1xf32> to vector<8x1xf32>
    %401 = vector.broadcast %400 : vector<8x1xf32> to vector<8x128xf32>
    %402 = vector.broadcast %cst_118 : f32 to vector<8x128xf32>
    %403 = arith.select %399, %401, %402 : vector<8x128xi1>, vector<8x128xf32>
    %404 = arith.addf %395, %403 : vector<8x128xf32>
    %c8_i32 = arith.constant 8 : i32
    %405 = vector.broadcast %c8_i32 : i32 to vector<1x128xi32>
    %406 = arith.cmpi eq, %331, %405 : vector<1x128xi32>
    %cst_119 = arith.constant 0.000000e+00 : f32
    %407 = vector.shape_cast %406 : vector<1x128xi1> to vector<1x128xi1>
    %408 = vector.broadcast %407 : vector<1x128xi1> to vector<8x128xi1>
    %409 = vector.shape_cast %312 : vector<8x1xf32> to vector<8x1xf32>
    %410 = vector.broadcast %409 : vector<8x1xf32> to vector<8x128xf32>
    %411 = vector.broadcast %cst_119 : f32 to vector<8x128xf32>
    %412 = arith.select %408, %410, %411 : vector<8x128xi1>, vector<8x128xf32>
    %413 = arith.addf %404, %412 : vector<8x128xf32>
    %c9_i32 = arith.constant 9 : i32
    %414 = vector.broadcast %c9_i32 : i32 to vector<1x128xi32>
    %415 = arith.cmpi eq, %331, %414 : vector<1x128xi32>
    %cst_120 = arith.constant 0.000000e+00 : f32
    %416 = vector.shape_cast %415 : vector<1x128xi1> to vector<1x128xi1>
    %417 = vector.broadcast %416 : vector<1x128xi1> to vector<8x128xi1>
    %418 = vector.shape_cast %318 : vector<8x1xf32> to vector<8x1xf32>
    %419 = vector.broadcast %418 : vector<8x1xf32> to vector<8x128xf32>
    %420 = vector.broadcast %cst_120 : f32 to vector<8x128xf32>
    %421 = arith.select %417, %419, %420 : vector<8x128xi1>, vector<8x128xf32>
    %422 = arith.addf %413, %421 : vector<8x128xf32>
    %c10_i32 = arith.constant 10 : i32
    %423 = vector.broadcast %c10_i32 : i32 to vector<1x128xi32>
    %424 = arith.cmpi eq, %331, %423 : vector<1x128xi32>
    %cst_121 = arith.constant 0.000000e+00 : f32
    %425 = vector.shape_cast %424 : vector<1x128xi1> to vector<1x128xi1>
    %426 = vector.broadcast %425 : vector<1x128xi1> to vector<8x128xi1>
    %427 = vector.shape_cast %324 : vector<8x1xf32> to vector<8x1xf32>
    %428 = vector.broadcast %427 : vector<8x1xf32> to vector<8x128xf32>
    %429 = vector.broadcast %cst_121 : f32 to vector<8x128xf32>
    %430 = arith.select %426, %428, %429 : vector<8x128xi1>, vector<8x128xf32>
    %431 = arith.addf %422, %430 : vector<8x128xf32>
    %c11_i32 = arith.constant 11 : i32
    %432 = vector.broadcast %c11_i32 : i32 to vector<1x128xi32>
    %433 = arith.cmpi eq, %331, %432 : vector<1x128xi32>
    %cst_122 = arith.constant 0.000000e+00 : f32
    %434 = vector.shape_cast %433 : vector<1x128xi1> to vector<1x128xi1>
    %435 = vector.broadcast %434 : vector<1x128xi1> to vector<8x128xi1>
    %436 = vector.shape_cast %330 : vector<8x1xf32> to vector<8x1xf32>
    %437 = vector.broadcast %436 : vector<8x1xf32> to vector<8x128xf32>
    %438 = vector.broadcast %cst_122 : f32 to vector<8x128xf32>
    %439 = arith.select %435, %437, %438 : vector<8x128xi1>, vector<8x128xf32>
    %440 = arith.addf %431, %439 : vector<8x128xf32>
    %c0_123 = arith.constant 0 : index
    %c0_124 = arith.constant 0 : index
    %441 = vector.load %arg25[%c0_123, %c0_124] : memref<8x128xf32, #tpu.memory_space<vmem>>, vector<8x128xf32>
    tpu.vector_store %arg25[%c0_123, %c0_124], %440 {strides = array<i32>} : memref<8x128xf32, #tpu.memory_space<vmem>>, vector<8x128xf32>,
    return
  }
  func.func @transform_0(%arg0: i32) -> (i32, i32) {
    %c0_i32 = arith.constant 0 : i32
    %c0_i32_0 = arith.constant 0 : i32
    %c0_i32_1 = arith.constant 0 : i32
    return %c0_i32, %c0_i32_0 : i32, i32
  }
  func.func @transform_1(%arg0: i32) -> (i32, i32) {
    %c0_i32 = arith.constant 0 : i32
    %c0_i32_0 = arith.constant 0 : i32
    return %arg0, %c0_i32 : i32, i32
  }
  func.func @transform_2(%arg0: i32) -> (i32, i32) {
    %c0_i32 = arith.constant 0 : i32
    %c0_i32_0 = arith.constant 0 : i32
    return %arg0, %c0_i32 : i32, i32
  }
  func.func @transform_3(%arg0: i32) -> (i32, i32) {
    %c0_i32 = arith.constant 0 : i32
    %c0_i32_0 = arith.constant 0 : i32
    %c0_i32_1 = arith.constant 0 : i32
    return %c0_i32, %c0_i32_0 : i32, i32
  }
  func.func @transform_4(%arg0: i32) -> (i32, i32) {
    %c0_i32 = arith.constant 0 : i32
    %c0_i32_0 = arith.constant 0 : i32
    %c0_i32_1 = arith.constant 0 : i32
    return %c0_i32, %c0_i32_0 : i32, i32
  }
  func.func @transform_5(%arg0: i32) -> (i32, i32) {
    %c0_i32 = arith.constant 0 : i32
    %c0_i32_0 = arith.constant 0 : i32
    %c0_i32_1 = arith.constant 0 : i32
    return %c0_i32, %c0_i32_0 : i32, i32
  }
  func.func @transform_6(%arg0: i32) -> (i32, i32) {
    %c0_i32 = arith.constant 0 : i32
    %c0_i32_0 = arith.constant 0 : i32
    %c0_i32_1 = arith.constant 0 : i32
    return %c0_i32, %c0_i32_0 : i32, i32
  }
  func.func @transform_7(%arg0: i32) -> (i32, i32) {
    %c0_i32 = arith.constant 0 : i32
    %c0_i32_0 = arith.constant 0 : i32
    %c0_i32_1 = arith.constant 0 : i32
    return %c0_i32, %c0_i32_0 : i32, i32
  }
  func.func @transform_8(%arg0: i32) -> (i32, i32) {
    %c0_i32 = arith.constant 0 : i32
    %c0_i32_0 = arith.constant 0 : i32
    %c0_i32_1 = arith.constant 0 : i32
    return %c0_i32, %c0_i32_0 : i32, i32
  }
  func.func @transform_9(%arg0: i32) -> (i32, i32) {
    %c0_i32 = arith.constant 0 : i32
    %c0_i32_0 = arith.constant 0 : i32
    %c0_i32_1 = arith.constant 0 : i32
    return %c0_i32, %c0_i32_0 : i32, i32
  }
  func.func @transform_10(%arg0: i32) -> (i32, i32) {
    %c0_i32 = arith.constant 0 : i32
    %c0_i32_0 = arith.constant 0 : i32
    %c0_i32_1 = arith.constant 0 : i32
    return %c0_i32, %c0_i32_0 : i32, i32
  }
  func.func @transform_11(%arg0: i32) -> (i32, i32) {
    %c0_i32 = arith.constant 0 : i32
    %c0_i32_0 = arith.constant 0 : i32
    %c0_i32_1 = arith.constant 0 : i32
    return %c0_i32, %c0_i32_0 : i32, i32
  }
  func.func @transform_12(%arg0: i32) -> (i32, i32) {
    %c0_i32 = arith.constant 0 : i32
    %c0_i32_0 = arith.constant 0 : i32
    %c0_i32_1 = arith.constant 0 : i32
    return %c0_i32, %c0_i32_0 : i32, i32
  }
  func.func @transform_13(%arg0: i32) -> (i32, i32) {
    %c0_i32 = arith.constant 0 : i32
    %c0_i32_0 = arith.constant 0 : i32
    %c0_i32_1 = arith.constant 0 : i32
    return %c0_i32, %c0_i32_0 : i32, i32
  }
  func.func @transform_14(%arg0: i32) -> (i32, i32) {
    %c0_i32 = arith.constant 0 : i32
    %c0_i32_0 = arith.constant 0 : i32
    %c0_i32_1 = arith.constant 0 : i32
    return %c0_i32, %c0_i32_0 : i32, i32
  }
  func.func @transform_15(%arg0: i32) -> (i32, i32) {
    %c0_i32 = arith.constant 0 : i32
    %c0_i32_0 = arith.constant 0 : i32
    %c0_i32_1 = arith.constant 0 : i32
    return %c0_i32, %c0_i32_0 : i32, i32
  }
  func.func @transform_16(%arg0: i32) -> (i32, i32) {
    %c0_i32 = arith.constant 0 : i32
    %c0_i32_0 = arith.constant 0 : i32
    %c0_i32_1 = arith.constant 0 : i32
    return %c0_i32, %c0_i32_0 : i32, i32
  }
  func.func @transform_17(%arg0: i32) -> (i32, i32) {
    %c0_i32 = arith.constant 0 : i32
    %c0_i32_0 = arith.constant 0 : i32
    %c0_i32_1 = arith.constant 0 : i32
    return %c0_i32, %c0_i32_0 : i32, i32
  }
  func.func @transform_18(%arg0: i32) -> (i32, i32) {
    %c0_i32 = arith.constant 0 : i32
    %c0_i32_0 = arith.constant 0 : i32
    %c0_i32_1 = arith.constant 0 : i32
    return %c0_i32, %c0_i32_0 : i32, i32
  }
  func.func @transform_19(%arg0: i32) -> (i32, i32) {
    %c0_i32 = arith.constant 0 : i32
    %c0_i32_0 = arith.constant 0 : i32
    %c0_i32_1 = arith.constant 0 : i32
    return %c0_i32, %c0_i32_0 : i32, i32
  }
  func.func @transform_20(%arg0: i32) -> (i32, i32) {
    %c0_i32 = arith.constant 0 : i32
    %c0_i32_0 = arith.constant 0 : i32
    %c0_i32_1 = arith.constant 0 : i32
    return %c0_i32, %c0_i32_0 : i32, i32
  }
  func.func @transform_21(%arg0: i32) -> (i32, i32) {
    %c0_i32 = arith.constant 0 : i32
    %c0_i32_0 = arith.constant 0 : i32
    %c0_i32_1 = arith.constant 0 : i32
    return %c0_i32, %c0_i32_0 : i32, i32
  }
  func.func @transform_22(%arg0: i32) -> (i32, i32) {
    %c0_i32 = arith.constant 0 : i32
    %c0_i32_0 = arith.constant 0 : i32
    %c0_i32_1 = arith.constant 0 : i32
    return %c0_i32, %c0_i32_0 : i32, i32
  }
  func.func @transform_23(%arg0: i32) -> (i32, i32) {
    %c0_i32 = arith.constant 0 : i32
    %c0_i32_0 = arith.constant 0 : i32
    %c0_i32_1 = arith.constant 0 : i32
    return %c0_i32, %c0_i32_0 : i32, i32
  }
  func.func @transform_24(%arg0: i32) -> (i32, i32) {
    %c0_i32 = arith.constant 0 : i32
    %c0_i32_0 = arith.constant 0 : i32
    return %arg0, %c0_i32 : i32, i32
  }
}

</mosaic_0001>

<bundles_post_ra>
// kernel: custom-call
= control target key start
LH: loop header
LB: loop body
LE: loop exit
PB: predicated region body
PF: predicated region fallthrough
CT: control target
= control target key end

     0   :  { %s6_s0 = inlined_call_operand.vmem [shape: u32[16], index: 0, kind: output, shape index: {}]  }

// kernel: forward.1
= control target key start
LH: loop header
LB: loop body
LE: loop exit
PB: predicated region body
PF: predicated region fallthrough
CT: control target
= control target key end

     0   :  { %s4918_s0 = inlined_call_operand.vmem [shape: f32[8,128], index: 0, kind: input, shape index: {}]   ;;  %s4919_s1 = inlined_call_operand.vmem [shape: f32[16,8], index: 1, kind: input, shape index: {}]   ;;  %s4920_s2 = inlined_call_operand.vmem [shape: f32[16,8], index: 2, kind: input, shape index: {}]   ;;  %s4921_s3 = inlined_call_operand.vmem [shape: f32[128,128], index: 3, kind: input, shape index: {}]   ;;  %s4922_s4 = inlined_call_operand.vmem [shape: f32[1,128], index: 4, kind: input, shape index: {}, may-alias: {4,23}]   ;;  %s4923_s5 = inlined_call_operand.hbm [shape: f32[128,256], index: 5, kind: input, shape index: {}]   ;;  %s4924_s6 = inlined_call_operand.vmem [shape: f32[1,256], index: 6, kind: input, shape index: {}, may-alias: {6,8,10,12,15,17,19,21}]   ;;  %s4925_s7 = inlined_call_operand.hbm [shape: f32[256,256], index: 7, kind: input, shape index: {}]   ;;  %s4926_s8 = inlined_call_operand.vmem [shape: f32[1,256], index: 8, kind: input, shape index: {}, may-alias: {6,8,10,12,15,17,19,21}]   ;;  %s4927_s9 = inlined_call_operand.hbm [shape: f32[256,256], index: 9, kind: input, shape index: {}]   ;;  %s4928_s10 = inlined_call_operand.vmem [shape: f32[1,256], index: 10, kind: input, shape index: {}, may-alias: {6,8,10,12,15,17,19,21}]   ;;  %s4929_s11 = inlined_call_operand.hbm [shape: f32[256,256], index: 11, kind: input, shape index: {}]   ;;  %s4930_s12 = inlined_call_operand.vmem [shape: f32[1,256], index: 12, kind: input, shape index: {}, may-alias: {6,8,10,12,15,17,19,21}]   ;;  %s4931_s13 = inlined_call_operand.hbm [shape: f32[128,256], index: 13, kind: input, shape index: {}]   ;;  %s4932_s14 = inlined_call_operand.hbm [shape: f32[256,256], index: 14, kind: input, shape index: {}]   ;;  %s4933_s15 = inlined_call_operand.vmem [shape: f32[1,256], index: 15, kind: input, shape index: {}, may-alias: {6,8,10,12,15,17,19,21}]   ;;  %s4934_s16 = inlined_call_operand.hbm [shape: f32[256,256], index: 16, kind: input, shape index: {}]   ;;  %s4935_s17 = inlined_call_operand.vmem [shape: f32[1,256], index: 17, kind: input, shape index: {}, may-alias: {6,8,10,12,15,17,19,21}]   ;;  %s4936_s18 = inlined_call_operand.hbm [shape: f32[256,256], index: 18, kind: input, shape index: {}]   ;;  %s4937_s19 = inlined_call_operand.vmem [shape: f32[1,256], index: 19, kind: input, shape index: {}, may-alias: {6,8,10,12,15,17,19,21}]   ;;  %s4938_s20 = inlined_call_operand.hbm [shape: f32[256,256], index: 20, kind: input, shape index: {}]   ;;  %s4939_s21 = inlined_call_operand.vmem [shape: f32[1,256], index: 21, kind: input, shape index: {}, may-alias: {6,8,10,12,15,17,19,21}]   ;;  %s4940_s22 = inlined_call_operand.hbm [shape: f32[256,128], index: 22, kind: input, shape index: {}]   ;;  %s4941_s23 = inlined_call_operand.vmem [shape: f32[1,128], index: 23, kind: input, shape index: {}, may-alias: {4,23}]   ;;  %s4942_s24 = inlined_call_operand.vmem [shape: f32[16,128], index: 24, kind: output, shape index: {}]  }
   0x1   :  { %4946 = sst [smem:[#allocation25_spill]] %s4918_s0 }
   0x2   :  { %4947 = sst [smem:[#allocation26_spill]] %s4919_s1 }
   0x3   :  { %4948 = sst [smem:[#allocation27_spill]] %s4920_s2 }
   0x4   :  { %4949 = sst [smem:[#allocation28_spill]] %s4921_s3 }
   0x5   :  { %4950 = sst [smem:[#allocation29_spill]] %s4922_s4 }
   0x6   :  { %4951 = sst [smem:[#allocation30_spill]] %s4923_s5 }
   0x7   :  { %4952 = sst [smem:[#allocation31_spill]] %s4924_s6 }
   0x8   :  { %4953 = sst [smem:[#allocation32_spill]] %s4925_s7 }
   0x9   :  { %4954 = sst [smem:[#allocation33_spill]] %s4926_s8 }
   0xa   :  { %4955 = sst [smem:[#allocation34_spill]] %s4929_s11 }
   0xb   :  { %4956 = sst [smem:[#allocation35_spill]] %s4932_s14 }
   0xc   :  { %4957 = sst [smem:[#allocation36_spill]] %s4936_s18 }
   0xd   :  { %29 = vsyncpa [#allocation3], 0 }
   0xe   :  { %30 = vsyncpa [#allocation5], 0 }
   0xf   :  { %31 = vsyncpa [#allocation8], 0 }
  0x10   :  { %32 = vsyncpa [#allocation11], 0 }
  0x11   :  { %33 = vsyncpa [#allocation14], 0 }
  0x12   :  { %34 = vsyncpa [#allocation17], 0  ;;  %s4272_s5 = smov 0  }
  0x13 LB: > { %4958 = sst [smem:[#allocation24_spill]] %s4115_s5  ;;  %s4278_s26 = sadd.s32 4294967295, %s4115_s5   ;;  %s4115_s5 = sphi %s4272_s5, %s40_s5  }
  0x14   : > { %p3591_p0 = scmp.ge.s32.totalorder %s4115_s5, 1  ;;  %p585_p1 = scmp.lt.s32.totalorder %s4115_s5, 3 }
  0x15   : > { %p3703_p2 = scmp.eq.s32.totalorder %s4278_s26, 0  ;;  %s4959_s6 = sld [smem:[#allocation32_spill]] }
  0x16   : > { %p4286_p3 = pnand %p3591_p0, %p585_p1  ;;  %s4961_s11 = sld [smem:[#allocation34_spill]] }
  0x17   : > { %s4117_s3 = smov [#allocation4]   ;;  %s4118_s4 = smov [#allocation7]  }
  0x18   : > { %p3672_p4 = pneg %p4286_p3  ;;  %s624_s25 = sshll.u32 %s4117_s3, 4  ;;  %s625_s25 = int_to_ptr.vmem [resolvable:$true] %s624_s25 }
  0x19   : > { %s658_s1 = sshll.u32 %s4118_s4, 4  ;;  %s4963_s14 = sld [smem:[#allocation35_spill]]  ;;  %s659_s1 = int_to_ptr.vmem [resolvable:$true] %s658_s1 }
  0x1a   : > { %p4297_p5 = pnand %p3703_p2, %p3672_p4  ;;  %s4119_s0 = smov 256  }
  0x1b   : > { %s622_s2 = sshll.u32 %s4959_s6, 4  ;;  %s4120_s7 = smov 16   ;;  %s623_s2 = int_to_ptr.hbm [resolvable:$true] %s622_s2 }
  0x1c   : > { %s656_s30 = sshll.u32 %s4961_s11, 4  ;;  %s4121_s3 = smov [#allocation10]   ;;  %s657_s30 = int_to_ptr.hbm [resolvable:$true] %s656_s30 }
  0x1d   : > { %3678 = dma.hbm_to_vmem [thread:$0]  (!%p4297_p5), %s623_s2, 8192, %s625_s25, [#allocation5], %s4119_s0, %s4119_s0, %s4120_s7  }
  0x1e   : > { %3684 = dma.hbm_to_vmem [thread:$0]  (!%p4297_p5), %s657_s30, 8192, %s659_s1, [#allocation8], %s4119_s0, %s4119_s0, %s4120_s7  }
  0x1f   : > { %s687_s6 = sshll.u32 %s4963_s14, 4  ;;  %s689_s4 = sshll.u32 %s4121_s3, 4  ;;  %s688_s6 = int_to_ptr.hbm [resolvable:$true] %s687_s6  ;;  %s690_s4 = int_to_ptr.vmem [resolvable:$true] %s689_s4 }
  0x20   : > { %s4964_s18 = sld [smem:[#allocation36_spill]]  ;;  %s4122_s30 = smov [#allocation13]  }
  0x21   : > { %3690 = dma.hbm_to_vmem [thread:$0]  (!%p4297_p5), %s688_s6, 8192, %s690_s4, [#allocation11], %s4119_s0, %s4119_s0, %s4120_s7  }
  0x22   : > { %s4965_s14 = sld [smem:[#allocation30_spill]]  ;;  %s723_s1 = sshll.u32 %s4122_s30, 4  ;;  %s724_s1 = int_to_ptr.vmem [resolvable:$true] %s723_s1 }
  0x23   : > { %s4123_s11 = smov [#allocation2]   ;;  %s639_s6 = sshll.u32 %s4927_s9, 4  ;;  %s640_s6 = int_to_ptr.hbm [resolvable:$true] %s639_s6 }
  0x24   : > { %s607_s3 = sshll.u32 %s4123_s11, 4  ;;  %s673_s2 = sshll.u32 %s4931_s13, 4  ;;  %s608_s3 = int_to_ptr.vmem [resolvable:$true] %s607_s3  ;;  %s674_s2 = int_to_ptr.hbm [resolvable:$true] %s673_s2 }
  0x25   : > { %s4124_s25 = smov [#allocation6]   ;;  %s4126_s4 = smov [#allocation12]  }
  0x26   : > { %s721_s28 = sshll.u32 %s4964_s18, 4  ;;  %s4125_s18 = smov [#allocation9]   ;;  %s722_s28 = int_to_ptr.hbm [resolvable:$true] %s721_s28 }
  0x27   : > { %3696 = dma.hbm_to_vmem [thread:$0]  (!%p4297_p5), %s722_s28, 8192, %s724_s1, [#allocation14], %s4119_s0, %s4119_s0, %s4120_s7  }
  0x28   : > { %s605_s5 = sshll.u32 %s4965_s14, 4  ;;  %s641_s28 = sshll.u32 %s4124_s25, 4  ;;  %s606_s5 = int_to_ptr.hbm [resolvable:$true] %s605_s5  ;;  %s642_s28 = int_to_ptr.vmem [resolvable:$true] %s641_s28 }
  0x29   : > { %3675 = dma.hbm_to_vmem [thread:$0]  (!%p4297_p5), %s606_s5, 4096, %s608_s3, [#allocation3], %s4119_s0, %s4119_s0, %s4120_s7  }
  0x2a   : > { %3681 = dma.hbm_to_vmem [thread:$0]  (!%p4297_p5), %s640_s6, 8192, %s642_s28, [#allocation5], %s4119_s0, %s4119_s0, %s4120_s7  }
  0x2b   : > { %s675_s30 = sshll.u32 %s4125_s18, 4  ;;  %s704_s5 = sshll.u32 %s4934_s16, 4  ;;  %s676_s30 = int_to_ptr.vmem [resolvable:$true] %s675_s30  ;;  %s705_s5 = int_to_ptr.hbm [resolvable:$true] %s704_s5 }
  0x2c   : > { %3687 = dma.hbm_to_vmem [thread:$0]  (!%p4297_p5), %s674_s2, 4096, %s676_s30, [#allocation8], %s4119_s0, %s4119_s0, %s4120_s7  }
  0x2d   : > { %s738_s14 = sshll.u32 %s4938_s20, 4  ;;  %s706_s6 = sshll.u32 %s4126_s4, 4  ;;  %s739_s14 = int_to_ptr.hbm [resolvable:$true] %s738_s14  ;;  %s707_s6 = int_to_ptr.vmem [resolvable:$true] %s706_s6 }
  0x2e   : > { %3693 = dma.hbm_to_vmem [thread:$0]  (!%p4297_p5), %s705_s5, 8192, %s707_s6, [#allocation11], %s4119_s0, %s4119_s0, %s4120_s7  }
  0x2f   : > { %s4127_s25 = smov [#allocation15]   ;;  %s755_s2 = sshll.u32 %s4940_s22, 4  ;;  %s756_s2 = int_to_ptr.hbm [resolvable:$true] %s755_s2 }
  0x30   : > { %s740_s28 = sshll.u32 %s4127_s25, 4  ;;  %s4128_s30 = smov [#allocation16]   ;;  %s741_s28 = int_to_ptr.vmem [resolvable:$true] %s740_s28 }
  0x31   : > { %3699 = dma.hbm_to_vmem [thread:$0]  (!%p4297_p5), %s739_s14, 8192, %s741_s28, [#allocation14], %s4119_s0, %s4119_s0, %s4120_s7  }
  0x32   : > { %s757_s11 = sshll.u32 %s4128_s30, 4  ;;  %s4129_s3 = smov 128   ;;  %s758_s11 = int_to_ptr.vmem [resolvable:$true] %s757_s11 }
  0x33   : > { %s4130_s27 = smov 8   ;;  %790 = sbr.rel (%p4286_p3) target bundleno = 2279 (0x8e7), region = 116 }
  0x34   : > { %3702 = dma.hbm_to_vmem [thread:$0]  (!%p4297_p5), %s756_s2, 4096, %s758_s11, [#allocation17], %s4129_s3, %s4129_s3, %s4130_s27  }
  0x38   : > { %4090 = dma.done.wait (%p3703_p2), [#allocation3], 4096  }
  0x39   : > { %4092 = vsyncadd (%p3703_p2), [#allocation3], 4294963200 }
  0x3a   : > { %4094 = dma.done.wait (%p3703_p2), [#allocation5], 16384  }
  0x3b   : > { %4096 = vsyncadd (%p3703_p2), [#allocation5], 4294950912 }
  0x3c   : > { %4098 = dma.done.wait (%p3703_p2), [#allocation8], 12288  }
  0x3d   : > { %4100 = vsyncadd (%p3703_p2), [#allocation8], 4294955008 }
  0x3e   : > { %4102 = dma.done.wait (%p3703_p2), [#allocation11], 16384  }
  0x3f   : > { %4104 = vsyncadd (%p3703_p2), [#allocation11], 4294950912 }
  0x40   : > { %4106 = dma.done.wait (%p3703_p2), [#allocation14], 16384  }
  0x41   : > { %4108 = vsyncadd (%p3703_p2), [#allocation14], 4294950912 }
  0x42   : > { %4110 = dma.done.wait (%p3703_p2), [#allocation17], 4096  }
  0x43   : > { %4112 = vsyncadd (%p3703_p2), [#allocation17], 4294963200  ;;  %p904_p6 = scmp.lt.s32.totalorder %s4278_s26, 1  ;;  %v4131_v0 = vmov 0   ;;  %s4966_s7 = sld [smem:[#allocation26_spill]]  ;;  %v4132_v2 = vmov 1  }
  0x44   : > { %3761 = vset.pattern.permute.xlu0 %v4131_v0  ;;  %s4967_s6 = sld [smem:[#allocation25_spill]]  ;;  %v4133_v17 = vmov 683565275   ;;  %v4134_v19 = vmov 2475754826   ;;  %s4139_s25 = smov 127  }
  0x45   : > { %s4977_s26 = smov (!%p904_p6, %s4278_s26), 1  ;;  %v4135_v22 = vmov 2131351028   ;;  %v4136_v25 = vmov 2102212464   ;;  %s4968_s28 = sld [smem:[#allocation28_spill]] }
  0x46   : > { %s4401_s29 = sshll.u32 %s4977_s26, 3  ;;  %v4137_v28 = vmov 920167782   ;;  %v4138_v31 = vmov 1326507024   ;;  %s4972_s26 = sld [smem:[#allocation31_spill]] }
  0x47   : > { %s4973_s1 = sld [smem:[#allocation33_spill]]  ;;  %s4140_s18 = smov 125  }
  0x48   : > { %s4974_s4 = sld [smem:[#allocation27_spill]]  ;;  %s4142_s27 = smov 2  }
  0x49   : > { %s907_s5 = scalar_lea.vmem %s4966_s7, %s4401_s29  ;;  %s4143_s7 = smov 3  }
  0x4a   : > { %v916_v1 = vld [vmem:[%s907_s5] sm:$0xff]  ;;  %s4971_s5 = sld [smem:[#allocation29_spill]] }
  0x4b   : > { %924 = vperm.xlu0 %3761, %v916_v1   ;;  %v3770_v3 = vld [vmem:[%s4967_s6] ss:$0 sm:$0xff] }
  0x53   : > { %3762 = vset.pattern.permute.xlu0 %v4132_v2 }
  0x54   : > { %1250 = vperm.xlu0 %3762, %v916_v1  }
  0xbd   : > { %v4411_v4 = vpop.permute.xlu0 %924 }
  0xbe   : > { %v4414_v5 = vmul.f32 %v3770_v3, %v4411_v4 }
  0xc0   : > { %v934_v6 = vand.u32 2139095040, %v4414_v5  ;;  %v931_v9 = vand.u32 2147483647, %v4414_v5  ;;  %vm933_vm12 = vcmp.lt.s32.totalorder %v4414_v5, 0 }
  0xc2   : > { %v935_v7 = vshrl.u32 %v934_v6, 23  ;;  %v938_v11 = vand.u32 8388607, %v931_v9  ;;  %vm4532_vm13 = vcmp.le.f32.partialorder %v931_v9, 0.7853982 }
  0xc4   : > { %v3617_v8 = vadd.s32 4294967169, %v935_v7  ;;  %v939_v15 = vor.u32 8388608, %v938_v11 }
  0xc6   : > { %v941_v10 = vadd.s32 1, %v3617_v8  ;;  %v4440_v38 = vshll.u32 %v939_v15, 8 }
  0xc8   : > { %vm942_vm0 = vcmp.gt.s32.totalorder %v941_v10, 0  ;;  %v980_v47 = vand.u32 65535, %v4440_v38  ;;  %v981_v48 = vshrl.u32 %v4440_v38, 16 }
  0xc9   : > { %v943_v12 = vsel %vm942_vm0, %v941_v10, 0 }
  0xca   : > { %v945_v13 = vand.u32 31, %v943_v12  ;;  %v4422_v16 = vshrl.u32 %v943_v12, 5 }
  0xcc   : > { %v4420_v14 = vsub.s32 32, %v945_v13  ;;  %v948_v18 = vshll.u32 %v4133_v17, %v945_v13  ;;  %v951_v20 = vshll.u32 %v4134_v19, %v945_v13  ;;  %v954_v24 = vshll.u32 %v4135_v22, %v945_v13 }
  0xcd   : > { %v957_v27 = vshll.u32 %v4136_v25, %v945_v13  ;;  %v960_v30 = vshll.u32 %v4137_v28, %v945_v13  ;;  %vm963_vm1 = vcmp.lt.s32.totalorder %v4422_v16, 1  ;;  %vm966_vm2 = vcmp.lt.s32.totalorder %v4422_v16, 4 }
  0xce   : > { %v949_v21 = vshrl.u32 %v4134_v19, %v4420_v14  ;;  %v952_v23 = vshrl.u32 %v4135_v22, %v4420_v14  ;;  %v955_v26 = vshrl.u32 %v4136_v25, %v4420_v14  ;;  %v958_v29 = vshrl.u32 %v4137_v28, %v4420_v14 }
  0xcf   : > { %v961_v32 = vshrl.u32 %v4138_v31, %v4420_v14  ;;  %vm965_vm3 = vcmp.lt.s32.totalorder %v4422_v16, 3  ;;  %vm964_vm4 = vcmp.lt.s32.totalorder %v4422_v16, 2  ;;  %v947_v15 = vshrl.u32 %v4133_v17, %v4420_v14  ;;  %v1275_v16 = vld [vmem:[%s4968_s28 + $0x68] sm:$0xff] }
  0xd0   : > { %v950_v33 = vor.u32 %v949_v21, %v948_v18  ;;  %v953_v34 = vor.u32 %v952_v23, %v951_v20  ;;  %v956_v35 = vor.u32 %v955_v26, %v954_v24  ;;  %v959_v36 = vor.u32 %v958_v29, %v957_v27 }
  0xd1   : > { %v962_v37 = vor.u32 %v961_v32, %v960_v30 }
  0xd2   : > { %v971_v39 = vsel %vm963_vm1, %v950_v33, %v953_v34  ;;  %v975_v40 = vsel %vm963_vm1, %v953_v34, %v956_v35  ;;  %v972_v41 = vsel %vm966_vm2, %v959_v36, 920167782  ;;  %v968_v11 = vsel %vm966_vm2, %v956_v35, 2102212464 }
  0xd3   : > { %v976_v42 = vsel %vm966_vm2, %v962_v37, 1326507024  ;;  %v973_v43 = vsel %vm965_vm3, %v956_v35, %v972_v41  ;;  %v967_v26 = vsel %vm963_vm1, %v947_v15, %v950_v33  ;;  %v969_v27 = vsel %vm965_vm3, %v953_v34, %v968_v11  ;;  %v1276_v34 = vld [vmem:[%s4968_s28 + $0x70] sm:$0xff] }
  0xd4   : > { %v977_v44 = vsel %vm965_vm3, %v959_v36, %v976_v42  ;;  %v974_v45 = vsel %vm964_vm4, %v971_v39, %v973_v43  ;;  %v970_v14 = vsel %vm964_vm4, %v967_v26, %v969_v27  ;;  %v1331_v26 = vld [vmem:[#allocation2 + $0xe8] sm:$0xff]  ;;  %v1328_v27 = vld [vmem:[#allocation2 + $0xd0] sm:$0xff] }
  0xd5   : > { %v978_v46 = vsel %vm964_vm4, %v975_v40, %v977_v44  ;;  %v1004_v51 = vand.u32 65535, %v974_v45  ;;  %v1005_v52 = vshrl.u32 %v974_v45, 16  ;;  %v1277_v40 = vld [vmem:[%s4968_s28 + $0x78] sm:$0xff]  ;;  %v1024_v41 = vmul.u32 %v4440_v38, %v970_v14  ;;  %v1274_v44 = vld [vmem:[%s4968_s28 + $0x60] sm:$0xff]  ;;  %v1272_v38 = vld [vmem:[%s4968_s28 + $0x50] sm:$0xff] }
  0xd6   : > { %v982_v49 = vand.u32 65535, %v978_v46  ;;  %v983_v50 = vshrl.u32 %v978_v46, 16  ;;  %1282 = vmatpush.msra.mxu0 %v1277_v40  ;;  %v1273_v46 = vld [vmem:[%s4968_s28 + $0x58] sm:$0xff] }
  0xd7   : > { %v1007_v55 = vmul.u32 %v1005_v52, %v980_v47  ;;  %v1008_v56 = vmul.u32 %v1004_v51, %v981_v48  ;;  %v1006_v60 = vmul.u32 %v1004_v51, %v980_v47  ;;  %v1009_v1 = vmul.u32 %v1005_v52, %v981_v48  ;;  %v1269_v52 = vld [vmem:[%s4968_s28 + $0x38] sm:$0xff] }
  0xd8   : > { %v985_v53 = vmul.u32 %v983_v50, %v980_v47  ;;  %v986_v54 = vmul.u32 %v982_v49, %v981_v48  ;;  %v984_v57 = vmul.u32 %v982_v49, %v980_v47  ;;  %v987_v59 = vmul.u32 %v983_v50, %v981_v48  ;;  %1283 = vmatpush.msra.mxu0 %v1276_v34  ;;  %v1271_v48 = vld [vmem:[%s4968_s28 + $0x48] sm:$0xff]  ;;  %v1270_v50 = vld [vmem:[%s4968_s28 + $0x40] sm:$0xff]  ;;  %v1325_v14 = vld [vmem:[#allocation2 + $0xb8] sm:$0xff] }
  0xd9   : > { %v1010_v61 = vshll.u32 %v1007_v55, 16  ;;  %v1012_v6 = vshll.u32 %v1008_v56, 16  ;;  %v1011_v23 = vshrl.u32 %v1007_v55, 16  ;;  %v1013_v32 = vshrl.u32 %v1008_v56, 16 }
  0xda   : > { %v988_v58 = vshll.u32 %v985_v53, 16  ;;  %v990_v62 = vshll.u32 %v986_v54, 16  ;;  %v989_v18 = vshrl.u32 %v985_v53, 16  ;;  %v991_v29 = vshrl.u32 %v986_v54, 16  ;;  %1284 = vmatpush.msra.mxu0 %v1275_v16  ;;  %v1268_v54 = vld [vmem:[%s4968_s28 + $0x30] sm:$0xff] }
  0xdb   : > { %vm1014_vm6 = vc.u32 %v1006_v60, %v1010_v61  ;;  %v1016_v7 = vadd.s32 %v1010_v61, %v1006_v60  ;;  %v1265_v60 = vld [vmem:[%s4968_s28 + $0x18] sm:$0xff]  ;;  %v1320_v16 = vld [vmem:[#allocation2 + $0x90] sm:$0xff] }
  0xdc   : > { %vm992_vm5 = vc.u32 %v984_v57, %v988_v58  ;;  %v994_v63 = vadd.s32 %v988_v58, %v984_v57  ;;  %v1015_v10 = vsel %vm1014_vm6, 1, %v4131_v0  ;;  %1285 = vmatpush.msra.mxu0 %v1274_v44  ;;  %v1267_v57 = vld [vmem:[%s4968_s28 + $0x28] sm:$0xff] }
  0xdd   : > { %v993_v3 = vsel %vm992_vm5, 1, %v4131_v0  ;;  %v1017_v13 = vadd.s32 %v1015_v10, %v1009_v1  ;;  %vm1018_vm8 = vc.u32 %v1016_v7, %v1012_v6  ;;  %v1020_v37 = vadd.s32 %v1016_v7, %v1012_v6  ;;  %v1263_v10 = vld [vmem:[%s4968_s28 + $0x8] sm:$0xff] }
  0xde   : > { %v995_v8 = vadd.s32 %v993_v3, %v987_v59  ;;  %vm996_vm7 = vc.u32 %v994_v63, %v990_v62  ;;  %v1019_v21 = vsel %vm1018_vm8, 1, %v4131_v0  ;;  %1286 = vmatpush.msra.mxu0 %v1273_v46  ;;  %v1266_v59 = vld [vmem:[%s4968_s28 + $0x20] sm:$0xff]  ;;  %v1264_v3 = vld [vmem:[%s4968_s28 + $0x10] sm:$0xff] }
  0xdf   : > { %v997_v12 = vsel %vm996_vm7, 1, %v4131_v0  ;;  %v1021_v24 = vadd.s32 %v1019_v21, %v1017_v13  ;;  %v1262_v13 = vld [vmem:[%s4968_s28] sm:$0xff] }
  0xe0   : > { %v999_v20 = vadd.s32 %v997_v12, %v995_v8  ;;  %1287 = vmatpush.msra.mxu0 %v1272_v38  ;;  %v1330_v21 = vld [vmem:[#allocation2 + $0xe0] sm:$0xff] }
  0xe1   : > { %v1022_v35 = vadd.s32 %v1021_v24, %v1011_v23  ;;  %v3771_v38 = vld [vmem:[%s4967_s6 + $0x3] ss:$0 sm:$0xff] }
  0xe2   : > { %v1000_v30 = vadd.s32 %v999_v20, %v989_v18  ;;  %1288 = vmatpush.msra.mxu0 %v1271_v48  ;;  %v1332_v18 = vld [vmem:[#allocation2 + $0xf0] sm:$0xff]  ;;  %v1333_v20 = vld [vmem:[#allocation2 + $0xf8] sm:$0xff]  ;;  %v1318_v48 = vld [vmem:[#allocation2 + $0x80] sm:$0xff] }
  0xe3   : > { %v1023_v39 = vadd.s32 %v1022_v35, %v1013_v32  ;;  %1340 = vmatpush.msra.mxu1 %v1332_v18  ;;  %1360 = vmatpush.msra.mxu2 %v1333_v20  ;;  %v1326_v32 = vld [vmem:[#allocation2 + $0xc0] sm:$0xff]  ;;  %v1327_v35 = vld [vmem:[#allocation2 + $0xc8] sm:$0xff] }
  0xe4   : > { %v1001_v36 = vadd.s32 %v1000_v30, %v991_v29  ;;  %1289 = vmatpush.msra.mxu0 %v1270_v50  ;;  %v1329_v29 = vld [vmem:[#allocation2 + $0xd8] sm:$0xff]  ;;  %v1251_v50 = vpop.permute.xlu0 %1250  ;;  %v1310_v18 = vld [vmem:[#allocation2 + $0x40] sm:$0xff]  ;;  %v1311_v20 = vld [vmem:[#allocation2 + $0x48] sm:$0xff] }
  0xe5   : > { %v1027_v33 = vadd.s32 1, %v1023_v39  ;;  %1341 = vmatpush.msra.mxu1 %v1330_v21  ;;  %1361 = vmatpush.msra.mxu2 %v1331_v26 }
  0xe6   : > { %vm1026_vm9 = vc.u32 %v1001_v36, %v1020_v37  ;;  %1290 = vmatpush.msra.mxu0 %v1269_v52  ;;  %v1025_v62 = vadd.s32 %v1020_v37, %v1001_v36  ;;  %v1324_v37 = vld [vmem:[#allocation2 + $0xb0] sm:$0xff] }
  0xe7   : > { %v1028_v42 = vsel %vm1026_vm9, %v1027_v33, %v1023_v39  ;;  %1342 = vmatpush.msra.mxu1 %v1328_v27  ;;  %1362 = vmatpush.msra.mxu2 %v1329_v29  ;;  %v1308_v29 = vld [vmem:[#allocation2 + $0x30] sm:$0xff]  ;;  %v1307_v39 = vld [vmem:[#allocation2 + $0x28] sm:$0xff] }
  0xe8   : > { %v1029_v43 = vadd.s32 %v1028_v42, %v1024_v41  ;;  %1291 = vmatpush.msra.mxu0 %v1268_v54  ;;  %v1322_v41 = vld [vmem:[#allocation2 + $0xa0] sm:$0xff]  ;;  %v1323_v42 = vld [vmem:[#allocation2 + $0xa8] sm:$0xff] }
  0xe9   : > { %1343 = vmatpush.msra.mxu1 %v1326_v32  ;;  %1363 = vmatpush.msra.mxu2 %v1327_v35 }
  0xea   : > { %v1030_v45 = vadd.s32 536870912, %v1029_v43  ;;  %1292 = vmatpush.msra.mxu0 %v1267_v57  ;;  %v919_v57 = vld [vmem:[%s4967_s6 + $0x2] sm:$0x1] }
  0xeb   : > { %1344 = vmatpush.msra.mxu1 %v1324_v37  ;;  %1364 = vmatpush.msra.mxu2 %v1325_v14  ;;  %vm929_vm0 = vcmp.gt.f32.partialorder %v919_v57, 0.5  ;;  %v1306_v14 = vld [vmem:[#allocation2 + $0x20] sm:$0xff]  ;;  %v1443_v57 = vld [vmem:[#allocation4 + $0x1e8] sm:$0xff] }
  0xec   : > { %v4496_v47 = vshrl.u32 %v1030_v45, 30  ;;  %1293 = vmatpush.msra.mxu0 %v1266_v59  ;;  %v1244_v26 = vsel %vm929_vm0, 1, %v4131_v0 }
  0xed   : > { %1345 = vmatpush.msra.mxu1 %v1322_v41  ;;  %1365 = vmatpush.msra.mxu2 %v1323_v42  ;;  %v1245_v37 = vperm.slane %v1244_v26, 0  ;;  %v1396_v26 = vld [vmem:[#allocation4 + $0x70] sm:$0xff] }
  0xee   : > { %v1032_v49 = vshll.u32 %v4496_v47, 30  ;;  %1294 = vmatpush.msra.mxu0 %v1265_v60  ;;  %v1055_v33 = vsub.s32 4, %v4496_v47  ;;  %v1253_v60 = vsub.f32 %v3771_v38, %v1251_v50  ;;  %v1304_v38 = vld [vmem:[#allocation2 + $0x10] sm:$0xff]  ;;  %v1303_v50 = vld [vmem:[#allocation2 + $0x8] sm:$0xff] }
  0xef   : > { %1346 = vmatpush.msra.mxu1 %v1320_v16 }
  0xf0   : > { %v1033_v51 = vsub.s32 %v1029_v43, %v1032_v49  ;;  %1295 = vmatpush.msra.mxu0 %v1264_v3  ;;  %v1321_v43 = vld [vmem:[#allocation2 + $0x98] sm:$0xff]  ;;  %v1056_v44 = vsel %vm933_vm12, %v1055_v33, %v4496_v47  ;;  %v1319_v49 = vld [vmem:[#allocation2 + $0x88] sm:$0xff]  ;;  %v918_v47 = vld [vmem:[%s4967_s6 + $0x1] sm:$0x1] }
  0xf1   : > { %1366 = vmatpush.msra.mxu2 %v1321_v43  ;;  %v1058_v54 = vsel %vm4532_vm13, 0, %v1056_v44  ;;  %1347 = vmatpush.msra.mxu1 %v1318_v48  ;;  %vm930_vm15 = vcmp.gt.f32.partialorder %v918_v47, 0.5  ;;  %v1305_v48 = vld [vmem:[#allocation2 + $0x18] sm:$0xff]  ;;  %v1408_v47 = vld [vmem:[#allocation4 + $0xd0] sm:$0xff] }
  0xf2   : > { %vm1034_vm10 = vcmp.lt.s32.totalorder %v1033_v51, 0  ;;  %v1035_v53 = vsub.s32 0, %v1033_v51  ;;  %1296 = vmatpush.msra.mxu0 %v1263_v10  ;;  %v1075_v3 = vadd.s32 3, %v1058_v54 }
  0xf3   : > { %1367 = vmatpush.msra.mxu2 %v1319_v49  ;;  %v1302_v49 = vld [vmem:[#allocation2] sm:$0xff] }
  0xf4   : > { %v1036_v55 = vsel %vm1034_vm10, %v1035_v53, %v1033_v51  ;;  %1297 = vmatpush.msra.mxu0 %v1262_v13  ;;  %v1230_v13 = vand.u32 3, %v1058_v54  ;;  %vm1074_vm10 = vweird.f32 %v4414_v5  ;;  %v1444_v54 = vld [vmem:[#allocation4 + $0x1f0] sm:$0xff] }
  0xf5   : > { %v1037_v56 = vclz %v1036_v55  ;;  %v1316_v55 = vld [vmem:[#allocation2 + $0x70] sm:$0xff] }
  0xf6   : > { %1348 = vmatpush.msra.mxu1 %v1316_v55  ;;  %vm1231_vm2 = vcmp.lt.s32.totalorder %v1230_v13, 2  ;;  %vm1232_vm4 = vcmp.eq.s32.totalorder %v1230_v13, 0  ;;  %vm1235_vm5 = vcmp.eq.s32.totalorder %v1230_v13, 2  ;;  %v1409_v55 = vld [vmem:[#allocation4 + $0xd8] sm:$0xff]  ;;  %1472 = vmatpush.msrb.mxu0 %v1444_v54  ;;  %v1418_v54 = vld [vmem:[#allocation4 + $0x120] sm:$0xff] }
  0xf7   : > { %v3618_v58 = vadd.s32 4294967294, %v1037_v56  ;;  %v1317_v56 = vld [vmem:[#allocation2 + $0x78] sm:$0xff] }
  0xf8   : > { %1368 = vmatpush.msra.mxu2 %v1317_v56  ;;  %v1442_v56 = vld [vmem:[#allocation4 + $0x1e0] sm:$0xff]  ;;  %v1401_v13 = vld [vmem:[#allocation4 + $0x98] sm:$0xff] }
  0xf9   : > { %vm3619_vm11 = vcmp.lt.s32.totalorder %v3618_v58, 0  ;;  %1473 = vmatpush.msrb.mxu0 %v1442_v56  ;;  %v1417_v56 = vld [vmem:[#allocation4 + $0x118] sm:$0xff] }
  0xfa   : > { %v1040_v61 = vsel %vm3619_vm11, 0, %v3618_v58  ;;  %vm1246_vm11 = vcmp.eq.s32.totalorder %v1245_v37, 1  ;;  %v1426_v37 = vld [vmem:[#allocation4 + $0x160] sm:$0xff] }
  0xfb   : > { %v1041_v63 = vsub.s32 32, %v1040_v61  ;;  %v1045_v1 = vsub.s32 4294967266, %v1040_v61  ;;  %v1042_v6 = vshll.u32 %v1033_v51, %v1040_v61  ;;  %v921_v51 = vld [vmem:[%s4967_s6 + $0x4] sm:$0x1] }
  0xfc   : > { %vm1256_vm14 = vcmp.gt.f32.partialorder %v921_v51, 0.5  ;;  %v1314_v61 = vld [vmem:[#allocation2 + $0x60] sm:$0xff]  ;;  %v1412_v51 = vld [vmem:[#allocation4 + $0xf0] sm:$0xff] }
  0xfd   : > { %v1043_v7 = vshrl.u32 %v1025_v62, %v1041_v63  ;;  %v1046_v8 = vadd.s32 127, %v1045_v1  ;;  %v1315_v62 = vld [vmem:[#allocation2 + $0x68] sm:$0xff]  ;;  %1349 = vmatpush.msra.mxu1 %v1314_v61  ;;  %1452 = vmatpush.msra.mxu3 %v1412_v51  ;;  %v1441_v61 = vld [vmem:[#allocation4 + $0x1d8] sm:$0xff] }
  0xfe   : > { %1369 = vmatpush.msra.mxu2 %v1315_v62  ;;  %v1438_v62 = vld [vmem:[#allocation4 + $0x1c0] sm:$0xff]  ;;  %v1423_v51 = vld [vmem:[#allocation4 + $0x148] sm:$0xff] }
  0xff   : > { %v1044_v11 = vor.u32 %v1043_v7, %v1042_v6  ;;  %v1047_v12 = vshll.u32 %v1046_v8, 23  ;;  %v1312_v6 = vld [vmem:[#allocation2 + $0x50] sm:$0xff]  ;;  %v1313_v7 = vld [vmem:[#allocation2 + $0x58] sm:$0xff] }
 0x100   : > { %1350 = vmatpush.msra.mxu1 %v1312_v6  ;;  %1370 = vmatpush.msra.mxu2 %v1313_v7  ;;  %v1436_v6 = vld [vmem:[#allocation4 + $0x1b0] sm:$0xff]  ;;  %v1402_v7 = vld [vmem:[#allocation4 + $0xa0] sm:$0xff] }
 0x101   : > { %v1048_v15 = vor.u32 4788187, %v1047_v12  ;;  %v1051_v24 = vcvt.s32.f32 %v1044_v11  ;;  %v1257_v11 = vsel %vm1256_vm14, 1, %v4131_v0  ;;  %v1254_v12 = vand.u32 2147483647, %v1253_v60  ;;  %v1440_v60 = vld [vmem:[#allocation4 + $0x1d0] sm:$0xff] }
 0x102   : > { %v1258_v27 = vperm.slane %v1257_v11, 0  ;;  %1351 = vmatpush.msra.mxu1 %v1310_v18  ;;  %1371 = vmatpush.msra.mxu2 %v1311_v20  ;;  %v1434_v11 = vld [vmem:[#allocation4 + $0x1a0] sm:$0xff]  ;;  %v1432_v18 = vld [vmem:[#allocation4 + $0x190] sm:$0xff] }
 0x103   : > { %v1049_v23 = vand.u32 2147483647, %v1048_v15  ;;  %v1240_v15 = vsel %vm930_vm15, 1, %v4131_v0  ;;  %vm1255_vm1 = vcmp.lt.f32.partialorder %v1254_v12, 0.5  ;;  %1474 = vmatpush.msrb.mxu0 %v1440_v60  ;;  %v1400_v12 = vld [vmem:[#allocation4 + $0x90] sm:$0xff]  ;;  %v1398_v20 = vld [vmem:[#allocation4 + $0x80] sm:$0xff] }
 0x104   : > { %1352 = vmatpush.msra.mxu1 %v1308_v29  ;;  %vm1259_vm8 = vcmp.eq.s32.totalorder %v1258_v27, 1  ;;  %v1397_v27 = vld [vmem:[#allocation4 + $0x78] sm:$0xff]  ;;  %v1431_v29 = vld [vmem:[#allocation4 + $0x188] sm:$0xff] }
 0x105   : > { %v1052_v30 = vmul.f32 %v1051_v24, %v1049_v23  ;;  %v1076_v24 = vand.u32 3, %v1075_v3  ;;  %v1439_v3 = vld [vmem:[#allocation4 + $0x1c8] sm:$0xff]  ;;  %1475 = vmatpush.msrb.mxu0 %v1438_v62  ;;  %v1565_v60 = vld [vmem:[#allocation6 + $0xf8] sm:$0xff] }
 0x106   : > { %1353 = vmatpush.msra.mxu1 %v1306_v14  ;;  %v1392_v14 = vld [vmem:[#allocation4 + $0x50] sm:$0xff]  ;;  %v1563_v62 = vld [vmem:[#allocation6 + $0xe8] sm:$0xff] }
 0x107   : > { %v1053_v36 = vxor.u32 2147483648, %v1052_v30  ;;  %vm1081_vm3 = vcmp.eq.s32.totalorder %v1076_v24, 2  ;;  %vm1077_vm6 = vcmp.lt.s32.totalorder %v1076_v24, 2  ;;  %vm1078_vm7 = vcmp.eq.s32.totalorder %v1076_v24, 0  ;;  %1476 = vmatpush.msrb.mxu0 %v1436_v6  ;;  %v1430_v24 = vld [vmem:[#allocation4 + $0x180] sm:$0xff]  ;;  %v1561_v6 = vld [vmem:[#allocation6 + $0xd8] sm:$0xff] }
 0x108   : > { %1354 = vmatpush.msra.mxu1 %v1304_v38  ;;  %v1425_v38 = vld [vmem:[#allocation4 + $0x158] sm:$0xff] }
 0x109   : > { %v1054_v40 = vsel %vm933_vm12, %v1053_v36, %v1052_v30  ;;  %v1309_v30 = vld [vmem:[#allocation2 + $0x38] sm:$0xff]  ;;  %v1241_v36 = vperm.slane %v1240_v15, 0  ;;  %vm1260_vm12 = vmand %vm1255_vm1, %vm1259_vm8  ;;  %v1435_v15 = vld [vmem:[#allocation4 + $0x1a8] sm:$0xff]  ;;  %1477 = vmatpush.msrb.mxu0 %v1434_v11 }
 0x10a   : > { %v4542_v34 = vsel %vm4532_vm13, %v4414_v5, %v1054_v40  ;;  %1372 = vmatpush.msra.mxu2 %v1309_v30  ;;  %v1413_v5 = vld [vmem:[#allocation4 + $0xf8] sm:$0xff]  ;;  %1355 = vmatpush.msra.mxu1 %v1302_v49  ;;  %v1428_v30 = vld [vmem:[#allocation4 + $0x170] sm:$0xff]  ;;  %v1422_v49 = vld [vmem:[#allocation4 + $0x140] sm:$0xff] }
 0x10b   : > { %v1059_v9 = vmul.f32 %v4542_v34, %v4542_v34  ;;  %vm1242_vm9 = vcmp.eq.s32.totalorder %v1241_v36, 1  ;;  %1478 = vmatpush.msrb.mxu0 %v1432_v18  ;;  %v1429_v36 = vld [vmem:[#allocation4 + $0x178] sm:$0xff]  ;;  %v1592_v11 = vld [vmem:[#allocation6 + $0x1d0] sm:$0xff]  ;;  %v1590_v18 = vld [vmem:[#allocation6 + $0x1c0] sm:$0xff] }
 0x10c   : > { %1373 = vmatpush.msra.mxu2 %v1307_v39  ;;  %1492 = vmatpush.msrb.mxu1 %v1413_v5  ;;  %v1393_v39 = vld [vmem:[#allocation4 + $0x58] sm:$0xff]  ;;  %v1382_v5 = vld [vmem:[#allocation4] sm:$0xff] }
 0x10d   : > { %v1060_v45 = vmul.f32 -0.001358992, %v1059_v9  ;;  %v1067_v46 = vmul.f32 -0.00019511016, %v1059_v9  ;;  %1479 = vmatpush.msrb.mxu0 %v1430_v24  ;;  %v1588_v24 = vld [vmem:[#allocation6 + $0x1b0] sm:$0xff] }
 0x10e   : > { %1374 = vmatpush.msra.mxu2 %v1305_v48  ;;  %v1384_v48 = vld [vmem:[#allocation4 + $0x10] sm:$0xff] }
 0x10f   : > { %v1061_v52 = vadd.f32 0.041655596, %v1060_v45  ;;  %v1068_v53 = vadd.f32 0.008332121, %v1067_v46  ;;  %1480 = vmatpush.msrb.mxu0 %v1428_v30  ;;  %v1586_v30 = vld [vmem:[#allocation6 + $0x1a0] sm:$0xff] }
 0x110   : > { %1375 = vmatpush.msra.mxu2 %v1303_v50  ;;  %v1385_v50 = vld [vmem:[#allocation4 + $0x18] sm:$0xff] }
 0x111   : > { %v1062_v58 = vmul.f32 %v1061_v52, %v1059_v9  ;;  %v1069_v59 = vmul.f32 %v1068_v53, %v1059_v9  ;;  %v1410_v52 = vld [vmem:[#allocation4 + $0xe0] sm:$0xff]  ;;  %v1411_v53 = vld [vmem:[#allocation4 + $0xe8] sm:$0xff]  ;;  %1481 = vmatpush.msrb.mxu0 %v1426_v37  ;;  %v1584_v37 = vld [vmem:[#allocation6 + $0x190] sm:$0xff] }
 0x112   : > { %1453 = vmatpush.msra.mxu3 %v1410_v52  ;;  %1493 = vmatpush.msrb.mxu1 %v1411_v53  ;;  %v1420_v52 = vld [vmem:[#allocation4 + $0x130] sm:$0xff]  ;;  %v1383_v53 = vld [vmem:[#allocation4 + $0x8] sm:$0xff] }
 0x113   : > { %v1063_v63 = vadd.f32 -0.4999988, %v1062_v58  ;;  %v1070_v1 = vadd.f32 -0.16666654, %v1069_v59  ;;  %v1406_v58 = vld [vmem:[#allocation4 + $0xc0] sm:$0xff]  ;;  %v1407_v59 = vld [vmem:[#allocation4 + $0xc8] sm:$0xff] }
 0x114   : > { %1454 = vmatpush.msra.mxu3 %v1408_v47  ;;  %1494 = vmatpush.msrb.mxu1 %v1409_v55  ;;  %v1421_v47 = vld [vmem:[#allocation4 + $0x138] sm:$0xff]  ;;  %v1419_v55 = vld [vmem:[#allocation4 + $0x128] sm:$0xff] }
 0x115   : > { %v1064_v8 = vmul.f32 %v1063_v63, %v1059_v9  ;;  %v1071_v10 = vmul.f32 %v1070_v1, %v1059_v9  ;;  %v1404_v63 = vld [vmem:[#allocation4 + $0xb0] sm:$0xff]  ;;  %v1405_v1 = vld [vmem:[#allocation4 + $0xb8] sm:$0xff] }
 0x116   : > { %1455 = vmatpush.msra.mxu3 %v1406_v58  ;;  %1495 = vmatpush.msrb.mxu1 %v1407_v59  ;;  %v1415_v58 = vld [vmem:[#allocation4 + $0x108] sm:$0xff]  ;;  %v1564_v59 = vld [vmem:[#allocation6 + $0xf0] sm:$0xff] }
 0x117   : > { %v1065_v21 = vadd.f32 1.0, %v1064_v8  ;;  %v1072_v23 = vadd.f32 1.0, %v1071_v10  ;;  %v1403_v8 = vld [vmem:[#allocation4 + $0xa8] sm:$0xff]  ;;  %v1437_v10 = vld [vmem:[#allocation4 + $0x1b8] sm:$0xff] }
 0x118   : > { %1456 = vmatpush.msra.mxu3 %v1404_v63  ;;  %1496 = vmatpush.msrb.mxu1 %v1405_v1  ;;  %v1596_v63 = vld [vmem:[#allocation6 + $0x1f0] sm:$0xff] }
 0x119   : > { %v1073_v32 = vmul.f32 %v1072_v23, %v4542_v34  ;;  %v1082_v35 = vxor.u32 2147483648, %v1065_v21  ;;  %v1433_v23 = vld [vmem:[#allocation4 + $0x198] sm:$0xff]  ;;  %v1560_v1 = vld [vmem:[#allocation6 + $0xd0] sm:$0xff] }
 0x11a   : > { %1457 = vmatpush.msra.mxu3 %v1402_v7  ;;  %1497 = vmatpush.msrb.mxu1 %v1403_v8  ;;  %v1594_v7 = vld [vmem:[#allocation6 + $0x1e0] sm:$0xff]  ;;  %v1595_v8 = vld [vmem:[#allocation6 + $0x1e8] sm:$0xff] }
 0x11b   : > { %v1079_v40 = vxor.u32 2147483648, %v1073_v32  ;;  %v1083_v33 = vsel %vm1081_vm3, %v1082_v35, %v1073_v32  ;;  %v1237_v42 = vsel %vm1235_vm5, %v1082_v35, %v1073_v32  ;;  %v1394_v32 = vld [vmem:[#allocation4 + $0x60] sm:$0xff]  ;;  %v1395_v35 = vld [vmem:[#allocation4 + $0x68] sm:$0xff] }
 0x11c   : > { %1458 = vmatpush.msra.mxu3 %v1400_v12  ;;  %1498 = vmatpush.msrb.mxu1 %v1401_v13  ;;  %v1559_v12 = vld [vmem:[#allocation6 + $0xc8] sm:$0xff]  ;;  %v1593_v13 = vld [vmem:[#allocation6 + $0x1d8] sm:$0xff] }
 0x11d   : > { %v1080_v34 = vsel %vm1078_vm7, %v1065_v21, %v1079_v40  ;;  %v1234_v41 = vsel %vm1232_vm4, %v1065_v21, %v1079_v40  ;;  %v1399_v21 = vld [vmem:[#allocation4 + $0x88] sm:$0xff] }
 0x11e   : > { %v1084_v9 = vsel %vm1077_vm6, %v1080_v34, %v1083_v33  ;;  %v1238_v16 = vsel %vm1231_vm2, %v1234_v41, %v1237_v42  ;;  %1459 = vmatpush.msra.mxu3 %v1398_v20  ;;  %1499 = vmatpush.msrb.mxu1 %v1399_v21  ;;  %v1427_v40 = vld [vmem:[#allocation4 + $0x168] sm:$0xff]  ;;  %v1390_v33 = vld [vmem:[#allocation4 + $0x40] sm:$0xff]  ;;  %v1388_v41 = vld [vmem:[#allocation4 + $0x30] sm:$0xff] }
 0x11f   : > { %v1085_v43 = vsel %vm1074_vm10, nan, %v1084_v9  ;;  %v1239_v44 = vsel %vm1074_vm10, nan, %v1238_v16  ;;  %v1391_v34 = vld [vmem:[#allocation4 + $0x48] sm:$0xff]  ;;  %v1389_v42 = vld [vmem:[#allocation4 + $0x38] sm:$0xff]  ;;  %v3772_v9 = vld [vmem:[%s4971_s5] ss:$0 sm:$0xff] }
 0x120   : > { %v1243_v45 = vsel %vm1242_vm9, %v1085_v43, %v1239_v44  ;;  %1460 = vmatpush.msra.mxu3 %v1396_v26  ;;  %1500 = vmatpush.msrb.mxu1 %v1397_v27  ;;  %v1386_v44 = vld [vmem:[#allocation4 + $0x20] sm:$0xff]  ;;  %v1557_v20 = vld [vmem:[#allocation6 + $0xb8] sm:$0xff]  ;;  %v1591_v21 = vld [vmem:[#allocation6 + $0x1c8] sm:$0xff]  ;;  %s4144_s5 = smov 1  }
 0x121   : > { %v1247_v46 = vsel %vm1246_vm11, %v4411_v4, %v1243_v45  ;;  %v1445_v4 = vld [vmem:[#allocation4 + $0x1f8] sm:$0xff]  ;;  %v1424_v45 = vld [vmem:[#allocation4 + $0x150] sm:$0xff]  ;;  %v1555_v26 = vld [vmem:[#allocation6 + $0xa8] sm:$0xff] }
 0x122   : > { %3623 = vmatmul.msk.f32.vlgmr.msra.gmra.mxu0 %vm1260_vm12, %v1247_v46  ;;  %1512 = vmatpush.msrb.mxu2 %v1445_v4  ;;  %v1387_v46 = vld [vmem:[#allocation4 + $0x28] sm:$0xff]  ;;  %v1416_v4 = vld [vmem:[#allocation4 + $0x110] sm:$0xff]  ;;  %v1589_v27 = vld [vmem:[#allocation6 + $0x1b8] sm:$0xff] }
 0x123   : > { %1461 = vmatpush.msra.mxu3 %v1394_v32  ;;  %1501 = vmatpush.msrb.mxu1 %v1395_v35  ;;  %v1553_v32 = vld [vmem:[#allocation6 + $0x98] sm:$0xff]  ;;  %v1587_v35 = vld [vmem:[#allocation6 + $0x1a8] sm:$0xff] }
 0x124   : > { %1513 = vmatpush.msrb.mxu2 %v1443_v57  ;;  %1482 = vmatpush.msrb.mxu0 %v1424_v45  ;;  %v1414_v57 = vld [vmem:[#allocation4 + $0x100] sm:$0xff] }
 0x125   : > { %1462 = vmatpush.msra.mxu3 %v1392_v14  ;;  %1502 = vmatpush.msrb.mxu1 %v1393_v39  ;;  %v1551_v14 = vld [vmem:[#allocation6 + $0x88] sm:$0xff]  ;;  %v1585_v39 = vld [vmem:[#allocation6 + $0x198] sm:$0xff] }
 0x126   : > { %1514 = vmatpush.msrb.mxu2 %v1441_v61  ;;  %1483 = vmatpush.msrb.mxu0 %v1422_v49  ;;  %v1562_v61 = vld [vmem:[#allocation6 + $0xe0] sm:$0xff] }
 0x127   : > { %1463 = vmatpush.msra.mxu3 %v1390_v33  ;;  %1503 = vmatpush.msrb.mxu1 %v1391_v34  ;;  %v1334_v33 = vld [vmem:[%s4972_s26] sm:$0x3]  ;;  %v1549_v34 = vld [vmem:[#allocation6 + $0x78] sm:$0xff]  ;;  %s4604_s26 = scalar_lea.vmem %s4974_s4, %s4401_s29 }
 0x128   : > { %1515 = vmatpush.msrb.mxu2 %v1439_v3  ;;  %1484 = vmatpush.msrb.mxu0 %v1420_v52  ;;  %v1597_v3 = vld [vmem:[#allocation6 + $0x1f8] sm:$0xff]  ;;  %v1582_v49 = vld [vmem:[#allocation6 + $0x180] sm:$0xff]  ;;  %v1580_v52 = vld [vmem:[#allocation6 + $0x170] sm:$0xff] }
 0x129   : > { %1464 = vmatpush.msra.mxu3 %v1388_v41  ;;  %1504 = vmatpush.msrb.mxu1 %v1389_v42  ;;  %v1336_v41 = vperm.slane %v1334_v33, 0 }
 0x12a   : > { %1516 = vmatpush.msrb.mxu2 %v1437_v10  ;;  %1485 = vmatpush.msrb.mxu0 %v1418_v54  ;;  %v1558_v10 = vld [vmem:[#allocation6 + $0xc0] sm:$0xff] }
 0x12b   : > { %1465 = vmatpush.msra.mxu3 %v1386_v44  ;;  %1505 = vmatpush.msrb.mxu1 %v1387_v46  ;;  %v1337_v44 = vperm.slane %v1334_v33, 1  ;;  %v1542_v54 = vld [vmem:[#allocation6 + $0x40] sm:$0xff]  ;;  %v1745_v33 = vld [vmem:[#allocation7 + $0x1d8] sm:$0xff] }
 0x12c   : > { %1517 = vmatpush.msrb.mxu2 %v1435_v15  ;;  %1486 = vmatpush.msrb.mxu0 %v1416_v4  ;;  %v1556_v15 = vld [vmem:[#allocation6 + $0xb0] sm:$0xff]  ;;  %v1543_v4 = vld [vmem:[#allocation6 + $0x48] sm:$0xff] }
 0x12d   : > { %1466 = vmatpush.msra.mxu3 %v1384_v48  ;;  %1506 = vmatpush.msrb.mxu1 %v1385_v50  ;;  %v1546_v48 = vld [vmem:[#allocation6 + $0x60] sm:$0xff]  ;;  %v1547_v50 = vld [vmem:[#allocation6 + $0x68] sm:$0xff] }
 0x12e   : > { %1518 = vmatpush.msrb.mxu2 %v1433_v23  ;;  %1487 = vmatpush.msrb.mxu0 %v1414_v57  ;;  %v1554_v23 = vld [vmem:[#allocation6 + $0xa0] sm:$0xff]  ;;  %v1540_v57 = vld [vmem:[#allocation6 + $0x30] sm:$0xff] }
 0x12f   : > { %1467 = vmatpush.msra.mxu3 %v1382_v5  ;;  %1507 = vmatpush.msrb.mxu1 %v1383_v53  ;;  %v1544_v5 = vld [vmem:[#allocation6 + $0x50] sm:$0xff]  ;;  %v1545_v53 = vld [vmem:[#allocation6 + $0x58] sm:$0xff] }
 0x130   : > { %1519 = vmatpush.msrb.mxu2 %v1431_v29  ;;  %1624 = vmatpush.msra.mxu0 %v1596_v63  ;;  %v1552_v29 = vld [vmem:[#allocation6 + $0x90] sm:$0xff]  ;;  %v1539_v63 = vld [vmem:[#allocation6 + $0x28] sm:$0xff] }
 0x131   : > { %1604 = vmatpush.msrb.mxu3 %v1564_v59  ;;  %v1541_v59 = vld [vmem:[#allocation6 + $0x38] sm:$0xff] }
 0x132   : > { %1520 = vmatpush.msrb.mxu2 %v1429_v36  ;;  %1625 = vmatpush.msra.mxu0 %v1594_v7  ;;  %v1550_v36 = vld [vmem:[#allocation6 + $0x80] sm:$0xff]  ;;  %v1537_v7 = vld [vmem:[#allocation6 + $0x18] sm:$0xff] }
 0x133   : > { %1605 = vmatpush.msrb.mxu3 %v1562_v61  ;;  %v1538_v61 = vld [vmem:[#allocation6 + $0x20] sm:$0xff] }
 0x134   : > { %1521 = vmatpush.msrb.mxu2 %v1427_v40  ;;  %1626 = vmatpush.msra.mxu0 %v1592_v11  ;;  %v1548_v40 = vld [vmem:[#allocation6 + $0x70] sm:$0xff]  ;;  %v1570_v11 = vld [vmem:[#allocation6 + $0x120] sm:$0xff] }
 0x135   : > { %1606 = vmatpush.msrb.mxu3 %v1560_v1  ;;  %v1575_v1 = vld [vmem:[#allocation6 + $0x148] sm:$0xff] }
 0x136   : > { %1522 = vmatpush.msrb.mxu2 %v1425_v38  ;;  %1627 = vmatpush.msra.mxu0 %v1590_v18  ;;  %v1569_v18 = vld [vmem:[#allocation6 + $0x118] sm:$0xff] }
 0x137   : > { %1607 = vmatpush.msrb.mxu3 %v1558_v10  ;;  %v1534_v10 = vld [vmem:[#allocation6] sm:$0xff] }
 0x138   : > { %1523 = vmatpush.msrb.mxu2 %v1423_v51  ;;  %1628 = vmatpush.msra.mxu0 %v1588_v24  ;;  %v1583_v51 = vld [vmem:[#allocation6 + $0x188] sm:$0xff]  ;;  %v1717_v24 = vld [vmem:[#allocation7 + $0xf8] sm:$0xff] }
 0x139   : > { %1608 = vmatpush.msrb.mxu3 %v1556_v15  ;;  %v1568_v15 = vld [vmem:[#allocation6 + $0x110] sm:$0xff] }
 0x13a   : > { %1524 = vmatpush.msrb.mxu2 %v1421_v47  ;;  %1629 = vmatpush.msra.mxu0 %v1586_v30  ;;  %v1581_v47 = vld [vmem:[#allocation6 + $0x178] sm:$0xff] }
 0x13b   : > { %1609 = vmatpush.msrb.mxu3 %v1554_v23  ;;  %v1716_v23 = vld [vmem:[#allocation7 + $0xf0] sm:$0xff]  ;;  %v1749_v30 = vld [vmem:[#allocation7 + $0x1f8] sm:$0xff] }
 0x13c   : > { %1525 = vmatpush.msrb.mxu2 %v1419_v55  ;;  %1630 = vmatpush.msra.mxu0 %v1584_v37  ;;  %v1578_v55 = vld [vmem:[#allocation6 + $0x160] sm:$0xff]  ;;  %v1747_v37 = vld [vmem:[#allocation7 + $0x1e8] sm:$0xff] }
 0x13d   : > { %1610 = vmatpush.msrb.mxu3 %v1552_v29  ;;  %v1715_v29 = vld [vmem:[#allocation7 + $0xe8] sm:$0xff] }
 0x13e   : > { %1526 = vmatpush.msrb.mxu2 %v1417_v56  ;;  %1631 = vmatpush.msra.mxu0 %v1582_v49  ;;  %v1579_v56 = vld [vmem:[#allocation6 + $0x168] sm:$0xff]  ;;  %v1705_v49 = vld [vmem:[#allocation7 + $0x98] sm:$0xff] }
 0x13f   : > { %1611 = vmatpush.msrb.mxu3 %v1550_v36  ;;  %v1713_v36 = vld [vmem:[#allocation7 + $0xd8] sm:$0xff] }
 0x140   : > { %1527 = vmatpush.msrb.mxu2 %v1415_v58  ;;  %1632 = vmatpush.msra.mxu0 %v1580_v52  ;;  %v1576_v58 = vld [vmem:[#allocation6 + $0x150] sm:$0xff]  ;;  %v1703_v52 = vld [vmem:[#allocation7 + $0x88] sm:$0xff] }
 0x141   : > { %1612 = vmatpush.msrb.mxu3 %v1548_v40  ;;  %v1711_v40 = vld [vmem:[#allocation7 + $0xc8] sm:$0xff] }
 0x142   : > { %1633 = vmatpush.msra.mxu0 %v1578_v55  ;;  %v1701_v55 = vld [vmem:[#allocation7 + $0x78] sm:$0xff] }
 0x143   : > { %1613 = vmatpush.msrb.mxu3 %v1546_v48  ;;  %v1738_v48 = vld [vmem:[#allocation7 + $0x1a0] sm:$0xff] }
 0x144   : > { %1634 = vmatpush.msra.mxu0 %v1576_v58 }
 0x145   : > { %1614 = vmatpush.msrb.mxu3 %v1544_v5  ;;  %v1736_v5 = vld [vmem:[#allocation7 + $0x190] sm:$0xff] }
 0x147   : > { %1615 = vmatpush.msrb.mxu3 %v1542_v54  ;;  %v1734_v54 = vld [vmem:[#allocation7 + $0x180] sm:$0xff] }
 0x149   : > { %1616 = vmatpush.msrb.mxu3 %v1540_v57 }
 0x14b   : > { %1617 = vmatpush.msrb.mxu3 %v1538_v61 }
 0x19f   : > { %v1299_v16 = vpop.f32.mrf.mxu0 }
 0x1a0   : > { %v4576_v43 = vadd.f32 %v3772_v9, %v1299_v16 }
 0x1a2   : > { %1356 = vmatmul.f32.vlgmr.msra.gmra.mxu1 %v4576_v43  ;;  %1376 = vmatmul.f32.vlgmr.msra.gmra.mxu2 %v4576_v43 }
 0x1a3   : > { %1644 = vmatpush.msra.mxu1 %v1565_v60  ;;  %1664 = vmatpush.msra.mxu2 %v1597_v3  ;;  %v1577_v60 = vld [vmem:[#allocation6 + $0x158] sm:$0xff]  ;;  %v1536_v3 = vld [vmem:[#allocation6 + $0x10] sm:$0xff] }
 0x1a4   : > { %1618 = vmatpush.msrb.mxu3 %v1536_v3 }
 0x1a5   : > { %1645 = vmatpush.msra.mxu1 %v1563_v62  ;;  %1665 = vmatpush.msra.mxu2 %v1595_v8  ;;  %v1574_v62 = vld [vmem:[#allocation6 + $0x140] sm:$0xff]  ;;  %v1573_v8 = vld [vmem:[#allocation6 + $0x138] sm:$0xff] }
 0x1a6   : > { %1635 = vmatpush.msra.mxu0 %v1574_v62  ;;  %1619 = vmatpush.msrb.mxu3 %v1534_v10  ;;  %v1698_v10 = vld [vmem:[#allocation7 + $0x60] sm:$0xff] }
 0x1a7   : > { %1646 = vmatpush.msra.mxu1 %v1561_v6  ;;  %1666 = vmatpush.msra.mxu2 %v1593_v13  ;;  %v1572_v6 = vld [vmem:[#allocation6 + $0x130] sm:$0xff]  ;;  %v1571_v13 = vld [vmem:[#allocation6 + $0x128] sm:$0xff] }
 0x1a8   : > { %1636 = vmatpush.msra.mxu0 %v1572_v6 }
 0x1a9   : > { %1647 = vmatpush.msra.mxu1 %v1559_v12  ;;  %1667 = vmatpush.msra.mxu2 %v1591_v21  ;;  %v1535_v12 = vld [vmem:[#allocation6 + $0x8] sm:$0xff] }
 0x1aa   : > { %1637 = vmatpush.msra.mxu0 %v1570_v11  ;;  %v1567_v21 = vld [vmem:[#allocation6 + $0x108] sm:$0xff]  ;;  %v1732_v11 = vld [vmem:[#allocation7 + $0x170] sm:$0xff] }
 0x1ab   : > { %1648 = vmatpush.msra.mxu1 %v1557_v20  ;;  %1668 = vmatpush.msra.mxu2 %v1589_v27  ;;  %v1566_v20 = vld [vmem:[#allocation6 + $0x100] sm:$0xff]  ;;  %v1748_v27 = vld [vmem:[#allocation7 + $0x1f0] sm:$0xff] }
 0x1ac   : > { %1638 = vmatpush.msra.mxu0 %v1568_v15  ;;  %v1696_v15 = vld [vmem:[#allocation7 + $0x50] sm:$0xff] }
 0x1ad   : > { %1649 = vmatpush.msra.mxu1 %v1555_v26  ;;  %1669 = vmatpush.msra.mxu2 %v1587_v35  ;;  %v1714_v26 = vld [vmem:[#allocation7 + $0xe0] sm:$0xff] }
 0x1ae   : > { %1639 = vmatpush.msra.mxu0 %v1566_v20  ;;  %v1746_v35 = vld [vmem:[#allocation7 + $0x1e0] sm:$0xff]  ;;  %v1697_v20 = vld [vmem:[#allocation7 + $0x58] sm:$0xff] }
 0x1af   : > { %1650 = vmatpush.msra.mxu1 %v1553_v32  ;;  %1670 = vmatpush.msra.mxu2 %v1585_v39  ;;  %v1712_v32 = vld [vmem:[#allocation7 + $0xd0] sm:$0xff] }
 0x1b0   : > { %v1744_v39 = vld [vmem:[#allocation7 + $0x1d0] sm:$0xff] }
 0x1b1   : > { %1651 = vmatpush.msra.mxu1 %v1551_v14  ;;  %1671 = vmatpush.msra.mxu2 %v1583_v51  ;;  %v1710_v14 = vld [vmem:[#allocation7 + $0xc0] sm:$0xff] }
 0x1b2   : > { %v1702_v51 = vld [vmem:[#allocation7 + $0x80] sm:$0xff] }
 0x1b3   : > { %1652 = vmatpush.msra.mxu1 %v1549_v34  ;;  %1672 = vmatpush.msra.mxu2 %v1581_v47  ;;  %v1708_v34 = vld [vmem:[#allocation7 + $0xb0] sm:$0xff] }
 0x1b4   : > { %v1700_v47 = vld [vmem:[#allocation7 + $0x70] sm:$0xff] }
 0x1b5   : > { %1653 = vmatpush.msra.mxu1 %v1547_v50  ;;  %1673 = vmatpush.msra.mxu2 %v1579_v56  ;;  %v1739_v50 = vld [vmem:[#allocation7 + $0x1a8] sm:$0xff]  ;;  %v1446_v56 = vld [vmem:[%s4973_s1] sm:$0x3]  ;;  %s4141_s1 = smov 126  }
 0x1b6   : > { %v1448_v57 = vperm.slane %v1446_v56, 0 }
 0x1b7   : > { %1654 = vmatpush.msra.mxu1 %v1545_v53  ;;  %1674 = vmatpush.msra.mxu2 %v1577_v60  ;;  %v1737_v53 = vld [vmem:[#allocation7 + $0x198] sm:$0xff] }
 0x1b9   : > { %1655 = vmatpush.msra.mxu1 %v1543_v4  ;;  %1675 = vmatpush.msra.mxu2 %v1575_v1  ;;  %v1735_v4 = vld [vmem:[#allocation7 + $0x188] sm:$0xff] }
 0x1bb   : > { %1656 = vmatpush.msra.mxu1 %v1541_v59  ;;  %1676 = vmatpush.msra.mxu2 %v1573_v8  ;;  %v1449_v59 = vperm.slane %v1446_v56, 1  ;;  %v1933_v56 = vld [vmem:[#allocation10 + $0x1f8] sm:$0xff] }
 0x1bd   : > { %1657 = vmatpush.msra.mxu1 %v1539_v63  ;;  %1677 = vmatpush.msra.mxu2 %v1571_v13  ;;  %v1733_v13 = vld [vmem:[#allocation7 + $0x178] sm:$0xff] }
 0x1bf   : > { %1658 = vmatpush.msra.mxu1 %v1537_v7  ;;  %1678 = vmatpush.msra.mxu2 %v1569_v18  ;;  %v1730_v18 = vld [vmem:[#allocation7 + $0x160] sm:$0xff] }
 0x1c1   : > { %1659 = vmatpush.msra.mxu1 %v1535_v12  ;;  %1679 = vmatpush.msra.mxu2 %v1567_v21  ;;  %v1699_v12 = vld [vmem:[#allocation7 + $0x68] sm:$0xff] }
 0x1c2   : > { %v1731_v21 = vld [vmem:[#allocation7 + $0x168] sm:$0xff] }
 0x21f   : > { %v1357_v42 = vpop.f32.mrf.mxu1 }
 0x220   : > { %v1358_v9 = vadd.f32 %v1357_v42, %v1336_v41  ;;  %v1742_v41 = vld [vmem:[#allocation7 + $0x1c0] sm:$0xff]  ;;  %v1709_v42 = vld [vmem:[#allocation7 + $0xb8] sm:$0xff] }
 0x222   : > { %v1380_v16 = vmax.f32 %v1358_v9, 0.0  ;;  %v1743_v9 = vld [vmem:[#allocation7 + $0x1c8] sm:$0xff] }
 0x224   : > { %1468 = vmatmul.f32.vlgmr.msra.gmra.mxu3 %v1380_v16  ;;  %1508 = vmatmul.f32.vlgmr.msrb.gmra.mxu1 %v1380_v16  ;;  %v1706_v16 = vld [vmem:[#allocation7 + $0xa0] sm:$0xff] }
 0x225   : > { %v1377_v45 = vpop.f32.mrf.mxu2  ;;  %1756 = vmatpush.msra.mxu3 %v1716_v23  ;;  %1796 = vmatpush.msrb.mxu1 %v1717_v24  ;;  %v1694_v23 = vld [vmem:[#allocation7 + $0x40] sm:$0xff]  ;;  %v1728_v24 = vld [vmem:[#allocation7 + $0x150] sm:$0xff] }
 0x226   : > { %v1378_v46 = vadd.f32 %v1377_v45, %v1337_v44  ;;  %v1740_v44 = vld [vmem:[#allocation7 + $0x1b0] sm:$0xff]  ;;  %v1707_v45 = vld [vmem:[#allocation7 + $0xa8] sm:$0xff] }
 0x227   : > { %1757 = vmatpush.msra.mxu3 %v1714_v26  ;;  %1797 = vmatpush.msrb.mxu1 %v1715_v29  ;;  %v1695_v26 = vld [vmem:[#allocation7 + $0x48] sm:$0xff]  ;;  %v1692_v29 = vld [vmem:[#allocation7 + $0x30] sm:$0xff] }
 0x228   : > { %v1381_v38 = vmax.f32 %v1378_v46, 0.0  ;;  %v1741_v46 = vld [vmem:[#allocation7 + $0x1b8] sm:$0xff] }
 0x229   : > { %1758 = vmatpush.msra.mxu3 %v1712_v32  ;;  %1798 = vmatpush.msrb.mxu1 %v1713_v36  ;;  %v1693_v32 = vld [vmem:[#allocation7 + $0x38] sm:$0xff]  ;;  %v1690_v36 = vld [vmem:[#allocation7 + $0x20] sm:$0xff] }
 0x22a   : > { %1488 = vmatmul.f32.vlgmr.msrb.gmra.mxu0 %v1381_v38  ;;  %1528 = vmatmul.f32.vlgmr.msrb.gmra.mxu2 %v1381_v38  ;;  %v1704_v38 = vld [vmem:[#allocation7 + $0x90] sm:$0xff] }
 0x22b   : > { %1776 = vmatpush.msrb.mxu0 %v1748_v27  ;;  %1816 = vmatpush.msrb.mxu2 %v1749_v30  ;;  %v1729_v27 = vld [vmem:[#allocation7 + $0x158] sm:$0xff]  ;;  %v1726_v30 = vld [vmem:[#allocation7 + $0x140] sm:$0xff] }
 0x22c   : > { %1759 = vmatpush.msra.mxu3 %v1710_v14  ;;  %1799 = vmatpush.msrb.mxu1 %v1711_v40  ;;  %v1691_v14 = vld [vmem:[#allocation7 + $0x28] sm:$0xff]  ;;  %v1688_v40 = vld [vmem:[#allocation7 + $0x10] sm:$0xff] }
 0x22d   : > { %1777 = vmatpush.msrb.mxu0 %v1746_v35  ;;  %1817 = vmatpush.msrb.mxu2 %v1747_v37  ;;  %v1727_v35 = vld [vmem:[#allocation7 + $0x148] sm:$0xff]  ;;  %v1724_v37 = vld [vmem:[#allocation7 + $0x130] sm:$0xff] }
 0x22e   : > { %1760 = vmatpush.msra.mxu3 %v1708_v34  ;;  %1800 = vmatpush.msrb.mxu1 %v1709_v42  ;;  %v1689_v34 = vld [vmem:[#allocation7 + $0x18] sm:$0xff]  ;;  %v1686_v42 = vld [vmem:[#allocation7] sm:$0xff] }
 0x22f   : > { %1778 = vmatpush.msrb.mxu0 %v1744_v39  ;;  %1818 = vmatpush.msrb.mxu2 %v1745_v33  ;;  %v1725_v39 = vld [vmem:[#allocation7 + $0x138] sm:$0xff]  ;;  %v1722_v33 = vld [vmem:[#allocation7 + $0x120] sm:$0xff] }
 0x230   : > { %1761 = vmatpush.msra.mxu3 %v1706_v16  ;;  %1801 = vmatpush.msrb.mxu1 %v1707_v45  ;;  %v1687_v16 = vld [vmem:[#allocation7 + $0x8] sm:$0xff]  ;;  %v1718_v45 = vld [vmem:[#allocation7 + $0x100] sm:$0xff] }
 0x231   : > { %1779 = vmatpush.msrb.mxu0 %v1742_v41  ;;  %1819 = vmatpush.msrb.mxu2 %v1743_v9  ;;  %v1723_v41 = vld [vmem:[#allocation7 + $0x128] sm:$0xff]  ;;  %v1720_v9 = vld [vmem:[#allocation7 + $0x110] sm:$0xff] }
 0x232   : > { %1762 = vmatpush.msra.mxu3 %v1704_v38  ;;  %1802 = vmatpush.msrb.mxu1 %v1705_v49  ;;  %v1900_v38 = vld [vmem:[#allocation10 + $0xf0] sm:$0xff]  ;;  %v1898_v49 = vld [vmem:[#allocation10 + $0xe0] sm:$0xff] }
 0x233   : > { %1780 = vmatpush.msrb.mxu0 %v1740_v44  ;;  %1820 = vmatpush.msrb.mxu2 %v1741_v46  ;;  %v1721_v44 = vld [vmem:[#allocation7 + $0x118] sm:$0xff]  ;;  %v1719_v46 = vld [vmem:[#allocation7 + $0x108] sm:$0xff] }
 0x234   : > { %1763 = vmatpush.msra.mxu3 %v1702_v51  ;;  %1803 = vmatpush.msrb.mxu1 %v1703_v52  ;;  %v1896_v51 = vld [vmem:[#allocation10 + $0xd0] sm:$0xff]  ;;  %v1894_v52 = vld [vmem:[#allocation10 + $0xc0] sm:$0xff] }
 0x235   : > { %1781 = vmatpush.msrb.mxu0 %v1738_v48  ;;  %1821 = vmatpush.msrb.mxu2 %v1739_v50  ;;  %v1932_v48 = vld [vmem:[#allocation10 + $0x1f0] sm:$0xff]  ;;  %v1930_v50 = vld [vmem:[#allocation10 + $0x1e0] sm:$0xff] }
 0x236   : > { %1764 = vmatpush.msra.mxu3 %v1700_v47  ;;  %1804 = vmatpush.msrb.mxu1 %v1701_v55  ;;  %v1892_v47 = vld [vmem:[#allocation10 + $0xb0] sm:$0xff]  ;;  %v1890_v55 = vld [vmem:[#allocation10 + $0xa0] sm:$0xff] }
 0x237   : > { %1782 = vmatpush.msrb.mxu0 %v1736_v5  ;;  %1822 = vmatpush.msrb.mxu2 %v1737_v53  ;;  %v1928_v5 = vld [vmem:[#allocation10 + $0x1d0] sm:$0xff]  ;;  %v1926_v53 = vld [vmem:[#allocation10 + $0x1c0] sm:$0xff] }
 0x238   : > { %1765 = vmatpush.msra.mxu3 %v1698_v10  ;;  %1805 = vmatpush.msrb.mxu1 %v1699_v12  ;;  %v1893_v10 = vld [vmem:[#allocation10 + $0xb8] sm:$0xff] }
 0x239   : > { %1783 = vmatpush.msrb.mxu0 %v1734_v54  ;;  %1823 = vmatpush.msrb.mxu2 %v1735_v4  ;;  %v1924_v54 = vld [vmem:[#allocation10 + $0x1b0] sm:$0xff]  ;;  %v1901_v4 = vld [vmem:[#allocation10 + $0xf8] sm:$0xff] }
 0x23a   : > { %1766 = vmatpush.msra.mxu3 %v1696_v15  ;;  %1806 = vmatpush.msrb.mxu1 %v1697_v20  ;;  %v1925_v12 = vld [vmem:[#allocation10 + $0x1b8] sm:$0xff]  ;;  %v1891_v15 = vld [vmem:[#allocation10 + $0xa8] sm:$0xff] }
 0x23b   : > { %1784 = vmatpush.msrb.mxu0 %v1732_v11  ;;  %1824 = vmatpush.msrb.mxu2 %v1733_v13  ;;  %v1916_v11 = vld [vmem:[#allocation10 + $0x170] sm:$0xff]  ;;  %v1882_v13 = vld [vmem:[#allocation10 + $0x60] sm:$0xff]  ;;  %v1923_v20 = vld [vmem:[#allocation10 + $0x1a8] sm:$0xff] }
 0x23c   : > { %1767 = vmatpush.msra.mxu3 %v1694_v23  ;;  %1807 = vmatpush.msrb.mxu1 %v1695_v26  ;;  %v1889_v23 = vld [vmem:[#allocation10 + $0x98] sm:$0xff]  ;;  %v1912_v26 = vld [vmem:[#allocation10 + $0x150] sm:$0xff] }
 0x23d   : > { %1785 = vmatpush.msrb.mxu0 %v1730_v18  ;;  %1825 = vmatpush.msrb.mxu2 %v1731_v21  ;;  %v1914_v18 = vld [vmem:[#allocation10 + $0x160] sm:$0xff]  ;;  %v1880_v21 = vld [vmem:[#allocation10 + $0x50] sm:$0xff] }
 0x23e   : > { %1768 = vmatpush.msra.mxu3 %v1692_v29  ;;  %1808 = vmatpush.msrb.mxu1 %v1693_v32  ;;  %v1887_v32 = vld [vmem:[#allocation10 + $0x88] sm:$0xff] }
 0x23f   : > { %1786 = vmatpush.msrb.mxu0 %v1728_v24  ;;  %1826 = vmatpush.msrb.mxu2 %v1729_v27  ;;  %v1598_v24 = vld [vmem:[%s4928_s10] sm:$0x3]  ;;  %v1921_v27 = vld [vmem:[#allocation10 + $0x198] sm:$0xff] }
 0x240   : > { %1769 = vmatpush.msra.mxu3 %v1690_v36  ;;  %1809 = vmatpush.msrb.mxu1 %v1691_v14  ;;  %v1600_v29 = vperm.slane %v1598_v24, 0  ;;  %v1919_v36 = vld [vmem:[#allocation10 + $0x188] sm:$0xff]  ;;  %v1876_v14 = vld [vmem:[#allocation10 + $0x30] sm:$0xff] }
 0x241   : > { %1787 = vmatpush.msrb.mxu0 %v1726_v30  ;;  %1827 = vmatpush.msrb.mxu2 %v1727_v35  ;;  %v1878_v30 = vld [vmem:[#allocation10 + $0x40] sm:$0xff] }
 0x242   : > { %1770 = vmatpush.msra.mxu3 %v1688_v40  ;;  %1810 = vmatpush.msrb.mxu1 %v1689_v34  ;;  %v1910_v35 = vld [vmem:[#allocation10 + $0x140] sm:$0xff]  ;;  %v1908_v34 = vld [vmem:[#allocation10 + $0x130] sm:$0xff] }
 0x243   : > { %1788 = vmatpush.msrb.mxu0 %v1724_v37  ;;  %1828 = vmatpush.msrb.mxu2 %v1725_v39  ;;  %v1601_v37 = vperm.slane %v1598_v24, 1  ;;  %v1885_v39 = vld [vmem:[#allocation10 + $0x78] sm:$0xff]  ;;  %v1875_v24 = vld [vmem:[#allocation10 + $0x28] sm:$0xff] }
 0x244   : > { %1771 = vmatpush.msra.mxu3 %v1686_v42  ;;  %1811 = vmatpush.msrb.mxu1 %v1687_v16 }
 0x245   : > { %1789 = vmatpush.msrb.mxu0 %v1722_v33  ;;  %1829 = vmatpush.msrb.mxu2 %v1723_v41  ;;  %v1917_v41 = vld [vmem:[#allocation10 + $0x178] sm:$0xff] }
 0x247   : > { %1790 = vmatpush.msrb.mxu0 %v1720_v9  ;;  %1830 = vmatpush.msrb.mxu2 %v1721_v44  ;;  %v1874_v9 = vld [vmem:[#allocation10 + $0x20] sm:$0xff] }
 0x248   : > { %v1906_v44 = vld [vmem:[#allocation10 + $0x120] sm:$0xff] }
 0x249   : > { %1791 = vmatpush.msrb.mxu0 %v1718_v45  ;;  %1831 = vmatpush.msrb.mxu2 %v1719_v46 }
 0x2a1   : > { %v1509_v61 = vpop.f32.mrf.mxu1 }
 0x2a2   : > { %v1510_v1 = vadd.f32 %v1509_v61, %v1449_v59  ;;  %v1931_v59 = vld [vmem:[#allocation10 + $0x1e8] sm:$0xff]  ;;  %v1897_v61 = vld [vmem:[#allocation10 + $0xd8] sm:$0xff] }
 0x2a7   : > { %v1469_v58 = vpop.f32.mrf.mxu3  ;;  %v1489_v62 = vpop.f32.mrf.mxu0 }
 0x2a8   : > { %v1470_v60 = vadd.f32 %v1469_v58, %v1448_v57  ;;  %v1922_v57 = vld [vmem:[#allocation10 + $0x1a0] sm:$0xff]  ;;  %v1899_v58 = vld [vmem:[#allocation10 + $0xe8] sm:$0xff] }
 0x2aa   : > { %v1490_v63 = vadd.f32 %v1489_v62, %v1470_v60  ;;  %v1888_v60 = vld [vmem:[#allocation10 + $0x90] sm:$0xff] }
 0x2ab   : > { %v1920_v62 = vld [vmem:[#allocation10 + $0x190] sm:$0xff] }
 0x2ac   : > { %v1532_v3 = vmax.f32 %v1490_v63, 0.0  ;;  %v1929_v63 = vld [vmem:[#allocation10 + $0x1d8] sm:$0xff] }
 0x2ad   : > { %v1529_v6 = vpop.f32.mrf.mxu2 }
 0x2ae   : > { %v1530_v7 = vadd.f32 %v1529_v6, %v1510_v1  ;;  %1620 = vmatmul.f32.vlgmr.msrb.gmra.mxu3 %v1532_v3  ;;  %1660 = vmatmul.f32.vlgmr.msra.gmra.mxu1 %v1532_v3  ;;  %v1886_v1 = vld [vmem:[#allocation10 + $0x80] sm:$0xff]  ;;  %v1895_v3 = vld [vmem:[#allocation10 + $0xc8] sm:$0xff] }
 0x2af   : > { %1934 = vmatpush.msrb.mxu3 %v1900_v38  ;;  %1974 = vmatpush.msra.mxu1 %v1901_v4  ;;  %v1918_v6 = vld [vmem:[#allocation10 + $0x180] sm:$0xff]  ;;  %v1872_v38 = vld [vmem:[#allocation10 + $0x10] sm:$0xff]  ;;  %v1867_v4 = vld [vmem:[#allocation9 + $0xe8] sm:$0xff] }
 0x2b0   : > { %v1533_v8 = vmax.f32 %v1530_v7, 0.0  ;;  %v1927_v7 = vld [vmem:[#allocation10 + $0x1c8] sm:$0xff] }
 0x2b1   : > { %1935 = vmatpush.msrb.mxu3 %v1898_v49  ;;  %1975 = vmatpush.msra.mxu1 %v1899_v58  ;;  %v1862_v58 = vld [vmem:[#allocation9 + $0xc0] sm:$0xff] }
 0x2b2   : > { %1640 = vmatmul.f32.vlgmr.msra.gmra.mxu0 %v1533_v8  ;;  %1680 = vmatmul.f32.vlgmr.msra.gmra.mxu2 %v1533_v8  ;;  %v1884_v8 = vld [vmem:[#allocation10 + $0x70] sm:$0xff] }
 0x2b3   : > { %1954 = vmatpush.msra.mxu0 %v1932_v48  ;;  %1936 = vmatpush.msrb.mxu3 %v1896_v51  ;;  %v1904_v51 = vld [vmem:[#allocation10 + $0x110] sm:$0xff] }
 0x2b4   : > { %1994 = vmatpush.msra.mxu2 %v1933_v56  ;;  %1976 = vmatpush.msra.mxu1 %v1897_v61  ;;  %v1864_v56 = vld [vmem:[#allocation9 + $0xd0] sm:$0xff]  ;;  %v1861_v61 = vld [vmem:[#allocation9 + $0xb8] sm:$0xff] }
 0x2b5   : > { %1955 = vmatpush.msra.mxu0 %v1930_v50  ;;  %1937 = vmatpush.msrb.mxu3 %v1894_v52 }
 0x2b6   : > { %1995 = vmatpush.msra.mxu2 %v1931_v59  ;;  %1977 = vmatpush.msra.mxu1 %v1895_v3  ;;  %v1863_v59 = vld [vmem:[#allocation9 + $0xc8] sm:$0xff] }
 0x2b7   : > { %1956 = vmatpush.msra.mxu0 %v1928_v5  ;;  %1938 = vmatpush.msrb.mxu3 %v1892_v47  ;;  %v1870_v5 = vld [vmem:[#allocation10] sm:$0xff]  ;;  %v1868_v47 = vld [vmem:[#allocation9 + $0xf0] sm:$0xff]  ;;  %v1859_v3 = vld [vmem:[#allocation9 + $0xa8] sm:$0xff] }
 0x2b8   : > { %1996 = vmatpush.msra.mxu2 %v1929_v63  ;;  %1978 = vmatpush.msra.mxu1 %v1893_v10  ;;  %v1915_v63 = vld [vmem:[#allocation10 + $0x168] sm:$0xff]  ;;  %v1857_v10 = vld [vmem:[#allocation9 + $0x98] sm:$0xff] }
 0x2b9   : > { %1957 = vmatpush.msra.mxu0 %v1926_v53  ;;  %1939 = vmatpush.msrb.mxu3 %v1890_v55  ;;  %v1902_v53 = vld [vmem:[#allocation10 + $0x100] sm:$0xff] }
 0x2ba   : > { %1997 = vmatpush.msra.mxu2 %v1927_v7  ;;  %1979 = vmatpush.msra.mxu1 %v1891_v15  ;;  %v1866_v55 = vld [vmem:[#allocation9 + $0xe0] sm:$0xff]  ;;  %v1913_v7 = vld [vmem:[#allocation10 + $0x158] sm:$0xff]  ;;  %v1855_v15 = vld [vmem:[#allocation9 + $0x88] sm:$0xff] }
 0x2bb   : > { %1958 = vmatpush.msra.mxu0 %v1924_v54  ;;  %1940 = vmatpush.msrb.mxu3 %v1888_v60  ;;  %v1869_v54 = vld [vmem:[#allocation9 + $0xf8] sm:$0xff]  ;;  %v1860_v60 = vld [vmem:[#allocation9 + $0xb0] sm:$0xff] }
 0x2bc   : > { %1998 = vmatpush.msra.mxu2 %v1925_v12  ;;  %1980 = vmatpush.msra.mxu1 %v1889_v23  ;;  %v1911_v12 = vld [vmem:[#allocation10 + $0x148] sm:$0xff]  ;;  %v1853_v23 = vld [vmem:[#allocation9 + $0x78] sm:$0xff] }
 0x2bd   : > { %1959 = vmatpush.msra.mxu0 %v1922_v57  ;;  %1941 = vmatpush.msrb.mxu3 %v1886_v1  ;;  %v1865_v57 = vld [vmem:[#allocation9 + $0xd8] sm:$0xff]  ;;  %v1858_v1 = vld [vmem:[#allocation9 + $0xa0] sm:$0xff] }
 0x2be   : > { %1999 = vmatpush.msra.mxu2 %v1923_v20  ;;  %1981 = vmatpush.msra.mxu1 %v1887_v32  ;;  %v1909_v20 = vld [vmem:[#allocation10 + $0x138] sm:$0xff] }
 0x2bf   : > { %1960 = vmatpush.msra.mxu0 %v1920_v62  ;;  %1942 = vmatpush.msrb.mxu3 %v1884_v8  ;;  %v1883_v62 = vld [vmem:[#allocation10 + $0x68] sm:$0xff]  ;;  %v1856_v8 = vld [vmem:[#allocation9 + $0x90] sm:$0xff]  ;;  %v1905_v32 = vld [vmem:[#allocation10 + $0x118] sm:$0xff] }
 0x2c0   : > { %2000 = vmatpush.msra.mxu2 %v1921_v27  ;;  %1982 = vmatpush.msra.mxu1 %v1885_v39  ;;  %v1850_v27 = vld [vmem:[#allocation9 + $0x60] sm:$0xff] }
 0x2c1   : > { %1961 = vmatpush.msra.mxu0 %v1918_v6  ;;  %1943 = vmatpush.msrb.mxu3 %v1882_v13  ;;  %v1881_v6 = vld [vmem:[#allocation10 + $0x58] sm:$0xff]  ;;  %v1854_v13 = vld [vmem:[#allocation9 + $0x80] sm:$0xff] }
 0x2c2   : > { %2001 = vmatpush.msra.mxu2 %v1919_v36  ;;  %1983 = vmatpush.msra.mxu1 %v1883_v62  ;;  %v1849_v36 = vld [vmem:[#allocation9 + $0x58] sm:$0xff]  ;;  %v1846_v39 = vld [vmem:[#allocation9 + $0x40] sm:$0xff] }
 0x2c3   : > { %1962 = vmatpush.msra.mxu0 %v1916_v11  ;;  %1944 = vmatpush.msrb.mxu3 %v1880_v21  ;;  %v1879_v11 = vld [vmem:[#allocation10 + $0x48] sm:$0xff]  ;;  %v1852_v21 = vld [vmem:[#allocation9 + $0x70] sm:$0xff] }
 0x2c4   : > { %2002 = vmatpush.msra.mxu2 %v1917_v41  ;;  %1984 = vmatpush.msra.mxu1 %v1881_v6  ;;  %v1842_v41 = vld [vmem:[#allocation9 + $0x20] sm:$0xff] }
 0x2c5   : > { %1963 = vmatpush.msra.mxu0 %v1914_v18  ;;  %1945 = vmatpush.msrb.mxu3 %v1878_v30  ;;  %v1877_v18 = vld [vmem:[#allocation10 + $0x38] sm:$0xff] }
 0x2c6   : > { %2003 = vmatpush.msra.mxu2 %v1915_v63  ;;  %1985 = vmatpush.msra.mxu1 %v1879_v11  ;;  %v1873_v30 = vld [vmem:[#allocation10 + $0x18] sm:$0xff] }
 0x2c7   : > { %1964 = vmatpush.msra.mxu0 %v1912_v26  ;;  %1946 = vmatpush.msrb.mxu3 %v1876_v14  ;;  %v1907_v26 = vld [vmem:[#allocation10 + $0x128] sm:$0xff]  ;;  %v2095_v11 = vld [vmem:[#allocation12 + $0xf8] sm:$0xff] }
 0x2c8   : > { %2004 = vmatpush.msra.mxu2 %v1913_v7  ;;  %1986 = vmatpush.msra.mxu1 %v1877_v18  ;;  %v1903_v14 = vld [vmem:[#allocation10 + $0x108] sm:$0xff]  ;;  %v2091_v18 = vld [vmem:[#allocation12 + $0xd8] sm:$0xff] }
 0x2c9   : > { %1965 = vmatpush.msra.mxu0 %v1910_v35  ;;  %1947 = vmatpush.msrb.mxu3 %v1874_v9  ;;  %v1848_v35 = vld [vmem:[#allocation9 + $0x50] sm:$0xff] }
 0x2ca   : > { %2005 = vmatpush.msra.mxu2 %v1911_v12  ;;  %1987 = vmatpush.msra.mxu1 %v1875_v24  ;;  %v1840_v9 = vld [vmem:[#allocation9 + $0x10] sm:$0xff]  ;;  %v2125_v12 = vld [vmem:[#allocation12 + $0x1e8] sm:$0xff]  ;;  %v2087_v24 = vld [vmem:[#allocation12 + $0xb8] sm:$0xff] }
 0x2cb   : > { %1966 = vmatpush.msra.mxu0 %v1908_v34  ;;  %1948 = vmatpush.msrb.mxu3 %v1872_v38  ;;  %v1845_v34 = vld [vmem:[#allocation9 + $0x38] sm:$0xff]  ;;  %v2124_v38 = vld [vmem:[#allocation12 + $0x1e0] sm:$0xff] }
 0x2cc   : > { %2006 = vmatpush.msra.mxu2 %v1909_v20  ;;  %1988 = vmatpush.msra.mxu1 %v1873_v30  ;;  %v2121_v20 = vld [vmem:[#allocation12 + $0x1c8] sm:$0xff]  ;;  %v2084_v30 = vld [vmem:[#allocation12 + $0xa0] sm:$0xff] }
 0x2cd   : > { %1967 = vmatpush.msra.mxu0 %v1906_v44  ;;  %1949 = vmatpush.msrb.mxu3 %v1870_v5  ;;  %v1838_v44 = vld [vmem:[#allocation9] sm:$0xff]  ;;  %v2090_v5 = vld [vmem:[#allocation12 + $0xd0] sm:$0xff] }
 0x2ce   : > { %2007 = vmatpush.msra.mxu2 %v1907_v26  ;;  %v2117_v26 = vld [vmem:[#allocation12 + $0x1a8] sm:$0xff] }
 0x2cf   : > { %1968 = vmatpush.msra.mxu0 %v1904_v51  ;;  %v2120_v51 = vld [vmem:[#allocation12 + $0x1c0] sm:$0xff] }
 0x2d0   : > { %2008 = vmatpush.msra.mxu2 %v1905_v32  ;;  %v2110_v32 = vld [vmem:[#allocation12 + $0x170] sm:$0xff] }
 0x2d1   : > { %1969 = vmatpush.msra.mxu0 %v1902_v53  ;;  %v2088_v53 = vld [vmem:[#allocation12 + $0xc0] sm:$0xff] }
 0x2d2   : > { %2009 = vmatpush.msra.mxu2 %v1903_v14  ;;  %v2083_v14 = vld [vmem:[#allocation12 + $0x98] sm:$0xff] }
 0x32b   : > { %v1661_v40 = vpop.f32.mrf.mxu1 }
 0x32c   : > { %v1662_v45 = vadd.f32 %v1661_v40, %v1601_v37  ;;  %v1871_v37 = vld [vmem:[#allocation10 + $0x8] sm:$0xff] }
 0x32d   : > { %v1847_v40 = vld [vmem:[#allocation9 + $0x48] sm:$0xff]  ;;  %1989 = vmatpush.msra.mxu1 %v1871_v37  ;;  %v2082_v37 = vld [vmem:[#allocation12 + $0x90] sm:$0xff] }
 0x32f   : > { %v1641_v16 = vpop.f32.mrf.mxu0 }
 0x331   : > { %v1621_v33 = vpop.f32.mrf.mxu3 }
 0x332   : > { %v1622_v42 = vadd.f32 %v1621_v33, %v1600_v29  ;;  %v1851_v29 = vld [vmem:[#allocation9 + $0x68] sm:$0xff]  ;;  %v1844_v33 = vld [vmem:[#allocation9 + $0x30] sm:$0xff] }
 0x334   : > { %v1642_v46 = vadd.f32 %v1641_v16, %v1622_v42  ;;  %v1843_v42 = vld [vmem:[#allocation9 + $0x28] sm:$0xff]  ;;  %v1841_v16 = vld [vmem:[#allocation9 + $0x18] sm:$0xff] }
 0x335   : > { %v1681_v48 = vpop.f32.mrf.mxu2 }
 0x336   : > { %v1684_v49 = vmax.f32 %v1642_v46, 0.0  ;;  %v1682_v50 = vadd.f32 %v1681_v48, %v1662_v45  ;;  %v1839_v45 = vld [vmem:[#allocation9 + $0x8] sm:$0xff]  ;;  %v2126_v46 = vld [vmem:[#allocation12 + $0x1f0] sm:$0xff] }
 0x337   : > { %v2122_v48 = vld [vmem:[#allocation12 + $0x1d0] sm:$0xff] }
 0x338   : > { %v1685_v52 = vmax.f32 %v1682_v50, 0.0  ;;  %1772 = vmatmul.f32.vlgmr.msra.gmra.mxu3 %v1684_v49  ;;  %1812 = vmatmul.f32.vlgmr.msrb.gmra.mxu1 %v1684_v49  ;;  %v2094_v49 = vld [vmem:[#allocation12 + $0xf0] sm:$0xff]  ;;  %v2092_v50 = vld [vmem:[#allocation12 + $0xe0] sm:$0xff] }
 0x339   : > { %2014 = vmatpush.msra.mxu3 %v1868_v47  ;;  %2134 = vmatpush.msrb.mxu1 %v2094_v49  ;;  %v2116_v47 = vld [vmem:[#allocation12 + $0x1a0] sm:$0xff]  ;;  %v2074_v49 = vld [vmem:[#allocation12 + $0x50] sm:$0xff] }
 0x33a   : > { %1792 = vmatmul.f32.vlgmr.msrb.gmra.mxu0 %v1685_v52  ;;  %1832 = vmatmul.f32.vlgmr.msrb.gmra.mxu2 %v1685_v52  ;;  %v2118_v52 = vld [vmem:[#allocation12 + $0x1b0] sm:$0xff] }
 0x33b   : > { %2034 = vmatpush.msrb.mxu0 %v1869_v54  ;;  %2015 = vmatpush.msra.mxu3 %v1866_v55  ;;  %v2086_v54 = vld [vmem:[#allocation12 + $0xb0] sm:$0xff] }
 0x33c   : > { %2154 = vmatpush.msrb.mxu2 %v2126_v46  ;;  %2135 = vmatpush.msrb.mxu1 %v2092_v50  ;;  %v2114_v55 = vld [vmem:[#allocation12 + $0x190] sm:$0xff]  ;;  %v2100_v50 = vld [vmem:[#allocation12 + $0x120] sm:$0xff] }
 0x33d   : > { %2035 = vmatpush.msrb.mxu0 %v1867_v4  ;;  %2016 = vmatpush.msra.mxu3 %v1864_v56  ;;  %v1750_v4 = vld [vmem:[%s4930_s12] sm:$0x3]  ;;  %v2102_v46 = vld [vmem:[#allocation12 + $0x130] sm:$0xff] }
 0x33e   : > { %2155 = vmatpush.msrb.mxu2 %v2124_v38  ;;  %2136 = vmatpush.msrb.mxu1 %v2090_v5  ;;  %v2112_v56 = vld [vmem:[#allocation12 + $0x180] sm:$0xff]  ;;  %v2077_v38 = vld [vmem:[#allocation12 + $0x68] sm:$0xff] }
 0x33f   : > { %2036 = vmatpush.msrb.mxu0 %v1865_v57  ;;  %2017 = vmatpush.msra.mxu3 %v1862_v58  ;;  %v1753_v57 = vperm.slane %v1750_v4, 1  ;;  %v1752_v58 = vperm.slane %v1750_v4, 0  ;;  %v2101_v5 = vld [vmem:[#allocation12 + $0x128] sm:$0xff]  ;;  %v2096_v4 = vld [vmem:[#allocation12 + $0x100] sm:$0xff] }
 0x340   : > { %2156 = vmatpush.msrb.mxu2 %v2122_v48  ;;  %2137 = vmatpush.msrb.mxu1 %v2088_v53  ;;  %v2103_v48 = vld [vmem:[#allocation12 + $0x138] sm:$0xff]  ;;  %v2098_v53 = vld [vmem:[#allocation12 + $0x110] sm:$0xff] }
 0x341   : > { %2037 = vmatpush.msrb.mxu0 %v1863_v59  ;;  %2018 = vmatpush.msra.mxu3 %v1860_v60 }
 0x342   : > { %2157 = vmatpush.msrb.mxu2 %v2120_v51  ;;  %2138 = vmatpush.msrb.mxu1 %v2086_v54  ;;  %v2075_v51 = vld [vmem:[#allocation12 + $0x58] sm:$0xff] }
 0x343   : > { %2038 = vmatpush.msrb.mxu0 %v1861_v61  ;;  %2019 = vmatpush.msra.mxu3 %v1858_v1  ;;  %v2099_v54 = vld [vmem:[#allocation12 + $0x118] sm:$0xff] }
 0x344   : > { %2158 = vmatpush.msrb.mxu2 %v2118_v52  ;;  %2139 = vmatpush.msrb.mxu1 %v2084_v30  ;;  %v2072_v52 = vld [vmem:[#allocation12 + $0x40] sm:$0xff]  ;;  %v2270_v30 = vld [vmem:[#allocation13 + $0x1b0] sm:$0xff] }
 0x345   : > { %2039 = vmatpush.msrb.mxu0 %v1859_v3  ;;  %2020 = vmatpush.msra.mxu3 %v1856_v8 }
 0x346   : > { %2159 = vmatpush.msrb.mxu2 %v2116_v47  ;;  %2140 = vmatpush.msrb.mxu1 %v2082_v37  ;;  %v2073_v47 = vld [vmem:[#allocation12 + $0x48] sm:$0xff]  ;;  %v2268_v37 = vld [vmem:[#allocation13 + $0x1a0] sm:$0xff] }
 0x347   : > { %2040 = vmatpush.msrb.mxu0 %v1857_v10  ;;  %2021 = vmatpush.msra.mxu3 %v1854_v13  ;;  %v2127_v10 = vld [vmem:[#allocation12 + $0x1f8] sm:$0xff]  ;;  %v2093_v13 = vld [vmem:[#allocation12 + $0xe8] sm:$0xff] }
 0x348   : > { %2160 = vmatpush.msrb.mxu2 %v2114_v55  ;;  %v2070_v55 = vld [vmem:[#allocation12 + $0x30] sm:$0xff] }
 0x349   : > { %2041 = vmatpush.msrb.mxu0 %v1855_v15  ;;  %2022 = vmatpush.msra.mxu3 %v1852_v21  ;;  %v2123_v15 = vld [vmem:[#allocation12 + $0x1d8] sm:$0xff]  ;;  %v2089_v21 = vld [vmem:[#allocation12 + $0xc8] sm:$0xff] }
 0x34a   : > { %2161 = vmatpush.msrb.mxu2 %v2112_v56  ;;  %v2071_v56 = vld [vmem:[#allocation12 + $0x38] sm:$0xff] }
 0x34b   : > { %2042 = vmatpush.msrb.mxu0 %v1853_v23  ;;  %2023 = vmatpush.msra.mxu3 %v1850_v27  ;;  %v2119_v23 = vld [vmem:[#allocation12 + $0x1b8] sm:$0xff] }
 0x34c   : > { %v2115_v27 = vld [vmem:[#allocation12 + $0x198] sm:$0xff]  ;;  %2162 = vmatpush.msrb.mxu2 %v2110_v32  ;;  %v2236_v32 = vld [vmem:[#allocation13 + $0xa0] sm:$0xff] }
 0x34d   : > { %2043 = vmatpush.msrb.mxu0 %v1851_v29  ;;  %2024 = vmatpush.msra.mxu3 %v1848_v35  ;;  %v2113_v29 = vld [vmem:[#allocation12 + $0x188] sm:$0xff] }
 0x34e   : > { %v2085_v35 = vld [vmem:[#allocation12 + $0xa8] sm:$0xff] }
 0x34f   : > { %2044 = vmatpush.msrb.mxu0 %v1849_v36  ;;  %2025 = vmatpush.msra.mxu3 %v1846_v39  ;;  %v2111_v36 = vld [vmem:[#allocation12 + $0x178] sm:$0xff]  ;;  %v2109_v39 = vld [vmem:[#allocation12 + $0x168] sm:$0xff] }
 0x351   : > { %2045 = vmatpush.msrb.mxu0 %v1847_v40  ;;  %2026 = vmatpush.msra.mxu3 %v1844_v33  ;;  %v2080_v40 = vld [vmem:[#allocation12 + $0x80] sm:$0xff]  ;;  %v2106_v33 = vld [vmem:[#allocation12 + $0x150] sm:$0xff] }
 0x352   : > { %2141 = vmatpush.msrb.mxu1 %v2080_v40  ;;  %v2235_v40 = vld [vmem:[#allocation13 + $0x98] sm:$0xff] }
 0x353   : > { %2046 = vmatpush.msrb.mxu0 %v1845_v34  ;;  %2027 = vmatpush.msra.mxu3 %v1842_v41  ;;  %v2081_v34 = vld [vmem:[#allocation12 + $0x88] sm:$0xff]  ;;  %v2107_v41 = vld [vmem:[#allocation12 + $0x158] sm:$0xff] }
 0x355   : > { %2047 = vmatpush.msrb.mxu0 %v1843_v42  ;;  %2028 = vmatpush.msra.mxu3 %v1840_v9  ;;  %v2078_v42 = vld [vmem:[#allocation12 + $0x70] sm:$0xff]  ;;  %v2104_v9 = vld [vmem:[#allocation12 + $0x140] sm:$0xff] }
 0x356   : > { %2142 = vmatpush.msrb.mxu1 %v2078_v42  ;;  %v2054_v42 = vld [vmem:[%s4933_s15] sm:$0x3] }
 0x357   : > { %2048 = vmatpush.msrb.mxu0 %v1841_v16  ;;  %2029 = vmatpush.msra.mxu3 %v1838_v44  ;;  %v2079_v16 = vld [vmem:[#allocation12 + $0x78] sm:$0xff]  ;;  %v2105_v44 = vld [vmem:[#allocation12 + $0x148] sm:$0xff] }
 0x359   : > { %2049 = vmatpush.msrb.mxu0 %v1839_v45  ;;  %v2076_v45 = vld [vmem:[#allocation12 + $0x60] sm:$0xff] }
 0x35a   : > { %2143 = vmatpush.msrb.mxu1 %v2076_v45 }
 0x35c   : > { %2144 = vmatpush.msrb.mxu1 %v2074_v49 }
 0x35e   : > { %2145 = vmatpush.msrb.mxu1 %v2072_v52 }
 0x360   : > { %2146 = vmatpush.msrb.mxu1 %v2070_v55 }
 0x3b5   : > { %v1813_v59 = vpop.f32.mrf.mxu1 }
 0x3b6   : > { %v1814_v61 = vadd.f32 %v1813_v59, %v1753_v57  ;;  %v2097_v57 = vld [vmem:[#allocation12 + $0x108] sm:$0xff] }
 0x3b7   : > { %v1793_v63 = vpop.f32.mrf.mxu0  ;;  %v2069_v59 = vld [vmem:[#allocation12 + $0x28] sm:$0xff] }
 0x3bb   : > { %v1773_v60 = vpop.f32.mrf.mxu3 }
 0x3bc   : > { %v1774_v62 = vadd.f32 %v1773_v60, %v1752_v58  ;;  %v2068_v58 = vld [vmem:[#allocation12 + $0x20] sm:$0xff]  ;;  %v2066_v60 = vld [vmem:[#allocation12 + $0x10] sm:$0xff] }
 0x3bd   : > { %v1833_v1 = vpop.f32.mrf.mxu2  ;;  %2147 = vmatpush.msrb.mxu1 %v2068_v58  ;;  %v2267_v58 = vld [vmem:[#allocation13 + $0x198] sm:$0xff] }
 0x3be   : > { %v1794_v3 = vadd.f32 %v1793_v63, %v1774_v62  ;;  %v1834_v6 = vadd.f32 %v1833_v1, %v1814_v61  ;;  %v2067_v61 = vld [vmem:[#allocation12 + $0x18] sm:$0xff]  ;;  %v2064_v62 = vld [vmem:[#allocation12] sm:$0xff]  ;;  %v2065_v63 = vld [vmem:[#allocation12 + $0x8] sm:$0xff] }
 0x3bf   : > { %2148 = vmatpush.msrb.mxu1 %v2066_v60  ;;  %v2246_v1 = vld [vmem:[#allocation13 + $0xf0] sm:$0xff]  ;;  %v2264_v60 = vld [vmem:[#allocation13 + $0x180] sm:$0xff] }
 0x3c0   : > { %v1836_v7 = vmax.f32 %v1794_v3, 0.0  ;;  %v1837_v8 = vmax.f32 %v1834_v6, 0.0  ;;  %v2247_v3 = vld [vmem:[#allocation13 + $0xf8] sm:$0xff]  ;;  %v2244_v6 = vld [vmem:[#allocation13 + $0xe0] sm:$0xff] }
 0x3c1   : > { %2149 = vmatpush.msrb.mxu1 %v2064_v62  ;;  %v2265_v62 = vld [vmem:[#allocation13 + $0x188] sm:$0xff] }
 0x3c2   : > { %1950 = vmatmul.f32.vlgmr.msrb.gmra.mxu3 %v1836_v7  ;;  %1970 = vmatmul.f32.vlgmr.msra.gmra.mxu0 %v1837_v8 }
 0x3c3   : > { %1990 = vmatmul.f32.vlgmr.msra.gmra.mxu1 %v1836_v7  ;;  %2010 = vmatmul.f32.vlgmr.msra.gmra.mxu2 %v1837_v8  ;;  %v2245_v7 = vld [vmem:[#allocation13 + $0xe8] sm:$0xff]  ;;  %v2278_v8 = vld [vmem:[#allocation13 + $0x1f0] sm:$0xff] }
 0x3c4   : > { %2194 = vmatpush.msra.mxu0 %v2127_v10  ;;  %2174 = vmatpush.msrb.mxu3 %v2095_v11  ;;  %v2242_v10 = vld [vmem:[#allocation13 + $0xd0] sm:$0xff]  ;;  %v2279_v11 = vld [vmem:[#allocation13 + $0x1f8] sm:$0xff] }
 0x3c5   : > { %2286 = vmatpush.msra.mxu1 %v2246_v1  ;;  %v2262_v1 = vld [vmem:[#allocation13 + $0x170] sm:$0xff] }
 0x3c6   : > { %2195 = vmatpush.msra.mxu0 %v2125_v12  ;;  %2175 = vmatpush.msrb.mxu3 %v2093_v13  ;;  %v2276_v12 = vld [vmem:[#allocation13 + $0x1e0] sm:$0xff]  ;;  %v2243_v13 = vld [vmem:[#allocation13 + $0xd8] sm:$0xff] }
 0x3c7   : > { %2287 = vmatpush.msra.mxu1 %v2244_v6  ;;  %v2263_v6 = vld [vmem:[#allocation13 + $0x178] sm:$0xff] }
 0x3c8   : > { %2196 = vmatpush.msra.mxu0 %v2123_v15  ;;  %2176 = vmatpush.msrb.mxu3 %v2091_v18  ;;  %v2277_v15 = vld [vmem:[#allocation13 + $0x1e8] sm:$0xff]  ;;  %v2240_v18 = vld [vmem:[#allocation13 + $0xc0] sm:$0xff] }
 0x3c9   : > { %2288 = vmatpush.msra.mxu1 %v2242_v10  ;;  %v2223_v10 = vld [vmem:[#allocation13 + $0x38] sm:$0xff] }
 0x3ca   : > { %2030 = vmatmul.f32.vlgmr.msra.gmra.mxu3 %v4576_v43  ;;  %2050 = vmatmul.f32.vlgmr.msrb.gmra.mxu0 %v4576_v43  ;;  %v2108_v43 = vld [vmem:[#allocation12 + $0x160] sm:$0xff] }
 0x3cb   : > { %2197 = vmatpush.msra.mxu0 %v2121_v20  ;;  %2177 = vmatpush.msrb.mxu3 %v2089_v21  ;;  %v2274_v20 = vld [vmem:[#allocation13 + $0x1d0] sm:$0xff]  ;;  %v2275_v21 = vld [vmem:[#allocation13 + $0x1d8] sm:$0xff] }
 0x3cc   : > { %2163 = vmatpush.msrb.mxu2 %v2108_v43  ;;  %2289 = vmatpush.msra.mxu1 %v2240_v18  ;;  %v2259_v18 = vld [vmem:[#allocation13 + $0x158] sm:$0xff] }
 0x3cd   : > { %2198 = vmatpush.msra.mxu0 %v2119_v23  ;;  %2178 = vmatpush.msrb.mxu3 %v2087_v24  ;;  %v2241_v23 = vld [vmem:[#allocation13 + $0xc8] sm:$0xff]  ;;  %v2272_v24 = vld [vmem:[#allocation13 + $0x1c0] sm:$0xff] }
 0x3ce   : > { %2164 = vmatpush.msrb.mxu2 %v2106_v33  ;;  %v2232_v33 = vld [vmem:[#allocation13 + $0x80] sm:$0xff] }
 0x3cf   : > { %2199 = vmatpush.msra.mxu0 %v2117_v26  ;;  %2179 = vmatpush.msrb.mxu3 %v2085_v35  ;;  %v2238_v26 = vld [vmem:[#allocation13 + $0xb0] sm:$0xff]  ;;  %v2271_v35 = vld [vmem:[#allocation13 + $0x1b8] sm:$0xff] }
 0x3d0   : > { %2165 = vmatpush.msrb.mxu2 %v2104_v9  ;;  %2290 = vmatpush.msra.mxu1 %v2238_v26  ;;  %v2231_v9 = vld [vmem:[#allocation13 + $0x78] sm:$0xff]  ;;  %v2216_v26 = vld [vmem:[#allocation13] sm:$0xff] }
 0x3d1   : > { %2200 = vmatpush.msra.mxu0 %v2115_v27  ;;  %2180 = vmatpush.msrb.mxu3 %v2083_v14  ;;  %v2273_v27 = vld [vmem:[#allocation13 + $0x1c8] sm:$0xff]  ;;  %v2234_v14 = vld [vmem:[#allocation13 + $0x90] sm:$0xff] }
 0x3d2   : > { %2166 = vmatpush.msrb.mxu2 %v2102_v46  ;;  %2291 = vmatpush.msra.mxu1 %v2236_v32  ;;  %v2252_v32 = vld [vmem:[#allocation13 + $0x120] sm:$0xff] }
 0x3d3   : > { %2201 = vmatpush.msra.mxu0 %v2113_v29  ;;  %2181 = vmatpush.msrb.mxu3 %v2081_v34  ;;  %v2239_v29 = vld [vmem:[#allocation13 + $0xb8] sm:$0xff]  ;;  %v2233_v34 = vld [vmem:[#allocation13 + $0x88] sm:$0xff] }
 0x3d4   : > { %2167 = vmatpush.msrb.mxu2 %v2100_v50  ;;  %2292 = vmatpush.msra.mxu1 %v2234_v14  ;;  %v2249_v14 = vld [vmem:[#allocation13 + $0x108] sm:$0xff] }
 0x3d5   : > { %2202 = vmatpush.msra.mxu0 %v2111_v36  ;;  %2182 = vmatpush.msrb.mxu3 %v2079_v16  ;;  %v2237_v36 = vld [vmem:[#allocation13 + $0xa8] sm:$0xff] }
 0x3d6   : > { %2168 = vmatpush.msrb.mxu2 %v2098_v53  ;;  %2293 = vmatpush.msra.mxu1 %v2232_v33  ;;  %v2428_v33 = vld [vmem:[#allocation15 + $0x1e0] sm:$0xff] }
 0x3d7   : > { %2203 = vmatpush.msra.mxu0 %v2109_v39  ;;  %2183 = vmatpush.msrb.mxu3 %v2077_v38  ;;  %v2269_v39 = vld [vmem:[#allocation13 + $0x1a8] sm:$0xff] }
 0x3d8   : > { %2169 = vmatpush.msrb.mxu2 %v2096_v4  ;;  %v2228_v4 = vld [vmem:[#allocation13 + $0x60] sm:$0xff] }
 0x3d9   : > { %2204 = vmatpush.msra.mxu0 %v2107_v41  ;;  %2184 = vmatpush.msrb.mxu3 %v2075_v51  ;;  %v2230_v41 = vld [vmem:[#allocation13 + $0x70] sm:$0xff] }
 0x3da   : > { %2306 = vmatpush.msra.mxu2 %v2278_v8  ;;  %2294 = vmatpush.msra.mxu1 %v2230_v41  ;;  %v2260_v8 = vld [vmem:[#allocation13 + $0x160] sm:$0xff]  ;;  %v2429_v41 = vld [vmem:[#allocation15 + $0x1e8] sm:$0xff] }
 0x3db   : > { %2205 = vmatpush.msra.mxu0 %v2105_v44  ;;  %2185 = vmatpush.msrb.mxu3 %v2073_v47 }
 0x3dc   : > { %2307 = vmatpush.msra.mxu2 %v2276_v12  ;;  %2295 = vmatpush.msra.mxu1 %v2228_v4  ;;  %v2220_v12 = vld [vmem:[#allocation13 + $0x20] sm:$0xff] }
 0x3dd   : > { %2206 = vmatpush.msra.mxu0 %v2103_v48  ;;  %2186 = vmatpush.msrb.mxu3 %v2071_v56  ;;  %v2057_v48 = vperm.slane %v2054_v42, 1  ;;  %v2266_v56 = vld [vmem:[#allocation13 + $0x190] sm:$0xff]  ;;  %v2388_v4 = vld [vmem:[#allocation15 + $0xa0] sm:$0xff] }
 0x3de   : > { %2308 = vmatpush.msra.mxu2 %v2274_v20  ;;  %v2218_v20 = vld [vmem:[#allocation13 + $0x10] sm:$0xff] }
 0x3df   : > { %2207 = vmatpush.msra.mxu0 %v2101_v5  ;;  %2187 = vmatpush.msrb.mxu3 %v2069_v59  ;;  %v2056_v5 = vperm.slane %v2054_v42, 0  ;;  %v2226_v59 = vld [vmem:[#allocation13 + $0x50] sm:$0xff]  ;;  %v2399_v42 = vld [vmem:[#allocation15 + $0xf8] sm:$0xff] }
 0x3e0   : > { %2309 = vmatpush.msra.mxu2 %v2272_v24  ;;  %2296 = vmatpush.msra.mxu1 %v2226_v59  ;;  %v2257_v24 = vld [vmem:[#allocation13 + $0x148] sm:$0xff]  ;;  %v2386_v59 = vld [vmem:[#allocation15 + $0x90] sm:$0xff] }
 0x3e1   : > { %2208 = vmatpush.msra.mxu0 %v2099_v54  ;;  %2188 = vmatpush.msrb.mxu3 %v2067_v61  ;;  %v2227_v61 = vld [vmem:[#allocation13 + $0x58] sm:$0xff] }
 0x3e2   : > { %2310 = vmatpush.msra.mxu2 %v2270_v30  ;;  %v2255_v30 = vld [vmem:[#allocation13 + $0x138] sm:$0xff] }
 0x3e3   : > { %2209 = vmatpush.msra.mxu0 %v2097_v57  ;;  %2189 = vmatpush.msrb.mxu3 %v2065_v63  ;;  %v2229_v57 = vld [vmem:[#allocation13 + $0x68] sm:$0xff]  ;;  %v2224_v63 = vld [vmem:[#allocation13 + $0x40] sm:$0xff] }
 0x3e4   : > { %2311 = vmatpush.msra.mxu2 %v2268_v37  ;;  %2297 = vmatpush.msra.mxu1 %v2224_v63  ;;  %v2251_v37 = vld [vmem:[#allocation13 + $0x118] sm:$0xff]  ;;  %v2417_v63 = vld [vmem:[#allocation15 + $0x188] sm:$0xff] }
 0x3e5   : > { %2326 = vmatpush.msra.mxu3 %v2247_v3  ;;  %2346 = vmatpush.msrb.mxu0 %v2279_v11  ;;  %v2225_v3 = vld [vmem:[#allocation13 + $0x48] sm:$0xff] }
 0x3e6   : > { %2312 = vmatpush.msra.mxu2 %v2266_v56  ;;  %v2261_v11 = vld [vmem:[#allocation13 + $0x168] sm:$0xff]  ;;  %v2418_v56 = vld [vmem:[#allocation15 + $0x190] sm:$0xff] }
 0x3e7   : > { %2327 = vmatpush.msra.mxu3 %v2245_v7  ;;  %2347 = vmatpush.msrb.mxu0 %v2277_v15  ;;  %v2222_v7 = vld [vmem:[#allocation13 + $0x30] sm:$0xff]  ;;  %v2221_v15 = vld [vmem:[#allocation13 + $0x28] sm:$0xff] }
 0x3e8   : > { %2313 = vmatpush.msra.mxu2 %v2264_v60  ;;  %2298 = vmatpush.msra.mxu1 %v2222_v7  ;;  %v2128_v60 = vld [vmem:[%s4935_s17] sm:$0x3] }
 0x3e9   : > { %2328 = vmatpush.msra.mxu3 %v2243_v13  ;;  %2348 = vmatpush.msrb.mxu0 %v2275_v21  ;;  %v2258_v13 = vld [vmem:[#allocation13 + $0x150] sm:$0xff]  ;;  %v2256_v21 = vld [vmem:[#allocation13 + $0x140] sm:$0xff] }
 0x3ea   : > { %2314 = vmatpush.msra.mxu2 %v2262_v1  ;;  %2299 = vmatpush.msra.mxu1 %v2220_v12  ;;  %v2414_v1 = vld [vmem:[#allocation15 + $0x170] sm:$0xff]  ;;  %v2131_v12 = vperm.slane %v2128_v60, 1 }
 0x3eb   : > { %2329 = vmatpush.msra.mxu3 %v2241_v23  ;;  %2349 = vmatpush.msrb.mxu0 %v2273_v27  ;;  %v2219_v23 = vld [vmem:[#allocation13 + $0x18] sm:$0xff]  ;;  %v2254_v27 = vld [vmem:[#allocation13 + $0x130] sm:$0xff] }
 0x3ec   : > { %2315 = vmatpush.msra.mxu2 %v2260_v8  ;;  %2300 = vmatpush.msra.mxu1 %v2218_v20 }
 0x3ed   : > { %2330 = vmatpush.msra.mxu3 %v2239_v29  ;;  %2350 = vmatpush.msrb.mxu0 %v2271_v35  ;;  %v2217_v29 = vld [vmem:[#allocation13 + $0x8] sm:$0xff] }
 0x3ee   : > { %2316 = vmatpush.msra.mxu2 %v2258_v13  ;;  %2301 = vmatpush.msra.mxu1 %v2216_v26  ;;  %v2253_v35 = vld [vmem:[#allocation13 + $0x128] sm:$0xff]  ;;  %v2412_v26 = vld [vmem:[#allocation15 + $0x160] sm:$0xff] }
 0x3ef   : > { %2331 = vmatpush.msra.mxu3 %v2237_v36  ;;  %2351 = vmatpush.msrb.mxu0 %v2269_v39  ;;  %v2250_v36 = vld [vmem:[#allocation13 + $0x110] sm:$0xff] }
 0x3f0   : > { %2317 = vmatpush.msra.mxu2 %v2256_v21  ;;  %v2430_v39 = vld [vmem:[#allocation15 + $0x1f0] sm:$0xff] }
 0x3f1   : > { %2332 = vmatpush.msra.mxu3 %v2235_v40  ;;  %2352 = vmatpush.msrb.mxu0 %v2267_v58  ;;  %v2431_v40 = vld [vmem:[#allocation15 + $0x1f8] sm:$0xff] }
 0x3f2   : > { %2318 = vmatpush.msra.mxu2 %v2254_v27  ;;  %v2419_v58 = vld [vmem:[#allocation15 + $0x198] sm:$0xff]  ;;  %v2385_v27 = vld [vmem:[#allocation15 + $0x88] sm:$0xff] }
 0x3f3   : > { %2333 = vmatpush.msra.mxu3 %v2233_v34  ;;  %2353 = vmatpush.msrb.mxu0 %v2265_v62  ;;  %v2398_v34 = vld [vmem:[#allocation15 + $0xf0] sm:$0xff]  ;;  %v2387_v62 = vld [vmem:[#allocation15 + $0x98] sm:$0xff] }
 0x3f4   : > { %2319 = vmatpush.msra.mxu2 %v2252_v32  ;;  %v2410_v32 = vld [vmem:[#allocation15 + $0x150] sm:$0xff] }
 0x3f5   : > { %2334 = vmatpush.msra.mxu3 %v2231_v9  ;;  %2354 = vmatpush.msrb.mxu0 %v2263_v6  ;;  %v2396_v9 = vld [vmem:[#allocation15 + $0xe0] sm:$0xff]  ;;  %v2415_v6 = vld [vmem:[#allocation15 + $0x178] sm:$0xff] }
 0x3f6   : > { %2320 = vmatpush.msra.mxu2 %v2250_v36  ;;  %v2411_v36 = vld [vmem:[#allocation15 + $0x158] sm:$0xff] }
 0x3f7   : > { %2335 = vmatpush.msra.mxu3 %v2229_v57  ;;  %2355 = vmatpush.msrb.mxu0 %v2261_v11  ;;  %v2389_v57 = vld [vmem:[#allocation15 + $0xa8] sm:$0xff] }
 0x3f9   : > { %2336 = vmatpush.msra.mxu3 %v2227_v61  ;;  %2356 = vmatpush.msrb.mxu0 %v2259_v18  ;;  %v2416_v61 = vld [vmem:[#allocation15 + $0x180] sm:$0xff] }
 0x3fb   : > { %2337 = vmatpush.msra.mxu3 %v2225_v3  ;;  %2357 = vmatpush.msrb.mxu0 %v2257_v24  ;;  %v2130_v3 = vperm.slane %v2128_v60, 0  ;;  %v2384_v24 = vld [vmem:[#allocation15 + $0x80] sm:$0xff]  ;;  %v2533_v60 = vld [vmem:[#allocation16 + $0x68] sm:$0xff] }
 0x3fd   : > { %2338 = vmatpush.msra.mxu3 %v2223_v10  ;;  %2358 = vmatpush.msrb.mxu0 %v2255_v30  ;;  %v2382_v30 = vld [vmem:[#allocation15 + $0x70] sm:$0xff] }
 0x3ff   : > { %2339 = vmatpush.msra.mxu3 %v2221_v15  ;;  %2359 = vmatpush.msrb.mxu0 %v2253_v35  ;;  %v2383_v35 = vld [vmem:[#allocation15 + $0x78] sm:$0xff] }
 0x401   : > { %2340 = vmatpush.msra.mxu3 %v2219_v23  ;;  %2360 = vmatpush.msrb.mxu0 %v2251_v37  ;;  %v2380_v37 = vld [vmem:[#allocation15 + $0x60] sm:$0xff] }
 0x403   : > { %2341 = vmatpush.msra.mxu3 %v2217_v29  ;;  %2361 = vmatpush.msrb.mxu0 %v2249_v14  ;;  %v2413_v29 = vld [vmem:[#allocation15 + $0x168] sm:$0xff] }
 0x404   : > { %v2381_v14 = vld [vmem:[#allocation15 + $0x68] sm:$0xff] }
 0x43f   : > { %v1971_v43 = vpop.f32.mrf.mxu0 }
 0x440   : > { %v1991_v44 = vpop.f32.mrf.mxu1 }
 0x445   : > { %v1951_v16 = vpop.f32.mrf.mxu3 }
 0x446   : > { %v2011_v45 = vpop.f32.mrf.mxu2  ;;  %v1972_v51 = vadd.f32 %v1971_v43, %v1951_v16  ;;  %v2248_v43 = vld [vmem:[#allocation13 + $0x100] sm:$0xff]  ;;  %v2426_v16 = vld [vmem:[#allocation15 + $0x1d0] sm:$0xff] }
 0x447   : > { %v2012_v46 = vadd.f32 %v2011_v45, %v1991_v44  ;;  %v2051_v38 = vpop.f32.mrf.mxu0  ;;  %2321 = vmatpush.msra.mxu2 %v2248_v43  ;;  %v2397_v44 = vld [vmem:[#allocation15 + $0xe8] sm:$0xff]  ;;  %v2427_v45 = vld [vmem:[#allocation15 + $0x1d8] sm:$0xff]  ;;  %v2408_v43 = vld [vmem:[#allocation15 + $0x140] sm:$0xff] }
 0x449   : > { %v2052_v49 = vadd.f32 %v2051_v38, %v2012_v46  ;;  %v2394_v46 = vld [vmem:[#allocation15 + $0xd0] sm:$0xff]  ;;  %v2424_v38 = vld [vmem:[#allocation15 + $0x1c0] sm:$0xff] }
 0x44b   : > { %v2061_v50 = vadd.f32 %v2057_v48, %v2052_v49  ;;  %v2395_v48 = vld [vmem:[#allocation15 + $0xd8] sm:$0xff]  ;;  %v2425_v49 = vld [vmem:[#allocation15 + $0x1c8] sm:$0xff] }
 0x44d   : > { %v2063_v52 = vmax.f32 %v2061_v50, 0.0  ;;  %v2031_v53 = vpop.f32.mrf.mxu3  ;;  %v2392_v50 = vld [vmem:[#allocation15 + $0xc0] sm:$0xff] }
 0x44e   : > { %v2032_v47 = vadd.f32 %v2031_v53, %v1972_v51  ;;  %v2422_v51 = vld [vmem:[#allocation15 + $0x1b0] sm:$0xff] }
 0x44f   : > { %2170 = vmatmul.f32.vlgmr.msrb.gmra.mxu2 %v2063_v52  ;;  %2210 = vmatmul.f32.vlgmr.msra.gmra.mxu0 %v2063_v52  ;;  %v2423_v52 = vld [vmem:[#allocation15 + $0x1b8] sm:$0xff]  ;;  %v2390_v53 = vld [vmem:[#allocation15 + $0xb0] sm:$0xff] }
 0x450   : > { %v2060_v54 = vadd.f32 %v2056_v5, %v2032_v47  ;;  %2458 = vmatpush.msrb.mxu2 %v2430_v39  ;;  %2498 = vmatpush.msra.mxu0 %v2431_v40  ;;  %v2393_v5 = vld [vmem:[#allocation15 + $0xc8] sm:$0xff]  ;;  %v2420_v47 = vld [vmem:[#allocation15 + $0x1a0] sm:$0xff]  ;;  %v2378_v40 = vld [vmem:[#allocation15 + $0x50] sm:$0xff] }
 0x451   : > { %v2409_v39 = vld [vmem:[#allocation15 + $0x148] sm:$0xff] }
 0x452   : > { %v2062_v55 = vmax.f32 %v2060_v54, 0.0  ;;  %2459 = vmatpush.msrb.mxu2 %v2428_v33  ;;  %2499 = vmatpush.msra.mxu0 %v2429_v41  ;;  %v2391_v54 = vld [vmem:[#allocation15 + $0xb8] sm:$0xff]  ;;  %v2406_v33 = vld [vmem:[#allocation15 + $0x130] sm:$0xff] }
 0x453   : > { %v2407_v41 = vld [vmem:[#allocation15 + $0x138] sm:$0xff] }
 0x454   : > { %2150 = vmatmul.f32.vlgmr.msrb.gmra.mxu1 %v2062_v55  ;;  %2190 = vmatmul.f32.vlgmr.msrb.gmra.mxu3 %v2062_v55  ;;  %v2421_v55 = vld [vmem:[#allocation15 + $0x1a8] sm:$0xff] }
 0x455   : > { %2438 = vmatpush.msrb.mxu1 %v2398_v34  ;;  %2478 = vmatpush.msrb.mxu3 %v2399_v42  ;;  %v2379_v34 = vld [vmem:[#allocation15 + $0x58] sm:$0xff]  ;;  %v2376_v42 = vld [vmem:[#allocation15 + $0x40] sm:$0xff] }
 0x456   : > { %2460 = vmatpush.msrb.mxu2 %v2426_v16  ;;  %2500 = vmatpush.msra.mxu0 %v2427_v45  ;;  %v2377_v16 = vld [vmem:[#allocation15 + $0x48] sm:$0xff]  ;;  %v2374_v45 = vld [vmem:[#allocation15 + $0x30] sm:$0xff] }
 0x457   : > { %2439 = vmatpush.msrb.mxu1 %v2396_v9  ;;  %2479 = vmatpush.msrb.mxu3 %v2397_v44  ;;  %v2404_v9 = vld [vmem:[#allocation15 + $0x120] sm:$0xff]  ;;  %v2405_v44 = vld [vmem:[#allocation15 + $0x128] sm:$0xff] }
 0x458   : > { %2461 = vmatpush.msrb.mxu2 %v2424_v38  ;;  %2501 = vmatpush.msra.mxu0 %v2425_v49  ;;  %v2375_v38 = vld [vmem:[#allocation15 + $0x38] sm:$0xff]  ;;  %v2372_v49 = vld [vmem:[#allocation15 + $0x20] sm:$0xff] }
 0x459   : > { %2440 = vmatpush.msrb.mxu1 %v2394_v46  ;;  %2480 = vmatpush.msrb.mxu3 %v2395_v48  ;;  %v2402_v46 = vld [vmem:[#allocation15 + $0x110] sm:$0xff]  ;;  %v2403_v48 = vld [vmem:[#allocation15 + $0x118] sm:$0xff] }
 0x45a   : > { %2462 = vmatpush.msrb.mxu2 %v2422_v51  ;;  %2502 = vmatpush.msra.mxu0 %v2423_v52  ;;  %v2373_v51 = vld [vmem:[#allocation15 + $0x28] sm:$0xff] }
 0x45b   : > { %2441 = vmatpush.msrb.mxu1 %v2392_v50  ;;  %2481 = vmatpush.msrb.mxu3 %v2393_v5  ;;  %v2400_v50 = vld [vmem:[#allocation15 + $0x100] sm:$0xff]  ;;  %v2401_v52 = vld [vmem:[#allocation15 + $0x108] sm:$0xff] }
 0x45c   : > { %2463 = vmatpush.msrb.mxu2 %v2420_v47  ;;  %2503 = vmatpush.msra.mxu0 %v2421_v55  ;;  %v4607_v5 = vld [vmem:[%s4604_s26] sm:$0xff]  ;;  %v2371_v47 = vld [vmem:[#allocation15 + $0x18] sm:$0xff]  ;;  %v2369_v55 = vld [vmem:[#allocation15 + $0x8] sm:$0xff] }
 0x45d   : > { %2442 = vmatpush.msrb.mxu1 %v2390_v53  ;;  %2482 = vmatpush.msrb.mxu3 %v2391_v54  ;;  %v2370_v53 = vld [vmem:[#allocation15 + $0x10] sm:$0xff]  ;;  %v2368_v54 = vld [vmem:[#allocation15] sm:$0xff] }
 0x45e   : > { %2464 = vmatpush.msrb.mxu2 %v2418_v56  ;;  %2504 = vmatpush.msra.mxu0 %v2419_v58  ;;  %v2535_v56 = vld [vmem:[#allocation16 + $0x78] sm:$0xff]  ;;  %v2534_v58 = vld [vmem:[#allocation16 + $0x70] sm:$0xff] }
 0x45f   : > { %2443 = vmatpush.msrb.mxu1 %v2388_v4  ;;  %2483 = vmatpush.msrb.mxu3 %v2389_v57  ;;  %v4611_v4 = vmul.f32 %v4607_v5, %v4607_v5  ;;  %v2551_v57 = vld [vmem:[#allocation16 + $0xf8] sm:$0xff] }
 0x460   : > { %2465 = vmatpush.msrb.mxu2 %v2416_v61  ;;  %2505 = vmatpush.msra.mxu0 %v2417_v63  ;;  %v2549_v61 = vld [vmem:[#allocation16 + $0xe8] sm:$0xff]  ;;  %v2548_v63 = vld [vmem:[#allocation16 + $0xe0] sm:$0xff] }
 0x461   : > { %2444 = vmatpush.msrb.mxu1 %v2386_v59  ;;  %2484 = vmatpush.msrb.mxu3 %v2387_v62  ;;  %v2550_v59 = vld [vmem:[#allocation16 + $0xf0] sm:$0xff]  ;;  %v2532_v62 = vld [vmem:[#allocation16 + $0x60] sm:$0xff] }
 0x462   : > { %2466 = vmatpush.msrb.mxu2 %v2414_v1  ;;  %2506 = vmatpush.msra.mxu0 %v2415_v6  ;;  %v2531_v1 = vld [vmem:[#allocation16 + $0x58] sm:$0xff]  ;;  %v2530_v6 = vld [vmem:[#allocation16 + $0x50] sm:$0xff] }
 0x463   : > { %2445 = vmatpush.msrb.mxu1 %v2384_v24  ;;  %2485 = vmatpush.msrb.mxu3 %v2385_v27 }
 0x464   : > { %2467 = vmatpush.msrb.mxu2 %v2412_v26  ;;  %2507 = vmatpush.msra.mxu0 %v2413_v29 }
 0x465   : > { %2446 = vmatpush.msrb.mxu1 %v2382_v30  ;;  %2486 = vmatpush.msrb.mxu3 %v2383_v35 }
 0x466   : > { %2468 = vmatpush.msrb.mxu2 %v2410_v32  ;;  %2508 = vmatpush.msra.mxu0 %v2411_v36 }
 0x467   : > { %2447 = vmatpush.msrb.mxu1 %v2380_v37  ;;  %2487 = vmatpush.msrb.mxu3 %v2381_v14  ;;  %v2525_v37 = vld [vmem:[#allocation16 + $0x28] sm:$0xff]  ;;  %v2524_v14 = vld [vmem:[#allocation16 + $0x20] sm:$0xff] }
 0x468   : > { %2469 = vmatpush.msrb.mxu2 %v2408_v43  ;;  %2509 = vmatpush.msra.mxu0 %v2409_v39  ;;  %v2544_v43 = vld [vmem:[#allocation16 + $0xc0] sm:$0xff]  ;;  %v2543_v39 = vld [vmem:[#allocation16 + $0xb8] sm:$0xff] }
 0x469   : > { %2448 = vmatpush.msrb.mxu1 %v2378_v40  ;;  %2488 = vmatpush.msrb.mxu3 %v2379_v34  ;;  %v2523_v40 = vld [vmem:[#allocation16 + $0x18] sm:$0xff]  ;;  %v2522_v34 = vld [vmem:[#allocation16 + $0x10] sm:$0xff] }
 0x46a   : > { %2470 = vmatpush.msrb.mxu2 %v2406_v33  ;;  %2510 = vmatpush.msra.mxu0 %v2407_v41  ;;  %v2542_v33 = vld [vmem:[#allocation16 + $0xb0] sm:$0xff]  ;;  %v2541_v41 = vld [vmem:[#allocation16 + $0xa8] sm:$0xff] }
 0x46b   : > { %2449 = vmatpush.msrb.mxu1 %v2376_v42  ;;  %2489 = vmatpush.msrb.mxu3 %v2377_v16  ;;  %v2521_v42 = vld [vmem:[#allocation16 + $0x8] sm:$0xff]  ;;  %v2520_v16 = vld [vmem:[#allocation16] sm:$0xff] }
 0x46c   : > { %2471 = vmatpush.msrb.mxu2 %v2404_v9  ;;  %2511 = vmatpush.msra.mxu0 %v2405_v44  ;;  %v2540_v9 = vld [vmem:[#allocation16 + $0xa0] sm:$0xff]  ;;  %v2539_v44 = vld [vmem:[#allocation16 + $0x98] sm:$0xff] }
 0x46d   : > { %2450 = vmatpush.msrb.mxu1 %v2374_v45  ;;  %2490 = vmatpush.msrb.mxu3 %v2375_v38  ;;  %v2538_v45 = vld [vmem:[#allocation16 + $0x90] sm:$0xff] }
 0x46e   : > { %2472 = vmatpush.msrb.mxu2 %v2402_v46  ;;  %2512 = vmatpush.msra.mxu0 %v2403_v48  ;;  %v2537_v46 = vld [vmem:[#allocation16 + $0x88] sm:$0xff]  ;;  %v2536_v48 = vld [vmem:[#allocation16 + $0x80] sm:$0xff] }
 0x46f   : > { %2451 = vmatpush.msrb.mxu1 %v2372_v49  ;;  %2491 = vmatpush.msrb.mxu3 %v2373_v51 }
 0x470   : > { %2473 = vmatpush.msrb.mxu2 %v2400_v50  ;;  %2513 = vmatpush.msra.mxu0 %v2401_v52 }
 0x471   : > { %2452 = vmatpush.msrb.mxu1 %v2370_v53  ;;  %2492 = vmatpush.msrb.mxu3 %v2371_v47  ;;  %v2432_v47 = vld [vmem:[%s4939_s21] sm:$0x3] }
 0x472   : > { %3001 = vrot.lane.b32.xlu1 %v4611_v4, %s4139_s25  ;;  %3009 = vrot.lane.b32.xlu2 %v4611_v4, %s4140_s18 }
 0x473   : > { %2453 = vmatpush.msrb.mxu1 %v2368_v54  ;;  %2493 = vmatpush.msrb.mxu3 %v2369_v55  ;;  %v2434_v54 = vperm.slane %v2432_v47, 0 }
 0x47a   : > { %3005 = vrot.lane.b32.xlu1 %v4611_v4, %s4141_s1 }
 0x4cc   : > { %v2211_v20 = vpop.f32.mrf.mxu0  ;;  %v3010_v51 = vpop.permute.xlu2 %3009 }
 0x4d1   : > { %v2151_v7 = vpop.f32.mrf.mxu1 }
 0x4d2   : > { %v2152_v8 = vadd.f32 %v2151_v7, %v2130_v3  ;;  %v2171_v10 = vpop.f32.mrf.mxu2  ;;  %v2547_v3 = vld [vmem:[#allocation16 + $0xd8] sm:$0xff]  ;;  %v2546_v7 = vld [vmem:[#allocation16 + $0xd0] sm:$0xff] }
 0x4d4   : > { %v2172_v11 = vadd.f32 %v2171_v10, %v2152_v8  ;;  %v2529_v8 = vld [vmem:[#allocation16 + $0x48] sm:$0xff] }
 0x4d5   : > { %v2545_v10 = vld [vmem:[#allocation16 + $0xc8] sm:$0xff] }
 0x4d6   : > { %v2214_v13 = vmax.f32 %v2172_v11, 0.0  ;;  %v2528_v11 = vld [vmem:[#allocation16 + $0x40] sm:$0xff] }
 0x4d7   : > { %v2191_v15 = vpop.f32.mrf.mxu3 }
 0x4d8   : > { %v2192_v18 = vadd.f32 %v2191_v15, %v2131_v12  ;;  %2302 = vmatmul.f32.vlgmr.msra.gmra.mxu1 %v2214_v13  ;;  %2342 = vmatmul.f32.vlgmr.msra.gmra.mxu3 %v2214_v13  ;;  %v2527_v12 = vld [vmem:[#allocation16 + $0x38] sm:$0xff]  ;;  %v2280_v13 = vld [vmem:[%s4937_s19] sm:$0x3] }
 0x4d9   : > { %2556 = vmatpush.msra.mxu1 %v2535_v56  ;;  %v2283_v15 = vperm.slane %v2280_v13, 1 }
 0x4da   : > { %v2212_v21 = vadd.f32 %v2211_v20, %v2192_v18  ;;  %v2526_v18 = vld [vmem:[#allocation16 + $0x30] sm:$0xff] }
 0x4db   : > { %2557 = vmatpush.msra.mxu1 %v2534_v58 }
 0x4dc   : > { %v2215_v23 = vmax.f32 %v2212_v21, 0.0  ;;  %v2282_v21 = vperm.slane %v2280_v13, 0 }
 0x4dd   : > { %2558 = vmatpush.msra.mxu1 %v2533_v60 }
 0x4de   : > { %2322 = vmatmul.f32.vlgmr.msra.gmra.mxu2 %v2215_v23  ;;  %2362 = vmatmul.f32.vlgmr.msrb.gmra.mxu0 %v2215_v23 }
 0x4df   : > { %2576 = vmatpush.msra.mxu2 %v2551_v57  ;;  %2559 = vmatpush.msra.mxu1 %v2532_v62  ;;  %v2435_v62 = vperm.slane %v2432_v47, 1 }
 0x4e1   : > { %2577 = vmatpush.msra.mxu2 %v2550_v59  ;;  %2560 = vmatpush.msra.mxu1 %v2531_v1 }
 0x4e3   : > { %2578 = vmatpush.msra.mxu2 %v2549_v61  ;;  %2561 = vmatpush.msra.mxu1 %v2530_v6 }
 0x4e4   : > { %v3002_v38 = vpop.permute.xlu1 %3001 }
 0x4e5   : > { %2579 = vmatpush.msra.mxu2 %v2548_v63  ;;  %2562 = vmatpush.msra.mxu1 %v2529_v8  ;;  %v3004_v49 = vadd.f32 %v3002_v38, %v4611_v4 }
 0x4e7   : > { %2580 = vmatpush.msra.mxu2 %v2547_v3  ;;  %2563 = vmatpush.msra.mxu1 %v2528_v11 }
 0x4e9   : > { %2581 = vmatpush.msra.mxu2 %v2546_v7  ;;  %2564 = vmatpush.msra.mxu1 %v2527_v12 }
 0x4eb   : > { %2582 = vmatpush.msra.mxu2 %v2545_v10  ;;  %2565 = vmatpush.msra.mxu1 %v2526_v18 }
 0x4ec   : > { %v3006_v50 = vpop.permute.xlu1 %3005 }
 0x4ed   : > { %2566 = vmatpush.msra.mxu1 %v2525_v37  ;;  %2583 = vmatpush.msra.mxu2 %v2544_v43  ;;  %v3008_v52 = vadd.f32 %v3006_v50, %v3004_v49  ;;  %v3773_v43 = vld [vmem:[%s4941_s23] ss:$0 sm:$0xff] }
 0x4ef   : > { %2567 = vmatpush.msra.mxu1 %v2524_v14  ;;  %2584 = vmatpush.msra.mxu2 %v2543_v39  ;;  %v3012_v53 = vadd.f32 %v3010_v51, %v3008_v52 }
 0x4f1   : > { %2568 = vmatpush.msra.mxu1 %v2523_v40  ;;  %2585 = vmatpush.msra.mxu2 %v2542_v33  ;;  %3774 = vrsqrt.f32 %v3012_v53  ;;  %vm3020_vm13 = vcmp.eq.f32.partialorder %v3012_v53, inf  ;;  %v3023_v10 = vand.u32 2147483648, %v3012_v53  ;;  %vm3022_vm14 = vcmp.eq.f32.partialorder %v3012_v53, 0.0 }
 0x4f3   : > { %2569 = vmatpush.msra.mxu1 %v2522_v34  ;;  %2586 = vmatpush.msra.mxu2 %v2541_v41 }
 0x4f5   : > { %2570 = vmatpush.msra.mxu1 %v2521_v42  ;;  %2587 = vmatpush.msra.mxu2 %v2540_v9 }
 0x4f7   : > { %2571 = vmatpush.msra.mxu1 %v2520_v16  ;;  %2588 = vmatpush.msra.mxu2 %v2539_v44  ;;  %v3775_v55 = vpop.eup %3774 }
 0x4f8   : > { %v3014_v56 = vmul.f32 %v3775_v55, %v3012_v53 }
 0x4f9   : > { %2589 = vmatpush.msra.mxu2 %v2538_v45 }
 0x4fa   : > { %v3015_v59 = vmul.f32 %v3775_v55, %v3014_v56 }
 0x4fb   : > { %2590 = vmatpush.msra.mxu2 %v2537_v46 }
 0x4fc   : > { %v3016_v63 = vmul.f32 0.5, %v3015_v59 }
 0x4fd   : > { %2591 = vmatpush.msra.mxu2 %v2536_v48 }
 0x4fe   : > { %v3017_v1 = vsub.f32 1.5, %v3016_v63 }
 0x500   : > { %v3018_v7 = vmul.f32 %v3775_v55, %v3017_v1 }
 0x502   : > { %v3019_v12 = vmul.f32 %v3018_v7, %v3012_v53 }
 0x555   : > { %v2303_v24 = vpop.f32.mrf.mxu1 }
 0x556   : > { %v2304_v29 = vadd.f32 %v2303_v24, %v2282_v21 }
 0x55b   : > { %v2343_v20 = vpop.f32.mrf.mxu3  ;;  %v2363_v26 = vpop.f32.mrf.mxu0 }
 0x55c   : > { %v2344_v23 = vadd.f32 %v2343_v20, %v2283_v15  ;;  %v3021_v15 = vsel %vm3020_vm13, %v3012_v53, %v3019_v12 }
 0x55d   : > { %v3024_v18 = vsel %vm3022_vm14, %v3023_v10, %v3021_v15 }
 0x55e   : > { %v2364_v27 = vadd.f32 %v2363_v26, %v2344_v23  ;;  %v3025_v20 = vmax.f32 %v3024_v18, 1e-12 }
 0x560   : > { %v2367_v30 = vmax.f32 %v2364_v27, 0.0  ;;  %3776 = vrcp.f32 %v3025_v20  ;;  %v3037_v24 = vand.u32 2147483648, %v3025_v20  ;;  %vm3031_vm15 = vweird.f32 %v3025_v20 }
 0x561   : > { %v2323_v32 = vpop.f32.mrf.mxu2  ;;  %v3035_v27 = vand.u32 2147483647, %v3025_v20 }
 0x562   : > { %v2324_v35 = vadd.f32 %v2323_v32, %v2304_v29  ;;  %2474 = vmatmul.f32.vlgmr.msrb.gmra.mxu2 %v2367_v30  ;;  %2514 = vmatmul.f32.vlgmr.msra.gmra.mxu0 %v2367_v30  ;;  %v3038_v30 = vor.u32 1.1754944e-38, %v3037_v24 }
 0x563   : > { %vm3036_vm2 = vcmp.eq.f32.partialorder %v3035_v27, 8.507059e+37 }
 0x564   : > { %v2366_v36 = vmax.f32 %v2324_v35, 0.0 }
 0x566   : > { %2454 = vmatmul.f32.vlgmr.msrb.gmra.mxu1 %v2366_v36  ;;  %2494 = vmatmul.f32.vlgmr.msrb.gmra.mxu3 %v2366_v36  ;;  %v3777_v21 = vpop.eup %3776 }
 0x567   : > { %v3027_v23 = vmul.f32 %v3777_v21, %v3025_v20  ;;  %vm3032_vm0 = vweird.f32 %v3777_v21 }
 0x568   : > { %vm3033_vm1 = vmor %vm3031_vm15, %vm3032_vm0 }
 0x569   : > { %v3028_v26 = vsub.f32 1.0, %v3027_v23 }
 0x56b   : > { %v3029_v29 = vmul.f32 %v3777_v21, %v3028_v26 }
 0x56d   : > { %v3030_v32 = vadd.f32 %v3777_v21, %v3029_v29 }
 0x56f   : > { %v3034_v35 = vsel %vm3033_vm1, %v3777_v21, %v3030_v32 }
 0x570   : > { %v3039_v36 = vsel %vm3036_vm2, %v3038_v30, %v3034_v35 }
 0x571   : > { %3047 = vrot.lane.b32.xlu0 %v3039_v36, %s4142_s27  ;;  %v4628_v37 = vmul.f32 %v3039_v36, %v4607_v5 }
 0x579   : > { %3124 = vrot.lane.b32.xlu0 %v4628_v37, %s4142_s27 }
 0x5df   : > { %v2515_v8 = vpop.f32.mrf.mxu0 }
 0x5e3   : > { %v2455_v57 = vpop.f32.mrf.mxu1  ;;  %v3048_v41 = vpop.permute.xlu0 %3047 }
 0x5e4   : > { %v2456_v58 = vadd.f32 %v2455_v57, %v2434_v54  ;;  %v4656_v42 = vmul.f32 %v3048_v41, %v4607_v5 }
 0x5e5   : > { %v2475_v60 = vpop.f32.mrf.mxu2 }
 0x5e6   : > { %v2476_v61 = vadd.f32 %v2475_v60, %v2456_v58 }
 0x5e8   : > { %v2518_v4 = vmax.f32 %v2476_v61, 0.0 }
 0x5e9   : > { %v2495_v3 = vpop.f32.mrf.mxu3 }
 0x5ea   : > { %v2496_v6 = vadd.f32 %v2495_v3, %v2435_v62  ;;  %2572 = vmatmul.f32.vlgmr.msra.gmra.mxu1 %v2518_v4 }
 0x5eb   : > { %v3125_v56 = vpop.permute.xlu0 %3124 }
 0x5ec   : > { %v2516_v11 = vadd.f32 %v2515_v8, %v2496_v6  ;;  %v4690_v6 = vmul.f32 %v4656_v42, %v4656_v42 }
 0x5ee   : > { %v2519_v13 = vmax.f32 %v2516_v11, 0.0 }
 0x5f0   : > { %2592 = vmatmul.f32.vlgmr.msra.gmra.mxu2 %v2519_v13 }
 0x667   : > { %v2573_v14 = vpop.f32.mrf.mxu1 }
 0x668   : > { %v2574_v39 = vadd.f32 %v3773_v43, %v2573_v14 }
 0x673   : > { %v2593_v40 = vpop.f32.mrf.mxu2 }
 0x674   : > { %v4635_v33 = vadd.f32 %v2593_v40, %v2574_v39 }
 0x676   : > { %v4639_v34 = vmul.f32 %v4635_v33, %v4635_v33 }
 0x678   : > { %2603 = vrot.lane.b32.xlu1 %v4639_v34, %s4141_s1  ;;  %2599 = vrot.lane.b32.xlu2 %v4639_v34, %s4139_s25 }
 0x680   : > { %3105 = vrot.lane.b32.xlu1 %v4628_v37, %s4143_s7  ;;  %3051 = vrot.lane.b32.xlu2 %v3039_v36, %s4143_s7 }
 0x688   : > { %3158 = vrot.lane.b32.xlu1 %v4628_v37, %s4144_s5  ;;  %3043 = vrot.lane.b32.xlu2 %v3039_v36, %s4144_s5 }
 0x690   : > { %2962 = vrot.lane.b32.xlu1 %v4635_v33, %s4139_s25  ;;  %2969 = vrot.lane.b32.xlu2 %v4635_v33, %s4141_s1 }
 0x698   : > { %3100 = vrot.lane.b32.xlu1 %v4656_v42, %s4139_s25 }
 0x6d2   : > { %v2600_v9 = vpop.permute.xlu2 %2599 }
 0x6d3   : > { %v4665_v46 = vadd.f32 %v2600_v9, %v4639_v34 }
 0x6da   : > { %v3052_v16 = vpop.permute.xlu2 %3051 }
 0x6db   : > { %v3054_v44 = vmul.f32 %v3052_v16, %v4607_v5 }
 0x6dd   : > { %v3068_v45 = vmul.f32 %v3054_v44, %v3054_v44 }
 0x6df   : > { %3089 = vrot.lane.b32.xlu0 %v3068_v45, %s4139_s25  ;;  %3144 = vrot.lane.b32.xlu1 %v3068_v45, %s4141_s1 }
 0x6e2   : > { %v3044_v50 = vpop.permute.xlu2 %3043 }
 0x6e3   : > { %v4673_v51 = vmul.f32 %v3044_v50, %v4607_v5  ;;  %v3127_v5 = vmul.f32 %v3125_v56, %v4656_v42 }
 0x6e5   : > { %v4678_v54 = vmul.f32 %v4673_v51, %v4673_v51 }
 0x6e7   : > { %3120 = vrot.lane.b32.xlu0 %v3054_v44, %s4141_s1 }
 0x6ea   : > { %v4667_v38 = vpop.permute.xlu1 %2603 }
 0x6eb   : > { %v2606_v48 = vadd.f32 %v4667_v38, %v4665_v46 }
 0x6ed   : > { %v2607_v49 = vmax.f32 %v2606_v48, 0.0001 }
 0x6ef   : > { %3778 = vrsqrt.f32 %v2607_v49  ;;  %3154 = vrot.lane.b32.xlu0 %v3054_v44, %s4139_s25  ;;  %vm2615_vm3 = vcmp.eq.f32.partialorder %v2607_v49, inf  ;;  %v2618_v4 = vand.u32 2147483648, %v2607_v49  ;;  %vm2617_vm4 = vcmp.eq.f32.partialorder %v2607_v49, 0.0 }
 0x6f2   : > { %v3106_v52 = vpop.permute.xlu1 %3105 }
 0x6f3   : > { %v3108_v53 = vmul.f32 %v3106_v52, %v3054_v44 }
 0x6f5   : > { %v3779_v47 = vpop.eup %3778  ;;  %3110 = vrot.lane.b32.xlu2 %v3108_v53, %s4141_s1 }
 0x6f6   : > { %v2609_v55 = vmul.f32 %v3779_v47, %v2607_v49 }
 0x6f7   : > { %3058 = vrot.lane.b32.xlu0 %v4678_v54, %s4139_s25 }
 0x6f8   : > { %v2610_v57 = vmul.f32 %v3779_v47, %v2609_v55 }
 0x6fa   : > { %v2611_v58 = vmul.f32 0.5, %v2610_v57  ;;  %v3159_v59 = vpop.permute.xlu1 %3158 }
 0x6fb   : > { %v3161_v60 = vmul.f32 %v3159_v59, %v4673_v51 }
 0x6fc   : > { %v2612_v61 = vsub.f32 1.5, %v2611_v58 }
 0x6fd   : > { %3163 = vrot.lane.b32.xlu1 %v3161_v60, %s4144_s5  ;;  %3129 = vrot.lane.b32.xlu2 %v3127_v5, %s4139_s25 }
 0x6fe   : > { %v2613_v62 = vmul.f32 %v3779_v47, %v2612_v61 }
 0x700   : > { %v2614_v63 = vmul.f32 %v2613_v62, %v2607_v49 }
 0x702   : > { %v2616_v1 = vsel %vm2615_vm3, %v2607_v49, %v2614_v63 }
 0x703   : > { %v4686_v3 = vsel %vm2617_vm4, %v2618_v4, %v2616_v1 }
 0x704   : > { %v2638_v7 = vand.u32 2139095040, %v4686_v3  ;;  %v4698_v10 = vand.u32 2147483647, %v4686_v3  ;;  %3780 = vrcp.f32 %v4686_v3  ;;  %vm2637_vm1 = vcmp.lt.s32.totalorder %v4686_v3, 0 }
 0x705   : > { %3064 = vrot.lane.b32.xlu1 %v4690_v6, %s4141_s1  ;;  %3184 = vrot.lane.b32.xlu2 %v4690_v6, %s4139_s25  ;;  %vm2625_vm4 = vweird.f32 %v4686_v3 }
 0x706   : > { %v2639_v8 = vshrl.u32 %v2638_v7, 23  ;;  %v2642_v13 = vand.u32 8388607, %v4698_v10  ;;  %vm2636_vm2 = vcmp.le.f32.partialorder %v4698_v10, 0.7853982 }
 0x708   : > { %v3624_v11 = vadd.s32 4294967169, %v2639_v8  ;;  %v2643_v20 = vor.u32 8388608, %v2642_v13 }
 0x70a   : > { %v2645_v12 = vadd.s32 1, %v3624_v11  ;;  %v4714_v41 = vshll.u32 %v2643_v20, 8 }
 0x70c   : > { %vm2646_vm5 = vcmp.gt.s32.totalorder %v2645_v12, 0  ;;  %v2684_v50 = vand.u32 65535, %v4714_v41  ;;  %v2685_v52 = vshrl.u32 %v4714_v41, 16 }
 0x70d   : > { %3070 = vrot.lane.b32.xlu2 %v3068_v45, %s4140_s18  ;;  %v2647_v15 = vsel %vm2646_vm5, %v2645_v12, 0 }
 0x70e   : > { %v2649_v18 = vand.u32 31, %v2647_v15  ;;  %v4702_v23 = vshrl.u32 %v2647_v15, 5 }
 0x710   : > { %v2650_v21 = vsub.s32 32, %v2649_v18  ;;  %v2652_v24 = vshll.u32 %v4133_v17, %v2649_v18  ;;  %v2655_v26 = vshll.u32 %v4134_v19, %v2649_v18  ;;  %v2658_v30 = vshll.u32 %v4135_v22, %v2649_v18 }
 0x711   : > { %v2661_v32 = vshll.u32 %v4136_v25, %v2649_v18  ;;  %v2664_v43 = vshll.u32 %v4137_v28, %v2649_v18  ;;  %vm2667_vm6 = vcmp.lt.s32.totalorder %v4702_v23, 1  ;;  %vm2670_vm7 = vcmp.lt.s32.totalorder %v4702_v23, 4 }
 0x712   : > { %v2653_v27 = vshrl.u32 %v4134_v19, %v2650_v21  ;;  %v2656_v29 = vshrl.u32 %v4135_v22, %v2650_v21  ;;  %v2659_v35 = vshrl.u32 %v4136_v25, %v2650_v21  ;;  %v2662_v36 = vshrl.u32 %v4137_v28, %v2650_v21 }
 0x713   : > { %v2665_v14 = vshrl.u32 %v4138_v31, %v2650_v21  ;;  %vm2669_vm8 = vcmp.lt.s32.totalorder %v4702_v23, 3  ;;  %vm2668_vm9 = vcmp.lt.s32.totalorder %v4702_v23, 2  ;;  %v4752_v23 = vpop.permute.xlu1 %2962 }
 0x714   : > { %v2654_v39 = vor.u32 %v2653_v27, %v2652_v24  ;;  %v2657_v40 = vor.u32 %v2656_v29, %v2655_v26  ;;  %v2660_v9 = vor.u32 %v2659_v35, %v2658_v30  ;;  %v2663_v19 = vor.u32 %v2662_v36, %v2661_v32 }
 0x715   : > { %v2666_v16 = vor.u32 %v2665_v14, %v2664_v43  ;;  %v2651_v27 = vshrl.u32 %v4133_v17, %v2650_v21 }
 0x716   : > { %v2675_v22 = vsel %vm2667_vm6, %v2654_v39, %v2657_v40  ;;  %v2676_v25 = vsel %vm2670_vm7, %v2663_v19, 920167782  ;;  %v2679_v28 = vsel %vm2667_vm6, %v2657_v40, %v2660_v9  ;;  %v2672_v20 = vsel %vm2670_vm7, %v2660_v9, 2102212464 }
 0x717   : > { %v2680_v31 = vsel %vm2670_vm7, %v2666_v16, 1326507024  ;;  %v2677_v44 = vsel %vm2669_vm8, %v2660_v9, %v2676_v25  ;;  %v2671_v43 = vsel %vm2667_vm6, %v2651_v27, %v2654_v39  ;;  %v2673_v14 = vsel %vm2669_vm8, %v2657_v40, %v2672_v20 }
 0x718   : > { %v2681_v45 = vsel %vm2669_vm8, %v2663_v19, %v2680_v31  ;;  %v2678_v48 = vsel %vm2668_vm9, %v2675_v22, %v2677_v44  ;;  %v2674_v17 = vsel %vm2668_vm9, %v2671_v43, %v2673_v14  ;;  %vm2630_vm6 = vcmp.eq.f32.partialorder %v4698_v10, 8.507059e+37 }
 0x719   : > { %v2682_v49 = vsel %vm2668_vm9, %v2679_v28, %v2681_v45  ;;  %v2708_v55 = vand.u32 65535, %v2678_v48  ;;  %v2709_v56 = vshrl.u32 %v2678_v48, 16  ;;  %v2728_v44 = vmul.u32 %v4714_v41, %v2674_v17 }
 0x71a   : > { %v2686_v53 = vand.u32 65535, %v2682_v49  ;;  %v2687_v47 = vshrl.u32 %v2682_v49, 16 }
 0x71b   : > { %v2711_v59 = vmul.u32 %v2709_v56, %v2684_v50  ;;  %v2712_v5 = vmul.u32 %v2708_v55, %v2685_v52  ;;  %v2710_v63 = vmul.u32 %v2708_v55, %v2684_v50  ;;  %v2713_v8 = vmul.u32 %v2709_v56, %v2685_v52 }
 0x71c   : > { %v2689_v57 = vmul.u32 %v2687_v47, %v2684_v50  ;;  %v2690_v58 = vmul.u32 %v2686_v53, %v2685_v52  ;;  %v2688_v60 = vmul.u32 %v2686_v53, %v2684_v50  ;;  %v2691_v62 = vmul.u32 %v2687_v47, %v2685_v52 }
 0x71d   : > { %v2714_v4 = vshll.u32 %v2711_v59, 16  ;;  %v2716_v12 = vshll.u32 %v2712_v5, 16  ;;  %v2715_v35 = vshrl.u32 %v2711_v59, 16  ;;  %v2717_v16 = vshrl.u32 %v2712_v5, 16 }
 0x71e   : > { %v2692_v61 = vshll.u32 %v2689_v57, 16  ;;  %v2694_v1 = vshll.u32 %v2690_v58, 16  ;;  %v2693_v29 = vshrl.u32 %v2689_v57, 16  ;;  %v2695_v19 = vshrl.u32 %v2690_v58, 16 }
 0x71f   : > { %vm2718_vm11 = vc.u32 %v2710_v63, %v2714_v4  ;;  %v2720_v13 = vadd.s32 %v2714_v4, %v2710_v63  ;;  %v4755_v63 = vpop.permute.xlu2 %2969 }
 0x720   : > { %vm2696_vm10 = vc.u32 %v2688_v60, %v2692_v61  ;;  %v2698_v7 = vadd.s32 %v2692_v61, %v2688_v60  ;;  %v2719_v18 = vsel %vm2718_vm11, 1, %v4131_v0 }
 0x721   : > { %v2697_v11 = vsel %vm2696_vm10, 1, %v4131_v0  ;;  %v2721_v26 = vadd.s32 %v2719_v18, %v2713_v8  ;;  %vm2722_vm13 = vc.u32 %v2720_v13, %v2716_v12  ;;  %v2724_v28 = vadd.s32 %v2720_v13, %v2716_v12 }
 0x722   : > { %v2699_v15 = vadd.s32 %v2697_v11, %v2691_v62  ;;  %vm2700_vm12 = vc.u32 %v2698_v7, %v2694_v1  ;;  %v2723_v32 = vsel %vm2722_vm13, 1, %v4131_v0  ;;  %v4757_v1 = vpop.eup %3780  ;;  %v3101_v11 = vpop.permute.xlu1 %3100 }
 0x723   : > { %v2701_v24 = vsel %vm2700_vm12, 1, %v4131_v0  ;;  %v2725_v36 = vadd.s32 %v2723_v32, %v2721_v26  ;;  %v2621_v13 = vmul.f32 %v4757_v1, %v4686_v3  ;;  %v3103_v18 = vmul.f32 %v3101_v11, %v4673_v51 }
 0x724   : > { %v2703_v30 = vadd.s32 %v2701_v24, %v2699_v15  ;;  %vm2626_vm3 = vweird.f32 %v4757_v1 }
 0x725   : > { %v2726_v22 = vadd.s32 %v2725_v36, %v2715_v35  ;;  %vm2627_vm5 = vmor %vm2625_vm4, %vm2626_vm3 }
 0x726   : > { %v2704_v9 = vadd.s32 %v2703_v30, %v2693_v29  ;;  %v2622_v29 = vsub.f32 1.0, %v2621_v13 }
 0x727   : > { %v2727_v21 = vadd.s32 %v2726_v22, %v2717_v16 }
 0x728   : > { %v2705_v25 = vadd.s32 %v2704_v9, %v2695_v19  ;;  %v2623_v9 = vmul.f32 %v4757_v1, %v2622_v29 }
 0x729   : > { %v2731_v31 = vadd.s32 1, %v2727_v21 }
 0x72a   : > { %vm2730_vm14 = vc.u32 %v2705_v25, %v2724_v28  ;;  %v2729_v57 = vadd.s32 %v2724_v28, %v2705_v25 }
 0x72b   : > { %v2732_v45 = vsel %vm2730_vm14, %v2731_v31, %v2727_v21  ;;  %v4779_v31 = vsub.f32 0.0, %v4635_v33 }
 0x72c   : > { %v2733_v48 = vadd.s32 %v2732_v45, %v2728_v44  ;;  %v2624_v44 = vadd.f32 %v4757_v1, %v2623_v9 }
 0x72e   : > { %v2734_v39 = vadd.s32 536870912, %v2733_v48 }
 0x730   : > { %v2735_v49 = vshrl.u32 %v2734_v39, 30 }
 0x732   : > { %v2736_v50 = vshll.u32 %v2735_v49, 30  ;;  %v2759_v30 = vsub.s32 4, %v2735_v49 }
 0x734   : > { %v2737_v40 = vsub.s32 %v2733_v48, %v2736_v50  ;;  %v2760_v16 = vsel %vm2637_vm1, %v2759_v30, %v2735_v49  ;;  %v2948_v30 = vsub.f32 0.0, %v4665_v46 }
 0x735   : > { %v2762_v17 = vsel %vm2636_vm2, 0, %v2760_v16 }
 0x736   : > { %vm2738_vm15 = vcmp.lt.s32.totalorder %v2737_v40, 0  ;;  %v2739_v52 = vsub.s32 0, %v2737_v40 }
 0x738   : > { %v2740_v53 = vsel %vm2738_vm15, %v2739_v52, %v2737_v40  ;;  %v2779_v52 = vadd.s32 3, %v2762_v17 }
 0x739   : > { %v2741_v47 = vclz %v2740_v53 }
 0x73b   : > { %v3625_v55 = vadd.s32 4294967294, %v2741_v47 }
 0x73d   : > { %vm3626_vm0 = vcmp.lt.s32.totalorder %v3625_v55, 0 }
 0x73e   : > { %v2744_v56 = vsel %vm3626_vm0, 0, %v3625_v55 }
 0x73f   : > { %v2745_v58 = vsub.s32 32, %v2744_v56  ;;  %v2749_v59 = vsub.s32 4294967266, %v2744_v56  ;;  %v2746_v41 = vshll.u32 %v2737_v40, %v2744_v56  ;;  %v2631_v40 = vand.u32 2147483648, %v4686_v3 }
 0x741   : > { %v2747_v5 = vshrl.u32 %v2729_v57, %v2745_v58  ;;  %v2750_v60 = vadd.s32 127, %v2749_v59  ;;  %v2936_v59 = vand.u32 3, %v2762_v17 }
 0x743   : > { %v2748_v61 = vor.u32 %v2747_v5, %v2746_v41  ;;  %v2751_v62 = vshll.u32 %v2750_v60, 23  ;;  %v2632_v41 = vor.u32 1.1754944e-38, %v2631_v40  ;;  %v2780_v5 = vand.u32 3, %v2779_v52 }
 0x744   : > { %vm2937_vm7 = vcmp.lt.s32.totalorder %v2936_v59, 2  ;;  %vm2938_vm8 = vcmp.eq.s32.totalorder %v2936_v59, 0  ;;  %vm2941_vm9 = vcmp.eq.s32.totalorder %v2936_v59, 2 }
 0x745   : > { %v2752_v4 = vor.u32 4788187, %v2751_v62  ;;  %v2755_v8 = vcvt.s32.f32 %v2748_v61  ;;  %v2596_v62 = vmul.f32 0.1, %v4635_v33  ;;  %vm2781_vm10 = vcmp.lt.s32.totalorder %v2780_v5, 2 }
 0x746   : > { %vm2782_vm11 = vcmp.eq.s32.totalorder %v2780_v5, 0  ;;  %vm2785_vm12 = vcmp.eq.s32.totalorder %v2780_v5, 2 }
 0x747   : > { %v2753_v7 = vand.u32 2147483647, %v2752_v4 }
 0x749   : > { %v2756_v12 = vmul.f32 %v2755_v8, %v2753_v7 }
 0x74b   : > { %v2757_v15 = vxor.u32 2147483648, %v2756_v12 }
 0x74d   : > { %v2758_v24 = vsel %vm2637_vm1, %v2757_v15, %v2756_v12  ;;  %v2977_v15 = vadd.f32 %v4667_v38, %v4639_v34 }
 0x74e   : > { %v2761_v32 = vsel %vm2636_vm2, %v4686_v3, %v2758_v24 }
 0x74f   : > { %v3111_v20 = vpop.permute.xlu2 %3110  ;;  %v2763_v36 = vmul.f32 %v2761_v32, %v2761_v32 }
 0x750   : > { %v3113_v26 = vsub.f32 %v3103_v18, %v3111_v20  ;;  %v3138_v27 = vadd.f32 %v3111_v20, %v3103_v18 }
 0x751   : > { %v3090_v35 = vpop.permute.xlu0 %3089  ;;  %v2764_v14 = vmul.f32 -0.001358992, %v2763_v36  ;;  %v2771_v19 = vmul.f32 -0.00019511016, %v2763_v36  ;;  %v3145_v28 = vpop.permute.xlu1 %3144 }
 0x752   : > { %v3092_v43 = vadd.f32 %v3090_v35, %v4690_v6  ;;  %3115 = vrot.lane.b32.xlu0 %v3113_v26, %s4139_s25  ;;  %3140 = vrot.lane.b32.xlu1 %v3138_v27, %s4139_s25  ;;  %v3147_v49 = vadd.f32 %v3145_v28, %v4678_v54  ;;  %v2978_v35 = vsub.f32 0.0, %v2977_v15 }
 0x753   : > { %v2765_v22 = vadd.f32 0.041655596, %v2764_v14  ;;  %v2772_v25 = vadd.f32 0.008332121, %v2771_v19 }
 0x754   : > { %3094 = vrot.lane.b32.xlu2 %v3092_v43, %s4141_s1 }
 0x755   : > { %v2766_v6 = vmul.f32 %v2765_v22, %v2763_v36  ;;  %v2773_v21 = vmul.f32 %v2772_v25, %v2763_v36 }
 0x757   : > { %v2767_v48 = vadd.f32 -0.4999988, %v2766_v6  ;;  %v2774_v39 = vadd.f32 -0.16666654, %v2773_v21  ;;  %v3130_v53 = vpop.permute.xlu2 %3129  ;;  %v3055_v6 = vmul.f32 %v4628_v37, %v4628_v37 }
 0x759   : > { %v3121_v45 = vpop.permute.xlu0 %3120  ;;  %v2768_v47 = vmul.f32 %v2767_v48, %v2763_v36  ;;  %v2775_v55 = vmul.f32 %v2774_v39, %v2763_v36  ;;  %v2965_v36 = vmul.f32 %v4752_v23, %v4635_v33 }
 0x75a   : > { %v3123_v50 = vmul.f32 %v3121_v45, %v4673_v51  ;;  %2957 = vrot.lane.b32.xlu0 %v4779_v31, %s4141_s1  ;;  %v2628_v51 = vsel %vm2627_vm5, %v4757_v1, %v2624_v44 }
 0x75b   : > { %v2769_v57 = vadd.f32 1.0, %v2768_v47  ;;  %v2776_v58 = vadd.f32 1.0, %v2775_v55  ;;  %v2633_v4 = vsel %vm2630_vm6, %v2632_v41, %v2628_v51 }
 0x75c   : > { %v3132_v56 = vadd.f32 %v3130_v53, %v3123_v50  ;;  %3149 = vrot.lane.b32.xlu2 %v3147_v49, %s4139_s25  ;;  %v3172_v8 = vsub.f32 %v3123_v50, %v3130_v53  ;;  %v2791_v26 = vmul.f32 %v2633_v4, %v2633_v4 }
 0x75d   : > { %v2777_v60 = vmul.f32 %v2776_v58, %v2761_v32  ;;  %v2786_v61 = vxor.u32 2147483648, %v2769_v57 }
 0x75e   : > { %3134 = vrot.lane.b32.xlu1 %v3132_v56, %s4139_s25 }
 0x75f   : > { %v2783_v7 = vxor.u32 2147483648, %v2777_v60  ;;  %v2943_v11 = vsel %vm2941_vm9, %v2786_v61, %v2777_v60  ;;  %v2787_v13 = vsel %vm2785_vm12, %v2786_v61, %v2777_v60  ;;  %v3185_v28 = vpop.permute.xlu2 %3184 }
 0x760   : > { %v3187_v17 = vadd.f32 %v3185_v28, %v4678_v54 }
 0x761   : > { %v2940_v1 = vsel %vm2938_vm8, %v2769_v57, %v2783_v7  ;;  %v2784_v12 = vsel %vm2782_vm11, %v2769_v57, %v2783_v7  ;;  %v3155_v43 = vpop.permute.xlu0 %3154 }
 0x762   : > { %3240 = vrot.lane.b32.xlu0 %v2596_v62, %s4143_s7  ;;  %v2944_v10 = vsel %vm2937_vm7, %v2940_v1, %v2943_v11  ;;  %v2788_v18 = vsel %vm2781_vm10, %v2784_v12, %v2787_v13  ;;  %v3157_v9 = vmul.f32 %v3155_v43, %v4656_v42 }
 0x763   : > { %v2945_v20 = vsel %vm2625_vm4, nan, %v2944_v10  ;;  %v2789_v24 = vsel %vm2625_vm4, nan, %v2788_v18 }
 0x764   : > { %3174 = vrot.lane.b32.xlu2 %v3172_v8, %s4139_s25  ;;  %v2946_v27 = vsub.f32 1.0, %v2945_v20  ;;  %v4806_v29 = vmul.f32 %v2789_v24, %v2633_v4 }
 0x766   : > { %v4809_v32 = vmul.f32 %v2946_v27, %v2791_v26  ;;  %v4815_v34 = vmul.f32 %v4779_v31, %v4806_v29  ;;  %v2975_v3 = vmul.f32 %v4755_v63, %v4806_v29 }
 0x767   : > { %v3071_v48 = vpop.permute.xlu2 %3070 }
 0x768   : > { %v4819_v38 = vmul.f32 %v2978_v35, %v4809_v32  ;;  %v4824_v46 = vmul.f32 %v2965_v36, %v4809_v32  ;;  %v4827_v14 = vmul.f32 %v2948_v30, %v4809_v32 }
 0x769   : > { %v3059_v42 = vpop.permute.xlu0 %3058 }
 0x76a   : > { %3249 = vrot.lane.b32.xlu0 %v2596_v62, %s4142_s27  ;;  %v4831_v19 = vadd.f32 %v2975_v3, %v4824_v46  ;;  %v3061_v44 = vadd.f32 %v3059_v42, %v3055_v6  ;;  %v2980_v27 = vadd.f32 1.0, %v4819_v38 }
 0x76c   : > { %2950 = vrot.lane.b32.xlu2 %v2948_v30, %s4139_s25 }
 0x76f   : > { %v3164_v16 = vpop.permute.xlu1 %3163 }
 0x770   : > { %v3166_v22 = vsub.f32 %v3157_v9, %v3164_v16  ;;  %v3178_v25 = vadd.f32 %v3164_v16, %v3157_v9 }
 0x772   : > { %2983 = vrot.lane.b32.xlu0 %v2965_v36, %s4139_s25  ;;  %3168 = vrot.lane.b32.xlu1 %v3166_v22, %s4141_s1 }
 0x774   : > { %3180 = vrot.lane.b32.xlu2 %v3178_v25, %s4141_s1 }
 0x777   : > { %v3065_v21 = vpop.permute.xlu1 %3064 }
 0x778   : > { %v3067_v45 = vadd.f32 %v3065_v21, %v3061_v44 }
 0x77a   : > { %3189 = vrot.lane.b32.xlu0 %v3187_v17, %s4139_s25  ;;  %2988 = vrot.lane.b32.xlu1 %v4779_v31, %s4139_s25  ;;  %v3073_v39 = vadd.f32 %v3071_v48, %v3067_v45  ;;  %v4145_v48 = vmov 3  }
 0x77b   : > { %3764 = vset.pattern.permute.xlu0 %v4145_v48  ;;  %3763 = vset.pattern.permute.xlu2 %v4145_v48 }
 0x77c   : > { %3782 = vrcp.f32 %v3073_v39  ;;  %v3085_v31 = vand.u32 2147483648, %v3073_v39  ;;  %vm3079_vm14 = vweird.f32 %v3073_v39  ;;  %v3083_v55 = vand.u32 2147483647, %v3073_v39  ;;  %3765 = vset.pattern.permute.xlu1 %v4145_v48 }
 0x77e   : > { %v3086_v37 = vor.u32 1.1754944e-38, %v3085_v31  ;;  %vm3084_vm0 = vcmp.eq.f32.partialorder %v3083_v55, 8.507059e+37  ;;  %v2993_v55 = vmul.f32 %v4806_v29, %v4635_v33 }
 0x782   : > { %3258 = vrot.lane.b32.xlu1 %v2596_v62, %s4144_s5  ;;  %v3783_v49 = vpop.eup %3782 }
 0x783   : > { %v3075_v50 = vmul.f32 %v3783_v49, %v3073_v39  ;;  %vm3080_vm13 = vweird.f32 %v3783_v49 }
 0x784   : > { %vm3081_vm15 = vmor %vm3079_vm14, %vm3080_vm13 }
 0x785   : > { %v3076_v40 = vsub.f32 1.0, %v3075_v50 }
 0x787   : > { %v3077_v52 = vmul.f32 %v3783_v49, %v3076_v40 }
 0x789   : > { %v3078_v47 = vadd.f32 %v3783_v49, %v3077_v52  ;;  %v2968_v52 = vmul.f32 %v4752_v23, %v4806_v29  ;;  %v2996_v23 = vadd.f32 1.0, %v4827_v14 }
 0x78b   : > { %v3082_v56 = vsel %vm3081_vm15, %v3783_v49, %v3078_v47 }
 0x78c   : > { %v3087_v51 = vsel %vm3084_vm0, %v3086_v37, %v3082_v56 }
 0x78d   : > { %v4844_v58 = vmul.f32 2.0, %v3087_v51 }
 0x7ae   : > { %v3095_v54 = vpop.permute.xlu2 %3094 }
 0x7af   : > { %v3097_v5 = vmul.f32 %v3095_v54, %v4844_v58  ;;  %v2972_v54 = vmul.f32 %v4755_v63, %v4635_v33 }
 0x7b1   : > { %v3098_v8 = vsub.f32 1.0, %v3097_v5  ;;  %v2973_v40 = vmul.f32 %v2972_v54, %v4809_v32  ;;  %v4146_v54 = vmov 2  }
 0x7b3   : > { %v2974_v37 = vadd.f32 %v2973_v40, %v2968_v52 }
 0x7b5   : > { %v3204_v5 = vmul.f32 %v3098_v8, %v2974_v37 }
 0x7b6   : > { %v3150_v53 = vpop.permute.xlu2 %3149 }
 0x7b7   : > { %v3152_v59 = vmul.f32 %v3150_v53, %v4844_v58 }
 0x7b9   : > { %v4848_v62 = vsub.f32 1.0, %v3152_v59 }
 0x7bb   : > { %v3210_v15 = vmul.f32 %v4848_v62, %v4831_v19  ;;  %v3215_v43 = vmul.f32 %v4848_v62, %v2980_v27 }
 0x7be   : > { %v3175_v57 = vpop.permute.xlu2 %3174 }
 0x7bf   : > { %v4863_v35 = vmul.f32 %v3175_v57, %v4844_v58 }
 0x7c4   : > { %v3116_v41 = vpop.permute.xlu0 %3115  ;;  %v3141_v60 = vpop.permute.xlu1 %3140 }
 0x7c5   : > { %v3118_v4 = vmul.f32 %v3116_v41, %v4844_v58  ;;  %v3143_v1 = vmul.f32 %v3141_v60, %v4844_v58  ;;  %v3234_v60 = vmul.f32 %v4863_v35, %v2974_v37 }
 0x7c6   : > { %v2951_v61 = vpop.permute.xlu2 %2950 }
 0x7c7   : > { %v2953_v7 = vmul.f32 %v2951_v61, %v4809_v32  ;;  %v3195_v10 = vmul.f32 %v3118_v4, %v4831_v19  ;;  %v3200_v25 = vmul.f32 %v3118_v4, %v2980_v27  ;;  %v3219_v41 = vmul.f32 %v3143_v1, %v2974_v37 }
 0x7c9   : > { %v2954_v11 = vadd.f32 1.0, %v2953_v7 }
 0x7cb   : > { %v3194_v12 = vmul.f32 %v3098_v8, %v2954_v11  ;;  %v3209_v13 = vmul.f32 %v3143_v1, %v2954_v11  ;;  %v3224_v28 = vmul.f32 %v4863_v35, %v2954_v11 }
 0x7cc   : > { %v2958_v18 = vpop.permute.xlu0 %2957 }
 0x7cd   : > { %v2960_v20 = vmul.f32 %v2958_v18, %v4806_v29  ;;  %v4857_v24 = vadd.f32 %v3195_v10, %v3194_v12  ;;  %v4859_v26 = vadd.f32 %v3210_v15, %v3209_v13 }
 0x7ce   : > { %v3181_v30 = vpop.permute.xlu2 %3180 }
 0x7cf   : > { %v2967_v36 = vadd.f32 %v4824_v46, %v2960_v20  ;;  %v3183_v3 = vmul.f32 %v3181_v30, %v4844_v58 }
 0x7d0   : > { %v3135_v39 = vpop.permute.xlu1 %3134 }
 0x7d1   : > { %v3199_v9 = vmul.f32 %v3098_v8, %v2967_v36  ;;  %v3214_v16 = vmul.f32 %v3143_v1, %v2967_v36  ;;  %v3229_v22 = vmul.f32 %v4863_v35, %v2967_v36  ;;  %v3225_v17 = vmul.f32 %v3183_v3, %v4831_v19 }
 0x7d2   : > { %v3230_v38 = vmul.f32 %v3183_v3, %v2980_v27  ;;  %v3137_v51 = vmul.f32 %v3135_v39, %v4844_v58 }
 0x7d3   : > { %v3201_v42 = vadd.f32 %v3200_v25, %v3199_v9  ;;  %v3216_v6 = vadd.f32 %v3215_v43, %v3214_v16  ;;  %v3226_v44 = vadd.f32 %v3225_v17, %v3224_v28 }
 0x7d4   : > { %v4871_v21 = vpop.permute.xlu0 %3240  ;;  %v4873_v46 = vadd.f32 %v3230_v38, %v3229_v22  ;;  %v3207_v12 = vmul.f32 %v3137_v51, %v2996_v23 }
 0x7d5   : > { %v3243_v45 = vmul.f32 %v4871_v21, %v3098_v8  ;;  %v3267_v19 = vmul.f32 %v4871_v21, %v3143_v1  ;;  %v3285_v48 = vmul.f32 %v4871_v21, %v4863_v35 }
 0x7d7   : > { %3245 = vrot.lane.b32.xlu2 %v3243_v45, %s4140_s18 }
 0x7dc   : > { %v3250_v49 = vpop.permute.xlu0 %3249 }
 0x7dd   : > { %v3252_v50 = vmul.f32 %v3250_v49, %v3118_v4  ;;  %v3273_v31 = vmul.f32 %v3250_v49, %v4848_v62  ;;  %v3291_v20 = vmul.f32 %v3250_v49, %v3183_v3 }
 0x7df   : > { %3269 = vrot.lane.b32.xlu2 %v3267_v19, %s4141_s1  ;;  %3254 = vrot.lane.b32.xlu0 %v3252_v50, %s4140_s18 }
 0x7e4   : > { %v3169_v53 = vpop.permute.xlu1 %3168  ;;  %v2984_v47 = vpop.permute.xlu0 %2983 }
 0x7e5   : > { %v2986_v56 = vmul.f32 %v2984_v47, %v4809_v32  ;;  %v3171_v57 = vmul.f32 %v3169_v53, %v4844_v58 }
 0x7e7   : > { %v2987_v63 = vadd.f32 %v2986_v56, %v4815_v34  ;;  %v2994_v59 = vadd.f32 %v2993_v55, %v2986_v56  ;;  %3275 = vrot.lane.b32.xlu0 %v3273_v31, %s4141_s1  ;;  %v3222_v11 = vmul.f32 %v3171_v57, %v2996_v23 }
 0x7e9   : > { %v3205_v61 = vmul.f32 %v3118_v4, %v2987_v63  ;;  %v3220_v33 = vmul.f32 %v4848_v62, %v2987_v63  ;;  %v3235_v32 = vmul.f32 %v3183_v3, %v2987_v63  ;;  %v3202_v7 = vmul.f32 %v3137_v51, %v2994_v59 }
 0x7ea   : > { %v3217_v13 = vmul.f32 %v3171_v57, %v2994_v59  ;;  %v3303_v63 = vlaneseq }
 0x7eb   : > { %v3203_v10 = vadd.f32 %v3202_v7, %v3201_v42  ;;  %v3221_v15 = vadd.f32 %v3220_v33, %v3219_v41  ;;  %v3206_v34 = vadd.f32 %v3205_v61, %v3204_v5  ;;  %v3236_v18 = vadd.f32 %v3235_v32, %v3234_v60 }
 0x7ec   : > { %v2989_v27 = vpop.permute.xlu1 %2988  ;;  %v3190_v30 = vpop.permute.xlu0 %3189  ;;  %v3218_v14 = vadd.f32 %v3217_v13, %v3216_v6 }
 0x7ed   : > { %v2991_v8 = vmul.f32 %v2989_v27, %v4806_v29  ;;  %v3192_v1 = vmul.f32 %v3190_v30, %v4844_v58  ;;  %v3223_v4 = vadd.f32 %v3222_v11, %v3221_v15  ;;  %v3208_v36 = vadd.f32 %v3207_v12, %v3206_v34 }
 0x7ef   : > { %v2992_v62 = vadd.f32 %v2991_v8, %v2973_v40  ;;  %v3193_v43 = vsub.f32 1.0, %v3192_v1  ;;  %3293 = vrot.lane.b32.xlu0 %v3291_v20, %s4139_s25 }
 0x7f1   : > { %v3197_v9 = vmul.f32 %v3137_v51, %v2992_v62  ;;  %v3227_v16 = vmul.f32 %v3193_v43, %v2992_v62  ;;  %v3212_v22 = vmul.f32 %v3171_v57, %v2992_v62  ;;  %v3237_v25 = vmul.f32 %v3193_v43, %v2996_v23 }
 0x7f2   : > { %v3232_v28 = vmul.f32 %v3193_v43, %v2994_v59  ;;  %v3304_v59 = vand.u32 127, %v3303_v63 }
 0x7f3   : > { %v3198_v3 = vadd.f32 %v3197_v9, %v4857_v24  ;;  %v3228_v17 = vadd.f32 %v3227_v16, %v3226_v44  ;;  %v3213_v38 = vadd.f32 %v3212_v22, %v4859_v26  ;;  %v3238_v42 = vadd.f32 %v3237_v25, %v3236_v18  ;;  %v3784_v44 = vld [vmem:[%s4604_s26] sm:$0xff]  ;;  %s915_s26 = scalar_lea.vmem %s4942_s24, %s4401_s29 }
 0x7f4   : > { %v3259_v29 = vpop.permute.xlu1 %3258  ;;  %v3233_v58 = vadd.f32 %v3232_v28, %v4873_v46  ;;  %v2998_v46 = vmul.f32 0.1, %v3784_v44  ;;  %vm3315_vm1 = vcmp.eq.s32.totalorder %v3304_v59, 1  ;;  %vm3305_vm2 = vcmp.eq.s32.totalorder %v3304_v59, 0 }
 0x7f5   : > { %v3261_v6 = vmul.f32 %v3259_v29, %v3137_v51  ;;  %v3279_v45 = vmul.f32 %v3259_v29, %v3171_v57  ;;  %v3297_v24 = vmul.f32 %v3259_v29, %v3193_v43  ;;  %vm3325_vm3 = vcmp.eq.s32.totalorder %v3304_v59, 2 }
 0x7f6   : > { %vm3335_vm4 = vcmp.eq.s32.totalorder %v3304_v59, 3  ;;  %vm3345_vm5 = vcmp.eq.s32.totalorder %v3304_v59, 4  ;;  %vm3355_vm6 = vcmp.eq.s32.totalorder %v3304_v59, 5  ;;  %vm3365_vm7 = vcmp.eq.s32.totalorder %v3304_v59, 6 }
 0x7f7   : > { %3263 = vrot.lane.b32.xlu1 %v3261_v6, %s4140_s18  ;;  %3281 = vrot.lane.b32.xlu2 %v3279_v45, %s4141_s1  ;;  %vm3375_vm8 = vcmp.eq.s32.totalorder %v3304_v59, 7  ;;  %vm3385_vm9 = vcmp.eq.s32.totalorder %v3304_v59, 8  ;;  %vm3395_vm10 = vcmp.eq.s32.totalorder %v3304_v59, 9  ;;  %vm3405_vm11 = vcmp.eq.s32.totalorder %v3304_v59, 10 }
 0x7f8   : > { %3320 = vperm.xlu0 %3764, %v3203_v10   ;;  %vm3415_vm12 = vcmp.eq.s32.totalorder %v3304_v59, 11 }
 0x7ff   : > { %3287 = vrot.lane.b32.xlu1 %v3285_v48, %s4139_s25  ;;  %3310 = vperm.xlu2 %3763, %v3198_v3  }
 0x800   : > { %3370 = vperm.xlu0 %3764, %v3228_v17  }
 0x807   : > { %3340 = vperm.xlu2 %3763, %v3213_v38   ;;  %3299 = vrot.lane.b32.xlu1 %v3297_v24, %s4139_s25 }
 0x808   : > { %3766 = vset.pattern.permute.xlu0 %v4131_v0 }
 0x80f   : > { %3360 = vperm.xlu2 %3763, %v3223_v4   ;;  %3330 = vperm.xlu1 %3765, %v3208_v36  }
 0x817   : > { %3350 = vperm.xlu1 %3765, %v3218_v14   ;;  %3390 = vperm.xlu2 %3763, %v3238_v42  }
 0x81f   : > { %3380 = vperm.xlu1 %3765, %v3233_v58   ;;  %3768 = vset.pattern.permute.xlu2 %v4146_v54 }
 0x827   : > { %3767 = vset.pattern.permute.xlu1 %v4132_v2 }
 0x831   : > { %v3246_v26 = vpop.permute.xlu2 %3245 }
 0x832   : > { %v3248_v0 = vadd.f32 %v3246_v26, %v2998_v46 }
 0x839   : > { %v3270_v21 = vpop.permute.xlu2 %3269 }
 0x83a   : > { %v3272_v39 = vadd.f32 %v3270_v21, %v2998_v46 }
 0x851   : > { %v3255_v35 = vpop.permute.xlu0 %3254  ;;  %v3282_v50 = vpop.permute.xlu2 %3281 }
 0x852   : > { %v3257_v52 = vadd.f32 %v3255_v35, %v3248_v0 }
 0x859   : > { %v3276_v49 = vpop.permute.xlu0 %3275  ;;  %v3311_v57 = vpop.permute.xlu2 %3310 }
 0x85a   : > { %v3278_v19 = vadd.f32 %v3276_v49, %v3272_v39  ;;  %v3313_v61 = vsel %vm3305_vm2, %v3311_v57, 0.0 }
 0x85c   : > { %v3284_v40 = vadd.f32 %v3282_v50, %v3278_v19 }
 0x85e   : > { %3410 = vperm.xlu1 %3767, %v3284_v40  }
 0x861   : > { %v3294_v55 = vpop.permute.xlu0 %3293  ;;  %v3341_v5 = vpop.permute.xlu2 %3340 }
 0x862   : > { %v3343_v12 = vsel %vm3335_vm4, %v3341_v5, 0.0 }
 0x869   : > { %v3264_v53 = vpop.permute.xlu1 %3263  ;;  %v3361_v10 = vpop.permute.xlu2 %3360 }
 0x86a   : > { %v3266_v47 = vadd.f32 %v3264_v53, %v3257_v52  ;;  %v3321_v41 = vpop.permute.xlu0 %3320  ;;  %v3363_v18 = vsel %vm3355_vm6, %v3361_v10, 0.0 }
 0x86b   : > { %v3323_v60 = vsel %vm3315_vm1, %v3321_v41, 0.0 }
 0x86c   : > { %3400 = vperm.xlu0 %3766, %v3266_v47   ;;  %v3324_v32 = vadd.f32 %v3323_v60, %v3313_v61 }
 0x871   : > { %v3288_v31 = vpop.permute.xlu1 %3287  ;;  %v3391_v1 = vpop.permute.xlu2 %3390 }
 0x872   : > { %v3290_v2 = vadd.f32 %v3288_v31, %v2998_v46  ;;  %v3371_v20 = vpop.permute.xlu0 %3370  ;;  %v3393_v62 = vsel %vm3385_vm9, %v3391_v1, 0.0 }
 0x873   : > { %v3373_v14 = vsel %vm3365_vm7, %v3371_v20, 0.0 }
 0x874   : > { %3769 = vset.pattern.permute.xlu0 %v4146_v54  ;;  %v3296_v56 = vadd.f32 %v3294_v55, %v3290_v2 }
 0x879   : > { %v3300_v37 = vpop.permute.xlu1 %3299 }
 0x87a   : > { %v3302_v51 = vadd.f32 %v3300_v37, %v3296_v56 }
 0x87c   : > { %3420 = vperm.xlu2 %3768, %v3302_v51  }
 0x881   : > { %v3331_v23 = vpop.permute.xlu1 %3330 }
 0x882   : > { %v3333_v33 = vsel %vm3325_vm3, %v3331_v23, 0.0 }
 0x883   : > { %v3334_v7 = vadd.f32 %v3333_v33, %v3324_v32 }
 0x885   : > { %v3344_v15 = vadd.f32 %v3343_v12, %v3334_v7 }
 0x889   : > { %v3351_v11 = vpop.permute.xlu1 %3350 }
 0x88a   : > { %v3353_v13 = vsel %vm3345_vm5, %v3351_v11, 0.0 }
 0x88b   : > { %v3354_v34 = vadd.f32 %v3353_v13, %v3344_v15 }
 0x88d   : > { %v3364_v27 = vadd.f32 %v3363_v18, %v3354_v34 }
 0x88f   : > { %v3374_v4 = vadd.f32 %v3373_v14, %v3364_v27 }
 0x891   : > { %v3381_v30 = vpop.permute.xlu1 %3380 }
 0x892   : > { %v3383_v8 = vsel %vm3375_vm8, %v3381_v30, 0.0 }
 0x893   : > { %v3384_v36 = vadd.f32 %v3383_v8, %v3374_v4 }
 0x895   : > { %v3394_v9 = vadd.f32 %v3393_v62, %v3384_v36 }
 0x8d0   : > { %v3411_v43 = vpop.permute.xlu1 %3410 }
 0x8d1   : > { %v3413_v3 = vsel %vm3405_vm11, %v3411_v43, 0.0 }
 0x8d6   : > { %v3421_v25 = vpop.permute.xlu2 %3420 }
 0x8d7   : > { %v3423_v38 = vsel %vm3415_vm12, %v3421_v25, 0.0 }
 0x8de   : > { %v3401_v16 = vpop.permute.xlu0 %3400 }
 0x8df   : > { %v3403_v22 = vsel %vm3395_vm10, %v3401_v16, 0.0 }
 0x8e0   : > { %v3404_v28 = vadd.f32 %v3403_v22, %v3394_v9 }
 0x8e2   : > { %v3414_v17 = vadd.f32 %v3413_v3, %v3404_v28 }
 0x8e4   : > { %v3424_v42 = vadd.f32 %v3423_v38, %v3414_v17 }
 0x8e6   : > { %3425 = vst [vmem:[%s915_s26] sm:$0xff] %v3424_v42 }
 0x8e7 PF: > { %s4975_s25 = sld [smem:[#allocation24_spill]] }
 0x8ed   : > { %s40_s5 = sadd.s32 1, %s4975_s25  }
 0x8ee   : > { %p37_p7 = scmp.ge.s32.totalorder %s40_s5, 4  }
 0x8f0   :  { %39 = sbr.rel (!%p37_p7) target bundleno = 19 (0x13), region = 190 }
 0x8f5   :  { %3445 = vsyncpa [#allocation3], 1 }
 0x8f6   :  { %3447 = vsyncpa [#allocation3 + $0x1], 1 }
 0x8f7   :  { %3448 = vsyncpa [#allocation5], 1 }
 0x8f8   :  { %3449 = vsyncpa [#allocation8], 1 }
 0x8f9   :  { %3450 = vsyncpa [#allocation11], 1 }
 0x8fa   :  { %3451 = vsyncpa [#allocation14], 1 }
 0x8fb   :  { %3452 = vsyncpa [#allocation17], 1 }

</bundles_post_ra>
